<compile_context>
chip_gen: v5e
topology: v5e:2x2
jax: 0.10.0
libtpu: 0.0.40
codegen_flags: <defaults>
</compile_context>

<pallas_src>
import jax
import jax.numpy as jnp
from jax.experimental import pallas as pl
from jax.experimental.pallas import tpu as pltpu


def _cvae_kernel(
    x2d_ref, cond_ref, eps_ref,
    w_xg_ref, w_cg_ref, b_g_ref,           # folded x / cond / bias -> encoder gates
    w_hh_ref,                               # encoder recurrent weights (H, 4H)
    w_mean_ref, b_mean_ref, w_lv_ref, b_lv_ref,
    w_dz_ref, w_dc_ref, b_d_ref,            # decoder LSTM input weights
    w_fc_ref, b_fc_ref,
    out_ref,                                 # packed (B, slab_w) f32 output
    pre_scr_ref,                             # VMEM scratch (B, T, 4H) f32
):
    f32 = jnp.float32
    bf16 = jnp.bfloat16

    B, T, _ = pre_scr_ref.shape
    H = w_hh_ref.shape[0]
    L = eps_ref.shape[1]
    D = w_fc_ref.shape[1]

    cond = cond_ref[...]                                              # (B, C)

    # Loop-invariant gate bias: (cond @ W_emb_c + b_emb) @ W_ih + b_ih + b_hh.
    gate_bias = (
        jnp.dot(cond.astype(bf16), w_cg_ref[...], preferred_element_type=f32)
        + b_g_ref[...]
    )                                                                 # (B, 4H)

    # Hoisted input projection for ALL timesteps: one well-shaped matmul,
    # with the loop-invariant bias folded in once.
    pre_all = jnp.dot(x2d_ref[...].astype(bf16), w_xg_ref[...],
                      preferred_element_type=f32)                     # (B*T, 4H)
    pre_scr_ref[...] = pre_all.reshape(B, T, 4 * H) + gate_bias[:, None, :]

    w_hh = w_hh_ref[...]                                              # (H, 4H) bf16

    # ---- encoder recurrence: serial chain is only h @ W_hh + gates ----------
    # T is small here, so a full static unroll is cheapest.
    # TODO(synk): for long sequences move T onto the pallas grid (carry h/c in
    # VMEM scratch) or use lax.fori_loop with partial unroll.
    h = jnp.zeros((B, H), f32)
    c = jnp.zeros((B, H), f32)
    for t in range(T):
        pre = pre_scr_ref[:, t, :] + jnp.dot(
            h.astype(bf16), w_hh, preferred_element_type=f32)         # (B, 4H)
        # PyTorch LSTM gate order: i, f, g, o.
        # NOTE: with H not a multiple of 128 these are sub-tile lane slices;
        # acceptable at H=32, revisit if hidden_dim is scaled up.
        i = jax.nn.sigmoid(pre[:, 0 * H:1 * H])
        f = jax.nn.sigmoid(pre[:, 1 * H:2 * H])
        g = jnp.tanh(pre[:, 2 * H:3 * H])
        o = jax.nn.sigmoid(pre[:, 3 * H:4 * H])
        c = f * c + i * g
        h = o * jnp.tanh(c)

    # ---- latent heads + reparameterization ----------------------------------
    h_b = h.astype(bf16)
    mean = jnp.dot(h_b, w_mean_ref[...], preferred_element_type=f32) + b_mean_ref[...]
    logvar = jnp.dot(h_b, w_lv_ref[...], preferred_element_type=f32) + b_lv_ref[...]
    z = mean + eps_ref[...] * jnp.exp(0.5 * logvar)

    # ---- decoder: one LSTM step with zero initial state ----------------------
    pre_d = (jnp.dot(z.astype(bf16), w_dz_ref[...], preferred_element_type=f32)
             + jnp.dot(cond.astype(bf16), w_dc_ref[...], preferred_element_type=f32)
             + b_d_ref[...])                                          # (B, 4H)
    i_d = jax.nn.sigmoid(pre_d[:, 0 * H:1 * H])
    g_d = jnp.tanh(pre_d[:, 2 * H:3 * H])
    o_d = jax.nn.sigmoid(pre_d[:, 3 * H:4 * H])
    # f-gate dropped: c_prev == 0, so f * c_prev == 0 exactly.
    h_d = o_d * jnp.tanh(i_d * g_d)
    x_recon = jnp.dot(h_d.astype(bf16), w_fc_ref[...],
                      preferred_element_type=f32) + b_fc_ref[...]     # (B, D)

    # ---- lane-dense packed output slab (single dense HBM writeback) ---------
    out_ref[...] = jnp.zeros(out_ref.shape, f32)
    out_ref[:, 0 * L:1 * L] = mean
    out_ref[:, 1 * L:2 * L] = logvar
    out_ref[:, 2 * L:3 * L] = z
    out_ref[:, 3 * L:3 * L + D] = x_recon


def init_params(key, input_dim, cond_dim, hidden_dim, latent_dim):
    """Deterministic synthetic parameters, stored transposed for x @ W."""
    D, C, H, L = input_dim, cond_dim, hidden_dim, latent_dim
    keys = jax.random.split(key, 13)
    scale = 0.1

    def rn(k, shape):
        return jax.random.normal(k, shape, jnp.float32) * scale

    w_emb = rn(keys[0], (D + C, H))
    w_emb_x, w_emb_c = w_emb[:D], w_emb[D:]
    b_emb = rn(keys[1], (1, H))

    w_ih_e = rn(keys[2], (H, 4 * H))          # encoder LSTM input weights
    w_hh_e = rn(keys[3], (H, 4 * H))          # encoder LSTM hidden weights
    b_e = rn(keys[4], (1, 4 * H))             # b_ih + b_hh combined

    w_mean = rn(keys[5], (H, L))
    b_mean = rn(keys[6], (1, L))
    w_lv = rn(keys[7], (H, L))
    b_lv = rn(keys[8], (1, L))

    w_ih_d = rn(keys[9], (L + C, 4 * H))      # decoder LSTM input weights
    w_ih_dz, w_ih_dc = w_ih_d[:L], w_ih_d[L:]
    b_d = rn(keys[10], (1, 4 * H))            # b_ih + b_hh combined

    w_fc = rn(keys[11], (H, D))
    b_fc = rn(keys[12], (1, D))

    return (w_emb_x, w_emb_c, b_emb,
            w_ih_e, w_hh_e, b_e,
            w_mean, b_mean, w_lv, b_lv,
            w_ih_dz, w_ih_dc, b_d,
            w_fc, b_fc)


def _fold_params(params):
    """Fold the embedding Linear into the encoder LSTM input weights and cast
    matmul weights to bf16 (f32 biases / accumulation kept)."""
    (w_emb_x, w_emb_c, b_emb, w_ih_e, w_hh_e, b_e,
     w_mean, b_mean, w_lv, b_lv, w_ih_dz, w_ih_dc, b_d, w_fc, b_fc) = params
    bf16 = jnp.bfloat16
    w_xg = jnp.dot(w_emb_x, w_ih_e).astype(bf16)          # (D, 4H)
    w_cg = jnp.dot(w_emb_c, w_ih_e).astype(bf16)          # (C, 4H)
    b_g = jnp.dot(b_emb, w_ih_e) + b_e                    # (1, 4H) f32
    return (w_xg, w_cg, b_g, w_hh_e.astype(bf16),
            w_mean.astype(bf16), b_mean, w_lv.astype(bf16), b_lv,
            w_ih_dz.astype(bf16), w_ih_dc.astype(bf16), b_d,
            w_fc.astype(bf16), b_fc)


@jax.jit
def conditional_vae_forward(x, cond, eps, params):
    """x: (B, T, D), cond: (B, C), eps: (B, L) -> (mean, logvar, z, x_recon)."""
    B, T, D = x.shape
    L = eps.shape[1]
    H = params[4].shape[0]                    # w_hh_e: (H, 4H)

    folded = _fold_params(params)

    # Pad batch to a multiple of 8 sublanes (f32 sublane tile).
    B_pad = pl.cdiv(B, 8) * 8
    if B_pad != B:
        pad = lambda a: jnp.pad(a, ((0, B_pad - B),) + ((0, 0),) * (a.ndim - 1))
        x, cond, eps = pad(x), pad(cond), pad(eps)

    x2d = x.reshape(B_pad * T, D)             # batch-major flatten: zero-copy

    slab_w = max(128, pl.cdiv(3 * L + D, 128) * 128)   # lane-dense output width

    vmem = pl.BlockSpec(memory_space=pltpu.MemorySpace.VMEM)
    n_in = 3 + len(folded)

    # Single tiny invocation: no grid needed.  For large B, add a "parallel"
    # batch grid axis to shard across v7x's two TensorCores.
    slab = pl.pallas_call(
        _cvae_kernel,
        out_shape=jax.ShapeDtypeStruct((B_pad, slab_w), jnp.float32),
        in_specs=[vmem] * n_in,
        out_specs=vmem,
        scratch_shapes=[pltpu.VMEM((B_pad, T, 4 * H), jnp.float32)],
    )(x2d, cond, eps, *folded)

    mean = slab[:B, 0 * L:1 * L]
    logvar = slab[:B, 1 * L:2 * L]
    z = slab[:B, 2 * L:3 * L]
    x_recon = slab[:B, 3 * L:3 * L + D]
    return mean, logvar, z, x_recon


def _reference_forward(x, cond, eps, params):
    """Pure-JAX f32 reference matching the PyTorch module semantics."""
    (w_emb_x, w_emb_c, b_emb, w_ih_e, w_hh_e, b_e,
     w_mean, b_mean, w_lv, b_lv, w_ih_dz, w_ih_dc, b_d, w_fc, b_fc) = params
    B, T, _ = x.shape
    H = w_hh_e.shape[0]

    def cell(pre, c_prev):
        i = jax.nn.sigmoid(pre[:, 0 * H:1 * H])
        f = jax.nn.sigmoid(pre[:, 1 * H:2 * H])
        g = jnp.tanh(pre[:, 2 * H:3 * H])
        o = jax.nn.sigmoid(pre[:, 3 * H:4 * H])
        c = f * c_prev + i * g
        return o * jnp.tanh(c), c

    h = jnp.zeros((B, H), jnp.float32)
    c = jnp.zeros((B, H), jnp.float32)
    for t in range(T):
        e = x[:, t, :] @ w_emb_x + cond @ w_emb_c + b_emb
        pre = e @ w_ih_e + h @ w_hh_e + b_e
        h, c = cell(pre, c)
    mean = h @ w_mean + b_mean
    logvar = h @ w_lv + b_lv
    z = mean + eps * jnp.exp(0.5 * logvar)
    pre_d = z @ w_ih_dz + cond @ w_ih_dc + b_d
    h_d, _ = cell(pre_d, jnp.zeros((B, H), jnp.float32))
    x_recon = h_d @ w_fc + b_fc
    return mean, logvar, z, x_recon


if __name__ == "__main__":
    B, T, D, C, H, L = 2, 8, 4, 3, 32, 16   # batch, seq, input, cond, hidden, latent

    key = jax.random.PRNGKey(0)
    kx, kc, ke, kp = jax.random.split(key, 4)
    x = jax.random.normal(kx, (B, T, D), jnp.float32)
    cond = jax.random.normal(kc, (B, C), jnp.float32)
    eps = jax.random.normal(ke, (B, L), jnp.float32)   # torch.randn_like(std)

    params = init_params(kp, D, C, H, L)

    mean, logvar, z, x_recon = conditional_vae_forward(x, cond, eps, params)
    jax.block_until_ready((mean, logvar, z, x_recon))

    assert mean.shape == (B, L) and logvar.shape == (B, L)
    assert z.shape == (B, L) and x_recon.shape == (B, D)

    # Loose tolerance: kernel matmuls run in bf16 with f32 accumulation.
    ref = _reference_forward(x, cond, eps, params)
    for got, want, name in zip((mean, logvar, z, x_recon), ref,
                               ("mean", "logvar", "z", "x_recon")):
        assert bool(jnp.allclose(got, want, atol=5e-2, rtol=5e-2)), name

    print("KERNEL_OK")
</pallas_src>

<mosaic_0001>
module attributes {stable_mosaic.version = 11 : i64} {
  func.func @_cvae_kernel(%arg0: memref<64x4xf32, #tpu.memory_space<vmem>>, %arg1: memref<8x3xf32, #tpu.memory_space<vmem>>, %arg2: memref<8x16xf32, #tpu.memory_space<vmem>>, %arg3: memref<4x128xbf16, #tpu.memory_space<vmem>>, %arg4: memref<3x128xbf16, #tpu.memory_space<vmem>>, %arg5: memref<1x128xf32, #tpu.memory_space<vmem>>, %arg6: memref<32x128xbf16, #tpu.memory_space<vmem>>, %arg7: memref<32x16xbf16, #tpu.memory_space<vmem>>, %arg8: memref<1x16xf32, #tpu.memory_space<vmem>>, %arg9: memref<32x16xbf16, #tpu.memory_space<vmem>>, %arg10: memref<1x16xf32, #tpu.memory_space<vmem>>, %arg11: memref<16x128xbf16, #tpu.memory_space<vmem>>, %arg12: memref<3x128xbf16, #tpu.memory_space<vmem>>, %arg13: memref<1x128xf32, #tpu.memory_space<vmem>>, %arg14: memref<32x4xbf16, #tpu.memory_space<vmem>>, %arg15: memref<1x4xf32, #tpu.memory_space<vmem>>, %arg16: memref<8x128xf32, #tpu.memory_space<vmem>>, %arg17: memref<8x8x128xf32, #tpu.memory_space<vmem>>) attributes {dimension_semantics = [], scalar_prefetch = 0 : i64, scratch_operands = 1 : i64, tpu.core_type = #tpu.core_type<tc>} {
    %c0 = arith.constant 0 : index
    %c0_0 = arith.constant 0 : index
    %0 = vector.load %arg1[%c0, %c0_0] : memref<8x3xf32, #tpu.memory_space<vmem>>, vector<8x3xf32>
    %1 = arith.truncf %0 : vector<8x3xf32> to vector<8x3xbf16>
    %c0_1 = arith.constant 0 : index
    %c0_2 = arith.constant 0 : index
    %2 = vector.load %arg4[%c0_1, %c0_2] : memref<3x128xbf16, #tpu.memory_space<vmem>>, vector<3x128xbf16>
    %cst = arith.constant dense<0.000000e+00> : vector<8x128xf32>
    %3 = tpu.matmul %1, %2, %cst {dimension_numbers = #tpu.dot_dimension_numbers<[1], [0], [0], [1], [0, 0, 1, 1], [], []>} : vector<8x3xbf16>, vector<3x128xbf16>, vector<8x128xf32> -> vector<8x128xf32>
    %c0_3 = arith.constant 0 : index
    %c0_4 = arith.constant 0 : index
    %4 = vector.load %arg5[%c0_3, %c0_4] : memref<1x128xf32, #tpu.memory_space<vmem>>, vector<1x128xf32>
    %5 = vector.broadcast %4 : vector<1x128xf32> to vector<8x128xf32>
    %6 = arith.addf %3, %5 : vector<8x128xf32>
    %c0_5 = arith.constant 0 : index
    %c0_6 = arith.constant 0 : index
    %7 = vector.load %arg0[%c0_5, %c0_6] : memref<64x4xf32, #tpu.memory_space<vmem>>, vector<64x4xf32>
    %8 = arith.truncf %7 : vector<64x4xf32> to vector<64x4xbf16>
    %c0_7 = arith.constant 0 : index
    %c0_8 = arith.constant 0 : index
    %9 = vector.load %arg3[%c0_7, %c0_8] : memref<4x128xbf16, #tpu.memory_space<vmem>>, vector<4x128xbf16>
    %cst_9 = arith.constant dense<0.000000e+00> : vector<64x128xf32>
    %10 = tpu.matmul %8, %9, %cst_9 {dimension_numbers = #tpu.dot_dimension_numbers<[1], [0], [0], [1], [0, 0, 1, 1], [], []>} : vector<64x4xbf16>, vector<4x128xbf16>, vector<64x128xf32> -> vector<64x128xf32>
    %11 = vector.shape_cast %10 : vector<64x128xf32> to vector<8x8x128xf32>
    %12 = vector.shape_cast %6 : vector<8x128xf32> to vector<8x1x128xf32>
    %13 = vector.broadcast %12 : vector<8x1x128xf32> to vector<8x8x128xf32>
    %14 = arith.addf %11, %13 : vector<8x8x128xf32>
    %c0_10 = arith.constant 0 : index
    %c0_11 = arith.constant 0 : index
    %c0_12 = arith.constant 0 : index
    %15 = vector.load %arg17[%c0_10, %c0_11, %c0_12] : memref<8x8x128xf32, #tpu.memory_space<vmem>>, vector<8x8x128xf32>
    tpu.vector_store %arg17[%c0_10, %c0_11, %c0_12], %14 {strides = array<i32>} : memref<8x8x128xf32, #tpu.memory_space<vmem>>, vector<8x8x128xf32>,
    %c0_13 = arith.constant 0 : index
    %c0_14 = arith.constant 0 : index
    %16 = vector.load %arg6[%c0_13, %c0_14] : memref<32x128xbf16, #tpu.memory_space<vmem>>, vector<32x128xbf16>
    %cst_15 = arith.constant 0.000000e+00 : f32
    %17 = vector.broadcast %cst_15 : f32 to vector<8x32xf32>
    %cst_16 = arith.constant 0.000000e+00 : f32
    %18 = vector.broadcast %cst_16 : f32 to vector<8x32xf32>
    %c0_17 = arith.constant 0 : index
    %c0_18 = arith.constant 0 : index
    %c0_19 = arith.constant 0 : index
    %19 = vector.load %arg17[%c0_17, %c0_18, %c0_19] : memref<8x8x128xf32, #tpu.memory_space<vmem>>, vector<8x1x128xf32>
    %20 = vector.shape_cast %19 : vector<8x1x128xf32> to vector<8x128xf32>
    %21 = arith.truncf %17 : vector<8x32xf32> to vector<8x32xbf16>
    %cst_20 = arith.constant dense<0.000000e+00> : vector<8x128xf32>
    %22 = tpu.matmul %21, %16, %cst_20 {dimension_numbers = #tpu.dot_dimension_numbers<[1], [0], [0], [1], [0, 0, 1, 1], [], []>} : vector<8x32xbf16>, vector<32x128xbf16>, vector<8x128xf32> -> vector<8x128xf32>
    %23 = arith.addf %20, %22 : vector<8x128xf32>
    %24 = vector.extract_strided_slice %23 {offsets = [0, 0], sizes = [8, 32], strides = [1, 1]} : vector<8x128xf32> to vector<8x32xf32>
    %25 = arith.negf %24 : vector<8x32xf32>
    %26 = math.exp %25 : vector<8x32xf32>
    %cst_21 = arith.constant 1.000000e+00 : f32
    %27 = vector.broadcast %cst_21 : f32 to vector<8x32xf32>
    %28 = arith.addf %27, %26 : vector<8x32xf32>
    %29 = arith.divf %27, %28 : vector<8x32xf32>
    %30 = vector.extract_strided_slice %23 {offsets = [0, 32], sizes = [8, 32], strides = [1, 1]} : vector<8x128xf32> to vector<8x32xf32>
    %31 = arith.negf %30 : vector<8x32xf32>
    %32 = math.exp %31 : vector<8x32xf32>
    %cst_22 = arith.constant 1.000000e+00 : f32
    %33 = vector.broadcast %cst_22 : f32 to vector<8x32xf32>
    %34 = arith.addf %33, %32 : vector<8x32xf32>
    %35 = arith.divf %33, %34 : vector<8x32xf32>
    %36 = vector.extract_strided_slice %23 {offsets = [0, 64], sizes = [8, 32], strides = [1, 1]} : vector<8x128xf32> to vector<8x32xf32>
    %37 = math.tanh %36 : vector<8x32xf32>
    %38 = vector.extract_strided_slice %23 {offsets = [0, 96], sizes = [8, 32], strides = [1, 1]} : vector<8x128xf32> to vector<8x32xf32>
    %39 = arith.negf %38 : vector<8x32xf32>
    %40 = math.exp %39 : vector<8x32xf32>
    %cst_23 = arith.constant 1.000000e+00 : f32
    %41 = vector.broadcast %cst_23 : f32 to vector<8x32xf32>
    %42 = arith.addf %41, %40 : vector<8x32xf32>
    %43 = arith.divf %41, %42 : vector<8x32xf32>
    %44 = arith.mulf %35, %18 : vector<8x32xf32>
    %45 = arith.mulf %29, %37 : vector<8x32xf32>
    %46 = arith.addf %44, %45 : vector<8x32xf32>
    %47 = math.tanh %46 : vector<8x32xf32>
    %48 = arith.mulf %43, %47 : vector<8x32xf32>
    %c0_24 = arith.constant 0 : index
    %c1 = arith.constant 1 : index
    %c0_25 = arith.constant 0 : index
    %49 = vector.load %arg17[%c0_24, %c1, %c0_25] : memref<8x8x128xf32, #tpu.memory_space<vmem>>, vector<8x1x128xf32>
    %50 = vector.shape_cast %49 : vector<8x1x128xf32> to vector<8x128xf32>
    %51 = arith.truncf %48 : vector<8x32xf32> to vector<8x32xbf16>
    %cst_26 = arith.constant dense<0.000000e+00> : vector<8x128xf32>
    %52 = tpu.matmul %51, %16, %cst_26 {dimension_numbers = #tpu.dot_dimension_numbers<[1], [0], [0], [1], [0, 0, 1, 1], [], []>} : vector<8x32xbf16>, vector<32x128xbf16>, vector<8x128xf32> -> vector<8x128xf32>
    %53 = arith.addf %50, %52 : vector<8x128xf32>
    %54 = vector.extract_strided_slice %53 {offsets = [0, 0], sizes = [8, 32], strides = [1, 1]} : vector<8x128xf32> to vector<8x32xf32>
    %55 = arith.negf %54 : vector<8x32xf32>
    %56 = math.exp %55 : vector<8x32xf32>
    %cst_27 = arith.constant 1.000000e+00 : f32
    %57 = vector.broadcast %cst_27 : f32 to vector<8x32xf32>
    %58 = arith.addf %57, %56 : vector<8x32xf32>
    %59 = arith.divf %57, %58 : vector<8x32xf32>
    %60 = vector.extract_strided_slice %53 {offsets = [0, 32], sizes = [8, 32], strides = [1, 1]} : vector<8x128xf32> to vector<8x32xf32>
    %61 = arith.negf %60 : vector<8x32xf32>
    %62 = math.exp %61 : vector<8x32xf32>
    %cst_28 = arith.constant 1.000000e+00 : f32
    %63 = vector.broadcast %cst_28 : f32 to vector<8x32xf32>
    %64 = arith.addf %63, %62 : vector<8x32xf32>
    %65 = arith.divf %63, %64 : vector<8x32xf32>
    %66 = vector.extract_strided_slice %53 {offsets = [0, 64], sizes = [8, 32], strides = [1, 1]} : vector<8x128xf32> to vector<8x32xf32>
    %67 = math.tanh %66 : vector<8x32xf32>
    %68 = vector.extract_strided_slice %53 {offsets = [0, 96], sizes = [8, 32], strides = [1, 1]} : vector<8x128xf32> to vector<8x32xf32>
    %69 = arith.negf %68 : vector<8x32xf32>
    %70 = math.exp %69 : vector<8x32xf32>
    %cst_29 = arith.constant 1.000000e+00 : f32
    %71 = vector.broadcast %cst_29 : f32 to vector<8x32xf32>
    %72 = arith.addf %71, %70 : vector<8x32xf32>
    %73 = arith.divf %71, %72 : vector<8x32xf32>
    %74 = arith.mulf %65, %46 : vector<8x32xf32>
    %75 = arith.mulf %59, %67 : vector<8x32xf32>
    %76 = arith.addf %74, %75 : vector<8x32xf32>
    %77 = math.tanh %76 : vector<8x32xf32>
    %78 = arith.mulf %73, %77 : vector<8x32xf32>
    %c0_30 = arith.constant 0 : index
    %c2 = arith.constant 2 : index
    %c0_31 = arith.constant 0 : index
    %79 = vector.load %arg17[%c0_30, %c2, %c0_31] : memref<8x8x128xf32, #tpu.memory_space<vmem>>, vector<8x1x128xf32>
    %80 = vector.shape_cast %79 : vector<8x1x128xf32> to vector<8x128xf32>
    %81 = arith.truncf %78 : vector<8x32xf32> to vector<8x32xbf16>
    %cst_32 = arith.constant dense<0.000000e+00> : vector<8x128xf32>
    %82 = tpu.matmul %81, %16, %cst_32 {dimension_numbers = #tpu.dot_dimension_numbers<[1], [0], [0], [1], [0, 0, 1, 1], [], []>} : vector<8x32xbf16>, vector<32x128xbf16>, vector<8x128xf32> -> vector<8x128xf32>
    %83 = arith.addf %80, %82 : vector<8x128xf32>
    %84 = vector.extract_strided_slice %83 {offsets = [0, 0], sizes = [8, 32], strides = [1, 1]} : vector<8x128xf32> to vector<8x32xf32>
    %85 = arith.negf %84 : vector<8x32xf32>
    %86 = math.exp %85 : vector<8x32xf32>
    %cst_33 = arith.constant 1.000000e+00 : f32
    %87 = vector.broadcast %cst_33 : f32 to vector<8x32xf32>
    %88 = arith.addf %87, %86 : vector<8x32xf32>
    %89 = arith.divf %87, %88 : vector<8x32xf32>
    %90 = vector.extract_strided_slice %83 {offsets = [0, 32], sizes = [8, 32], strides = [1, 1]} : vector<8x128xf32> to vector<8x32xf32>
    %91 = arith.negf %90 : vector<8x32xf32>
    %92 = math.exp %91 : vector<8x32xf32>
    %cst_34 = arith.constant 1.000000e+00 : f32
    %93 = vector.broadcast %cst_34 : f32 to vector<8x32xf32>
    %94 = arith.addf %93, %92 : vector<8x32xf32>
    %95 = arith.divf %93, %94 : vector<8x32xf32>
    %96 = vector.extract_strided_slice %83 {offsets = [0, 64], sizes = [8, 32], strides = [1, 1]} : vector<8x128xf32> to vector<8x32xf32>
    %97 = math.tanh %96 : vector<8x32xf32>
    %98 = vector.extract_strided_slice %83 {offsets = [0, 96], sizes = [8, 32], strides = [1, 1]} : vector<8x128xf32> to vector<8x32xf32>
    %99 = arith.negf %98 : vector<8x32xf32>
    %100 = math.exp %99 : vector<8x32xf32>
    %cst_35 = arith.constant 1.000000e+00 : f32
    %101 = vector.broadcast %cst_35 : f32 to vector<8x32xf32>
    %102 = arith.addf %101, %100 : vector<8x32xf32>
    %103 = arith.divf %101, %102 : vector<8x32xf32>
    %104 = arith.mulf %95, %76 : vector<8x32xf32>
    %105 = arith.mulf %89, %97 : vector<8x32xf32>
    %106 = arith.addf %104, %105 : vector<8x32xf32>
    %107 = math.tanh %106 : vector<8x32xf32>
    %108 = arith.mulf %103, %107 : vector<8x32xf32>
    %c0_36 = arith.constant 0 : index
    %c3 = arith.constant 3 : index
    %c0_37 = arith.constant 0 : index
    %109 = vector.load %arg17[%c0_36, %c3, %c0_37] : memref<8x8x128xf32, #tpu.memory_space<vmem>>, vector<8x1x128xf32>
    %110 = vector.shape_cast %109 : vector<8x1x128xf32> to vector<8x128xf32>
    %111 = arith.truncf %108 : vector<8x32xf32> to vector<8x32xbf16>
    %cst_38 = arith.constant dense<0.000000e+00> : vector<8x128xf32>
    %112 = tpu.matmul %111, %16, %cst_38 {dimension_numbers = #tpu.dot_dimension_numbers<[1], [0], [0], [1], [0, 0, 1, 1], [], []>} : vector<8x32xbf16>, vector<32x128xbf16>, vector<8x128xf32> -> vector<8x128xf32>
    %113 = arith.addf %110, %112 : vector<8x128xf32>
    %114 = vector.extract_strided_slice %113 {offsets = [0, 0], sizes = [8, 32], strides = [1, 1]} : vector<8x128xf32> to vector<8x32xf32>
    %115 = arith.negf %114 : vector<8x32xf32>
    %116 = math.exp %115 : vector<8x32xf32>
    %cst_39 = arith.constant 1.000000e+00 : f32
    %117 = vector.broadcast %cst_39 : f32 to vector<8x32xf32>
    %118 = arith.addf %117, %116 : vector<8x32xf32>
    %119 = arith.divf %117, %118 : vector<8x32xf32>
    %120 = vector.extract_strided_slice %113 {offsets = [0, 32], sizes = [8, 32], strides = [1, 1]} : vector<8x128xf32> to vector<8x32xf32>
    %121 = arith.negf %120 : vector<8x32xf32>
    %122 = math.exp %121 : vector<8x32xf32>
    %cst_40 = arith.constant 1.000000e+00 : f32
    %123 = vector.broadcast %cst_40 : f32 to vector<8x32xf32>
    %124 = arith.addf %123, %122 : vector<8x32xf32>
    %125 = arith.divf %123, %124 : vector<8x32xf32>
    %126 = vector.extract_strided_slice %113 {offsets = [0, 64], sizes = [8, 32], strides = [1, 1]} : vector<8x128xf32> to vector<8x32xf32>
    %127 = math.tanh %126 : vector<8x32xf32>
    %128 = vector.extract_strided_slice %113 {offsets = [0, 96], sizes = [8, 32], strides = [1, 1]} : vector<8x128xf32> to vector<8x32xf32>
    %129 = arith.negf %128 : vector<8x32xf32>
    %130 = math.exp %129 : vector<8x32xf32>
    %cst_41 = arith.constant 1.000000e+00 : f32
    %131 = vector.broadcast %cst_41 : f32 to vector<8x32xf32>
    %132 = arith.addf %131, %130 : vector<8x32xf32>
    %133 = arith.divf %131, %132 : vector<8x32xf32>
    %134 = arith.mulf %125, %106 : vector<8x32xf32>
    %135 = arith.mulf %119, %127 : vector<8x32xf32>
    %136 = arith.addf %134, %135 : vector<8x32xf32>
    %137 = math.tanh %136 : vector<8x32xf32>
    %138 = arith.mulf %133, %137 : vector<8x32xf32>
    %c0_42 = arith.constant 0 : index
    %c4 = arith.constant 4 : index
    %c0_43 = arith.constant 0 : index
    %139 = vector.load %arg17[%c0_42, %c4, %c0_43] : memref<8x8x128xf32, #tpu.memory_space<vmem>>, vector<8x1x128xf32>
    %140 = vector.shape_cast %139 : vector<8x1x128xf32> to vector<8x128xf32>
    %141 = arith.truncf %138 : vector<8x32xf32> to vector<8x32xbf16>
    %cst_44 = arith.constant dense<0.000000e+00> : vector<8x128xf32>
    %142 = tpu.matmul %141, %16, %cst_44 {dimension_numbers = #tpu.dot_dimension_numbers<[1], [0], [0], [1], [0, 0, 1, 1], [], []>} : vector<8x32xbf16>, vector<32x128xbf16>, vector<8x128xf32> -> vector<8x128xf32>
    %143 = arith.addf %140, %142 : vector<8x128xf32>
    %144 = vector.extract_strided_slice %143 {offsets = [0, 0], sizes = [8, 32], strides = [1, 1]} : vector<8x128xf32> to vector<8x32xf32>
    %145 = arith.negf %144 : vector<8x32xf32>
    %146 = math.exp %145 : vector<8x32xf32>
    %cst_45 = arith.constant 1.000000e+00 : f32
    %147 = vector.broadcast %cst_45 : f32 to vector<8x32xf32>
    %148 = arith.addf %147, %146 : vector<8x32xf32>
    %149 = arith.divf %147, %148 : vector<8x32xf32>
    %150 = vector.extract_strided_slice %143 {offsets = [0, 32], sizes = [8, 32], strides = [1, 1]} : vector<8x128xf32> to vector<8x32xf32>
    %151 = arith.negf %150 : vector<8x32xf32>
    %152 = math.exp %151 : vector<8x32xf32>
    %cst_46 = arith.constant 1.000000e+00 : f32
    %153 = vector.broadcast %cst_46 : f32 to vector<8x32xf32>
    %154 = arith.addf %153, %152 : vector<8x32xf32>
    %155 = arith.divf %153, %154 : vector<8x32xf32>
    %156 = vector.extract_strided_slice %143 {offsets = [0, 64], sizes = [8, 32], strides = [1, 1]} : vector<8x128xf32> to vector<8x32xf32>
    %157 = math.tanh %156 : vector<8x32xf32>
    %158 = vector.extract_strided_slice %143 {offsets = [0, 96], sizes = [8, 32], strides = [1, 1]} : vector<8x128xf32> to vector<8x32xf32>
    %159 = arith.negf %158 : vector<8x32xf32>
    %160 = math.exp %159 : vector<8x32xf32>
    %cst_47 = arith.constant 1.000000e+00 : f32
    %161 = vector.broadcast %cst_47 : f32 to vector<8x32xf32>
    %162 = arith.addf %161, %160 : vector<8x32xf32>
    %163 = arith.divf %161, %162 : vector<8x32xf32>
    %164 = arith.mulf %155, %136 : vector<8x32xf32>
    %165 = arith.mulf %149, %157 : vector<8x32xf32>
    %166 = arith.addf %164, %165 : vector<8x32xf32>
    %167 = math.tanh %166 : vector<8x32xf32>
    %168 = arith.mulf %163, %167 : vector<8x32xf32>
    %c0_48 = arith.constant 0 : index
    %c5 = arith.constant 5 : index
    %c0_49 = arith.constant 0 : index
    %169 = vector.load %arg17[%c0_48, %c5, %c0_49] : memref<8x8x128xf32, #tpu.memory_space<vmem>>, vector<8x1x128xf32>
    %170 = vector.shape_cast %169 : vector<8x1x128xf32> to vector<8x128xf32>
    %171 = arith.truncf %168 : vector<8x32xf32> to vector<8x32xbf16>
    %cst_50 = arith.constant dense<0.000000e+00> : vector<8x128xf32>
    %172 = tpu.matmul %171, %16, %cst_50 {dimension_numbers = #tpu.dot_dimension_numbers<[1], [0], [0], [1], [0, 0, 1, 1], [], []>} : vector<8x32xbf16>, vector<32x128xbf16>, vector<8x128xf32> -> vector<8x128xf32>
    %173 = arith.addf %170, %172 : vector<8x128xf32>
    %174 = vector.extract_strided_slice %173 {offsets = [0, 0], sizes = [8, 32], strides = [1, 1]} : vector<8x128xf32> to vector<8x32xf32>
    %175 = arith.negf %174 : vector<8x32xf32>
    %176 = math.exp %175 : vector<8x32xf32>
    %cst_51 = arith.constant 1.000000e+00 : f32
    %177 = vector.broadcast %cst_51 : f32 to vector<8x32xf32>
    %178 = arith.addf %177, %176 : vector<8x32xf32>
    %179 = arith.divf %177, %178 : vector<8x32xf32>
    %180 = vector.extract_strided_slice %173 {offsets = [0, 32], sizes = [8, 32], strides = [1, 1]} : vector<8x128xf32> to vector<8x32xf32>
    %181 = arith.negf %180 : vector<8x32xf32>
    %182 = math.exp %181 : vector<8x32xf32>
    %cst_52 = arith.constant 1.000000e+00 : f32
    %183 = vector.broadcast %cst_52 : f32 to vector<8x32xf32>
    %184 = arith.addf %183, %182 : vector<8x32xf32>
    %185 = arith.divf %183, %184 : vector<8x32xf32>
    %186 = vector.extract_strided_slice %173 {offsets = [0, 64], sizes = [8, 32], strides = [1, 1]} : vector<8x128xf32> to vector<8x32xf32>
    %187 = math.tanh %186 : vector<8x32xf32>
    %188 = vector.extract_strided_slice %173 {offsets = [0, 96], sizes = [8, 32], strides = [1, 1]} : vector<8x128xf32> to vector<8x32xf32>
    %189 = arith.negf %188 : vector<8x32xf32>
    %190 = math.exp %189 : vector<8x32xf32>
    %cst_53 = arith.constant 1.000000e+00 : f32
    %191 = vector.broadcast %cst_53 : f32 to vector<8x32xf32>
    %192 = arith.addf %191, %190 : vector<8x32xf32>
    %193 = arith.divf %191, %192 : vector<8x32xf32>
    %194 = arith.mulf %185, %166 : vector<8x32xf32>
    %195 = arith.mulf %179, %187 : vector<8x32xf32>
    %196 = arith.addf %194, %195 : vector<8x32xf32>
    %197 = math.tanh %196 : vector<8x32xf32>
    %198 = arith.mulf %193, %197 : vector<8x32xf32>
    %c0_54 = arith.constant 0 : index
    %c6 = arith.constant 6 : index
    %c0_55 = arith.constant 0 : index
    %199 = vector.load %arg17[%c0_54, %c6, %c0_55] : memref<8x8x128xf32, #tpu.memory_space<vmem>>, vector<8x1x128xf32>
    %200 = vector.shape_cast %199 : vector<8x1x128xf32> to vector<8x128xf32>
    %201 = arith.truncf %198 : vector<8x32xf32> to vector<8x32xbf16>
    %cst_56 = arith.constant dense<0.000000e+00> : vector<8x128xf32>
    %202 = tpu.matmul %201, %16, %cst_56 {dimension_numbers = #tpu.dot_dimension_numbers<[1], [0], [0], [1], [0, 0, 1, 1], [], []>} : vector<8x32xbf16>, vector<32x128xbf16>, vector<8x128xf32> -> vector<8x128xf32>
    %203 = arith.addf %200, %202 : vector<8x128xf32>
    %204 = vector.extract_strided_slice %203 {offsets = [0, 0], sizes = [8, 32], strides = [1, 1]} : vector<8x128xf32> to vector<8x32xf32>
    %205 = arith.negf %204 : vector<8x32xf32>
    %206 = math.exp %205 : vector<8x32xf32>
    %cst_57 = arith.constant 1.000000e+00 : f32
    %207 = vector.broadcast %cst_57 : f32 to vector<8x32xf32>
    %208 = arith.addf %207, %206 : vector<8x32xf32>
    %209 = arith.divf %207, %208 : vector<8x32xf32>
    %210 = vector.extract_strided_slice %203 {offsets = [0, 32], sizes = [8, 32], strides = [1, 1]} : vector<8x128xf32> to vector<8x32xf32>
    %211 = arith.negf %210 : vector<8x32xf32>
    %212 = math.exp %211 : vector<8x32xf32>
    %cst_58 = arith.constant 1.000000e+00 : f32
    %213 = vector.broadcast %cst_58 : f32 to vector<8x32xf32>
    %214 = arith.addf %213, %212 : vector<8x32xf32>
    %215 = arith.divf %213, %214 : vector<8x32xf32>
    %216 = vector.extract_strided_slice %203 {offsets = [0, 64], sizes = [8, 32], strides = [1, 1]} : vector<8x128xf32> to vector<8x32xf32>
    %217 = math.tanh %216 : vector<8x32xf32>
    %218 = vector.extract_strided_slice %203 {offsets = [0, 96], sizes = [8, 32], strides = [1, 1]} : vector<8x128xf32> to vector<8x32xf32>
    %219 = arith.negf %218 : vector<8x32xf32>
    %220 = math.exp %219 : vector<8x32xf32>
    %cst_59 = arith.constant 1.000000e+00 : f32
    %221 = vector.broadcast %cst_59 : f32 to vector<8x32xf32>
    %222 = arith.addf %221, %220 : vector<8x32xf32>
    %223 = arith.divf %221, %222 : vector<8x32xf32>
    %224 = arith.mulf %215, %196 : vector<8x32xf32>
    %225 = arith.mulf %209, %217 : vector<8x32xf32>
    %226 = arith.addf %224, %225 : vector<8x32xf32>
    %227 = math.tanh %226 : vector<8x32xf32>
    %228 = arith.mulf %223, %227 : vector<8x32xf32>
    %c0_60 = arith.constant 0 : index
    %c7 = arith.constant 7 : index
    %c0_61 = arith.constant 0 : index
    %229 = vector.load %arg17[%c0_60, %c7, %c0_61] : memref<8x8x128xf32, #tpu.memory_space<vmem>>, vector<8x1x128xf32>
    %230 = vector.shape_cast %229 : vector<8x1x128xf32> to vector<8x128xf32>
    %231 = arith.truncf %228 : vector<8x32xf32> to vector<8x32xbf16>
    %cst_62 = arith.constant dense<0.000000e+00> : vector<8x128xf32>
    %232 = tpu.matmul %231, %16, %cst_62 {dimension_numbers = #tpu.dot_dimension_numbers<[1], [0], [0], [1], [0, 0, 1, 1], [], []>} : vector<8x32xbf16>, vector<32x128xbf16>, vector<8x128xf32> -> vector<8x128xf32>
    %233 = arith.addf %230, %232 : vector<8x128xf32>
    %234 = vector.extract_strided_slice %233 {offsets = [0, 0], sizes = [8, 32], strides = [1, 1]} : vector<8x128xf32> to vector<8x32xf32>
    %235 = arith.negf %234 : vector<8x32xf32>
    %236 = math.exp %235 : vector<8x32xf32>
    %cst_63 = arith.constant 1.000000e+00 : f32
    %237 = vector.broadcast %cst_63 : f32 to vector<8x32xf32>
    %238 = arith.addf %237, %236 : vector<8x32xf32>
    %239 = arith.divf %237, %238 : vector<8x32xf32>
    %240 = vector.extract_strided_slice %233 {offsets = [0, 32], sizes = [8, 32], strides = [1, 1]} : vector<8x128xf32> to vector<8x32xf32>
    %241 = arith.negf %240 : vector<8x32xf32>
    %242 = math.exp %241 : vector<8x32xf32>
    %cst_64 = arith.constant 1.000000e+00 : f32
    %243 = vector.broadcast %cst_64 : f32 to vector<8x32xf32>
    %244 = arith.addf %243, %242 : vector<8x32xf32>
    %245 = arith.divf %243, %244 : vector<8x32xf32>
    %246 = vector.extract_strided_slice %233 {offsets = [0, 64], sizes = [8, 32], strides = [1, 1]} : vector<8x128xf32> to vector<8x32xf32>
    %247 = math.tanh %246 : vector<8x32xf32>
    %248 = vector.extract_strided_slice %233 {offsets = [0, 96], sizes = [8, 32], strides = [1, 1]} : vector<8x128xf32> to vector<8x32xf32>
    %249 = arith.negf %248 : vector<8x32xf32>
    %250 = math.exp %249 : vector<8x32xf32>
    %cst_65 = arith.constant 1.000000e+00 : f32
    %251 = vector.broadcast %cst_65 : f32 to vector<8x32xf32>
    %252 = arith.addf %251, %250 : vector<8x32xf32>
    %253 = arith.divf %251, %252 : vector<8x32xf32>
    %254 = arith.mulf %245, %226 : vector<8x32xf32>
    %255 = arith.mulf %239, %247 : vector<8x32xf32>
    %256 = arith.addf %254, %255 : vector<8x32xf32>
    %257 = math.tanh %256 : vector<8x32xf32>
    %258 = arith.mulf %253, %257 : vector<8x32xf32>
    %259 = arith.truncf %258 : vector<8x32xf32> to vector<8x32xbf16>
    %c0_66 = arith.constant 0 : index
    %c0_67 = arith.constant 0 : index
    %260 = vector.load %arg7[%c0_66, %c0_67] : memref<32x16xbf16, #tpu.memory_space<vmem>>, vector<32x16xbf16>
    %cst_68 = arith.constant dense<0.000000e+00> : vector<8x16xf32>
    %261 = tpu.matmul %259, %260, %cst_68 {dimension_numbers = #tpu.dot_dimension_numbers<[1], [0], [0], [1], [0, 0, 1, 1], [], []>} : vector<8x32xbf16>, vector<32x16xbf16>, vector<8x16xf32> -> vector<8x16xf32>
    %c0_69 = arith.constant 0 : index
    %c0_70 = arith.constant 0 : index
    %262 = vector.load %arg8[%c0_69, %c0_70] : memref<1x16xf32, #tpu.memory_space<vmem>>, vector<1x16xf32>
    %263 = vector.broadcast %262 : vector<1x16xf32> to vector<8x16xf32>
    %264 = arith.addf %261, %263 : vector<8x16xf32>
    %c0_71 = arith.constant 0 : index
    %c0_72 = arith.constant 0 : index
    %265 = vector.load %arg9[%c0_71, %c0_72] : memref<32x16xbf16, #tpu.memory_space<vmem>>, vector<32x16xbf16>
    %cst_73 = arith.constant dense<0.000000e+00> : vector<8x16xf32>
    %266 = tpu.matmul %259, %265, %cst_73 {dimension_numbers = #tpu.dot_dimension_numbers<[1], [0], [0], [1], [0, 0, 1, 1], [], []>} : vector<8x32xbf16>, vector<32x16xbf16>, vector<8x16xf32> -> vector<8x16xf32>
    %c0_74 = arith.constant 0 : index
    %c0_75 = arith.constant 0 : index
    %267 = vector.load %arg10[%c0_74, %c0_75] : memref<1x16xf32, #tpu.memory_space<vmem>>, vector<1x16xf32>
    %268 = vector.broadcast %267 : vector<1x16xf32> to vector<8x16xf32>
    %269 = arith.addf %266, %268 : vector<8x16xf32>
    %c0_76 = arith.constant 0 : index
    %c0_77 = arith.constant 0 : index
    %270 = vector.load %arg2[%c0_76, %c0_77] : memref<8x16xf32, #tpu.memory_space<vmem>>, vector<8x16xf32>
    %cst_78 = arith.constant 5.000000e-01 : f32
    %271 = vector.broadcast %cst_78 : f32 to vector<8x16xf32>
    %272 = arith.mulf %271, %269 : vector<8x16xf32>
    %273 = math.exp %272 : vector<8x16xf32>
    %274 = arith.mulf %270, %273 : vector<8x16xf32>
    %275 = arith.addf %264, %274 : vector<8x16xf32>
    %276 = arith.truncf %275 : vector<8x16xf32> to vector<8x16xbf16>
    %c0_79 = arith.constant 0 : index
    %c0_80 = arith.constant 0 : index
    %277 = vector.load %arg11[%c0_79, %c0_80] : memref<16x128xbf16, #tpu.memory_space<vmem>>, vector<16x128xbf16>
    %cst_81 = arith.constant dense<0.000000e+00> : vector<8x128xf32>
    %278 = tpu.matmul %276, %277, %cst_81 {dimension_numbers = #tpu.dot_dimension_numbers<[1], [0], [0], [1], [0, 0, 1, 1], [], []>} : vector<8x16xbf16>, vector<16x128xbf16>, vector<8x128xf32> -> vector<8x128xf32>
    %279 = arith.truncf %0 : vector<8x3xf32> to vector<8x3xbf16>
    %c0_82 = arith.constant 0 : index
    %c0_83 = arith.constant 0 : index
    %280 = vector.load %arg12[%c0_82, %c0_83] : memref<3x128xbf16, #tpu.memory_space<vmem>>, vector<3x128xbf16>
    %cst_84 = arith.constant dense<0.000000e+00> : vector<8x128xf32>
    %281 = tpu.matmul %279, %280, %cst_84 {dimension_numbers = #tpu.dot_dimension_numbers<[1], [0], [0], [1], [0, 0, 1, 1], [], []>} : vector<8x3xbf16>, vector<3x128xbf16>, vector<8x128xf32> -> vector<8x128xf32>
    %282 = arith.addf %278, %281 : vector<8x128xf32>
    %c0_85 = arith.constant 0 : index
    %c0_86 = arith.constant 0 : index
    %283 = vector.load %arg13[%c0_85, %c0_86] : memref<1x128xf32, #tpu.memory_space<vmem>>, vector<1x128xf32>
    %284 = vector.broadcast %283 : vector<1x128xf32> to vector<8x128xf32>
    %285 = arith.addf %282, %284 : vector<8x128xf32>
    %286 = vector.extract_strided_slice %285 {offsets = [0, 0], sizes = [8, 32], strides = [1, 1]} : vector<8x128xf32> to vector<8x32xf32>
    %287 = arith.negf %286 : vector<8x32xf32>
    %288 = math.exp %287 : vector<8x32xf32>
    %cst_87 = arith.constant 1.000000e+00 : f32
    %289 = vector.broadcast %cst_87 : f32 to vector<8x32xf32>
    %290 = arith.addf %289, %288 : vector<8x32xf32>
    %291 = arith.divf %289, %290 : vector<8x32xf32>
    %292 = vector.extract_strided_slice %285 {offsets = [0, 64], sizes = [8, 32], strides = [1, 1]} : vector<8x128xf32> to vector<8x32xf32>
    %293 = math.tanh %292 : vector<8x32xf32>
    %294 = vector.extract_strided_slice %285 {offsets = [0, 96], sizes = [8, 32], strides = [1, 1]} : vector<8x128xf32> to vector<8x32xf32>
    %295 = arith.negf %294 : vector<8x32xf32>
    %296 = math.exp %295 : vector<8x32xf32>
    %cst_88 = arith.constant 1.000000e+00 : f32
    %297 = vector.broadcast %cst_88 : f32 to vector<8x32xf32>
    %298 = arith.addf %297, %296 : vector<8x32xf32>
    %299 = arith.divf %297, %298 : vector<8x32xf32>
    %300 = arith.mulf %291, %293 : vector<8x32xf32>
    %301 = math.tanh %300 : vector<8x32xf32>
    %302 = arith.mulf %299, %301 : vector<8x32xf32>
    %303 = arith.truncf %302 : vector<8x32xf32> to vector<8x32xbf16>
    %c0_89 = arith.constant 0 : index
    %c0_90 = arith.constant 0 : index
    %304 = vector.load %arg14[%c0_89, %c0_90] : memref<32x4xbf16, #tpu.memory_space<vmem>>, vector<32x4xbf16>
    %cst_91 = arith.constant dense<0.000000e+00> : vector<8x4xf32>
    %305 = tpu.matmul %303, %304, %cst_91 {dimension_numbers = #tpu.dot_dimension_numbers<[1], [0], [0], [1], [0, 0, 1, 1], [], []>} : vector<8x32xbf16>, vector<32x4xbf16>, vector<8x4xf32> -> vector<8x4xf32>
    %c0_92 = arith.constant 0 : index
    %c0_93 = arith.constant 0 : index
    %306 = vector.load %arg15[%c0_92, %c0_93] : memref<1x4xf32, #tpu.memory_space<vmem>>, vector<1x4xf32>
    %307 = vector.broadcast %306 : vector<1x4xf32> to vector<8x4xf32>
    %308 = arith.addf %305, %307 : vector<8x4xf32>
    %cst_94 = arith.constant 0.000000e+00 : f32
    %309 = vector.broadcast %cst_94 : f32 to vector<8x128xf32>
    %c0_95 = arith.constant 0 : index
    %c0_96 = arith.constant 0 : index
    %310 = vector.load %arg16[%c0_95, %c0_96] : memref<8x128xf32, #tpu.memory_space<vmem>>, vector<8x128xf32>
    tpu.vector_store %arg16[%c0_95, %c0_96], %309 {strides = array<i32>} : memref<8x128xf32, #tpu.memory_space<vmem>>, vector<8x128xf32>,
    %c0_97 = arith.constant 0 : index
    %c0_98 = arith.constant 0 : index
    %311 = vector.load %arg16[%c0_97, %c0_98] : memref<8x128xf32, #tpu.memory_space<vmem>>, vector<8x16xf32>
    tpu.vector_store %arg16[%c0_97, %c0_98], %264 {strides = array<i32>} : memref<8x128xf32, #tpu.memory_space<vmem>>, vector<8x16xf32>,
    %c0_99 = arith.constant 0 : index
    %c16 = arith.constant 16 : index
    %312 = vector.load %arg16[%c0_99, %c16] : memref<8x128xf32, #tpu.memory_space<vmem>>, vector<8x16xf32>
    tpu.vector_store %arg16[%c0_99, %c16], %269 {strides = array<i32>} : memref<8x128xf32, #tpu.memory_space<vmem>>, vector<8x16xf32>,
    %c0_100 = arith.constant 0 : index
    %c32 = arith.constant 32 : index
    %313 = vector.load %arg16[%c0_100, %c32] : memref<8x128xf32, #tpu.memory_space<vmem>>, vector<8x16xf32>
    tpu.vector_store %arg16[%c0_100, %c32], %275 {strides = array<i32>} : memref<8x128xf32, #tpu.memory_space<vmem>>, vector<8x16xf32>,
    %c0_101 = arith.constant 0 : index
    %c48 = arith.constant 48 : index
    %314 = vector.load %arg16[%c0_101, %c48] : memref<8x128xf32, #tpu.memory_space<vmem>>, vector<8x4xf32>
    tpu.vector_store %arg16[%c0_101, %c48], %308 {strides = array<i32>} : memref<8x128xf32, #tpu.memory_space<vmem>>, vector<8x4xf32>,
    return
  }
}

</mosaic_0001>

<bundles_post_ra>
// kernel: conditional_vae_forward.1
= control target key start
LH: loop header
LB: loop body
LE: loop exit
PB: predicated region body
PF: predicated region fallthrough
CT: control target
= control target key end

     0   :  { %vm66_vm0 = vcmask 1041408   ;;  %vm65_vm1 = vcmask 1040384   ;;  %v4167_v2 = vmov 65535   ;;  %vm98_vm2 = vcmask 31744   ;;  %s5929_s3 = inlined_call_operand.vmem [shape: bf16[4,128], index: 3, kind: input, shape index: {}]   ;;  %s5930_s4 = inlined_call_operand.vmem [shape: bf16[3,128], index: 4, kind: input, shape index: {}]   ;;  %s5931_s0 = inlined_call_operand.vmem [shape: f32[64,4], index: 0, kind: input, shape index: {}]   ;;  %s5932_s1 = inlined_call_operand.vmem [shape: f32[8,3], index: 1, kind: input, shape index: {}]   ;;  %s5933_s6 = inlined_call_operand.vmem [shape: bf16[32,128], index: 6, kind: input, shape index: {}]   ;;  %s5934_s5 = inlined_call_operand.vmem [shape: f32[1,128], index: 5, kind: input, shape index: {}]   ;;  %s5935_s12 = inlined_call_operand.vmem [shape: bf16[3,128], index: 12, kind: input, shape index: {}]   ;;  %s5936_s9 = inlined_call_operand.vmem [shape: bf16[32,16], index: 9, kind: input, shape index: {}]   ;;  %s5937_s7 = inlined_call_operand.vmem [shape: bf16[32,16], index: 7, kind: input, shape index: {}]   ;;  %s5938_s8 = inlined_call_operand.vmem [shape: f32[1,16], index: 8, kind: input, shape index: {}]   ;;  %s5939_s10 = inlined_call_operand.vmem [shape: f32[1,16], index: 10, kind: input, shape index: {}]   ;;  %s5940_s13 = inlined_call_operand.vmem [shape: f32[1,128], index: 13, kind: input, shape index: {}]   ;;  %s5941_s11 = inlined_call_operand.vmem [shape: bf16[16,128], index: 11, kind: input, shape index: {}]   ;;  %s5942_s16 = inlined_call_operand.vmem [shape: f32[8,128], index: 16, kind: output, shape index: {}]   ;;  %s5943_s2 = inlined_call_operand.vmem [shape: f32[8,16], index: 2, kind: input, shape index: {}]   ;;  %s5944_s14 = inlined_call_operand.vmem [shape: bf16[32,4], index: 14, kind: input, shape index: {}]   ;;  %s5945_s15 = inlined_call_operand.vmem [shape: f32[1,4], index: 15, kind: input, shape index: {}]  }
   0x1   :  { %5947 = sst [smem:[#allocation3_spill]] %s5929_s3  ;;  %v56_v1 = vld [vmem:[%s5930_s4] sm:$0x3]  ;;  %v67_v3 = vsel %vm65_vm1, 4294967295, %v4167_v2  ;;  %v86_v7 = vld [vmem:[%s5931_s0 + $0x8] sm:$0xff]  ;;  %vm5946_vm3 = vcmask 23552  }
   0x2   :  { %s5948_s23 = sld [smem:[#allocation3_spill]]  ;;  %v85_v4 = vld [vmem:[%s5931_s0] sm:$0xff]  ;;  %v4269_v6 = vsel %vm66_vm0, %v67_v3, 0  ;;  %v4281_v11 = vld [vmem:[%s5933_s6 + $0x8] sm:$0xff]  ;;  %v4168_v14 = vmov 0   ;;  %v87_v15 = vld [vmem:[%s5931_s0 + $0x10] sm:$0xff] }
   0x3   :  { %v54_v8 = vld [vmem:[%s5932_s1] sm:$0xff]  ;;  %v70_v9 = vand.u32 %v4269_v6, %v56_v1  ;;  %v93_v10 = vpack.c.bf16 %v86_v7, %v85_v4  ;;  %217 = vmatpush.bf16.msra.mxu2 %v4281_v11  ;;  %609 = vmatpush.bf16.msra.mxu3 %v4281_v11  ;;  %v88_v16 = vld [vmem:[%s5931_s0 + $0x18] sm:$0xff]  ;;  %v90_v19 = vld [vmem:[%s5931_s0 + $0x28] sm:$0xff]  ;;  %s4172_s4 = smov 16  }
   0x4   :  { %v4283_v12 = vpack.c.bf16 %v54_v8, %v54_v8  ;;  %v4289_v13 = vld [vmem:[%s5933_s6] sm:$0xff]  ;;  %v94_v17 = vpack.c.bf16 %v88_v16, %v87_v15  ;;  %v91_v21 = vld [vmem:[%s5931_s0 + $0x30] sm:$0xff]  ;;  %v92_v22 = vld [vmem:[%s5931_s0 + $0x38] sm:$0xff] }
   0x5   :  { %79 = vmatpush.bf16.msra.mxu0 %v70_v9  ;;  %v89_v18 = vld [vmem:[%s5931_s0 + $0x20] sm:$0xff]  ;;  %v96_v23 = vpack.c.bf16 %v92_v22, %v91_v21  ;;  %s4169_s0 = smov 64  }
   0x6   :  { %v95_v20 = vpack.c.bf16 %v90_v19, %v89_v18  ;;  %v3640_v24 = vld [vmem:[%s5934_s5] ss:$0 sm:$0xff]  ;;  %s4170_s5 = smov 32  }
   0x7   :  { %218 = vmatpush.bf16.msra.mxu2 %v4289_v13  ;;  %610 = vmatpush.bf16.msra.mxu3 %v4289_v13 }
   0x8   :  { %v97_v0 = vld [vmem:[%s5948_s23] sm:$0x3]  ;;  %3505 = vmatmul.msk.bf16.vlgmr.msra.gmra.mxu0 %vm5946_vm3, %v4283_v12 }
   0x9   :  { %v112_v5 = vsel %vm66_vm0, %v97_v0, 0  ;;  %994 = vmatpush.bf16.msrb.mxu0 %v4281_v11 }
   0xa   :  { %121 = vmatpush.bf16.msra.mxu1 %v112_v5  ;;  %219 = vmatmul.bf16.vlgmr.msra.gmra.mxu2 %v4168_v14 }
   0xb   :  { %1379 = vmatpush.bf16.msrb.mxu2 %v4281_v11  ;;  %1764 = vmatpush.bf16.msrb.mxu3 %v4281_v11 }
   0xd   :  { %3506 = vmatmul.msk.bf16.vlgmr.msra.gmra.mxu1 %vm98_vm2, %v93_v10  ;;  %995 = vmatpush.bf16.msrb.mxu0 %v4289_v13 }
   0xf   :  { %1380 = vmatpush.bf16.msrb.mxu2 %v4289_v13  ;;  %1765 = vmatpush.bf16.msrb.mxu3 %v4289_v13 }
  0x11   :  { %2149 = vmatpush.bf16.msra.mxu0 %v4281_v11 }
  0x13   :  { %2534 = vmatpush.bf16.msra.mxu2 %v4281_v11 }
  0x15   :  { %2150 = vmatpush.bf16.msra.mxu0 %v4289_v13 }
  0x17   :  { %2535 = vmatpush.bf16.msra.mxu2 %v4289_v13 }
  0x1d   :  { %3507 = vmatmul.msk.bf16.gmra.mxu1 %vm98_vm2, %v94_v17 }
  0x2d   :  { %3508 = vmatmul.msk.bf16.gmra.mxu1 %vm98_vm2, %v95_v20 }
  0x3d   :  { %3509 = vmatmul.msk.bf16.gmra.mxu1 %vm98_vm2, %v96_v23 }
  0x85   :  { %v81_v26 = vpop.f32.mrf.mxu0 }
  0x86   :  { %v4331_v27 = vadd.f32 %v3640_v24, %v81_v26 }
  0x88   :  { %v151_v28 = vperm.slane %v4331_v27, 0  ;;  %v144_v29 = vrot.slane %v4331_v27, 1  ;;  %v145_v34 = vrot.slane %v4331_v27, 2  ;;  %v146_v42 = vrot.slane %v4331_v27, 3 }
  0x89   :  { %v147_v53 = vrot.slane %v4331_v27, 4  ;;  %v148_v62 = vrot.slane %v4331_v27, 5  ;;  %v149_v7 = vrot.slane %v4331_v27, 6  ;;  %v150_v18 = vrot.slane %v4331_v27, 7 }
  0x8a   :  { %v123_v25 = vpop.f32.mrf.mxu1  ;;  %v152_v31 = vperm.slane %v144_v29, 0  ;;  %v153_v37 = vperm.slane %v145_v34, 0  ;;  %v154_v47 = vperm.slane %v146_v42, 0 }
  0x8b   :  { %v167_v30 = vadd.f32 %v151_v28, %v123_v25  ;;  %v155_v56 = vperm.slane %v147_v53, 0  ;;  %v156_v0 = vperm.slane %v148_v62, 0  ;;  %v157_v9 = vperm.slane %v149_v7, 0 }
  0x8c   :  { %v158_v20 = vperm.slane %v150_v18, 0 }
  0x8d   :  { %175 = vst [vmem:[#allocation2] sm:$0xff] %v167_v30  ;;  %v83_v35 = vpop.f32.mrf.mxu0  ;;  %v4336_v36 = vpop.f32.mrf.mxu2 }
  0x8e   :  { %v225_v38 = vrot.slane %v4336_v36, 1  ;;  %v226_v48 = vrot.slane %v4336_v36, 2  ;;  %v227_v57 = vrot.slane %v4336_v36, 3  ;;  %v228_v3 = vrot.slane %v4336_v36, 4 }
  0x8f   :  { %v229_v15 = vrot.slane %v4336_v36, 5  ;;  %v230_v23 = vrot.slane %v4336_v36, 6  ;;  %v231_v27 = vrot.slane %v4336_v36, 7 }
  0x92   :  { %v125_v32 = vpop.f32.mrf.mxu1 }
  0x93   :  { %v168_v33 = vadd.f32 %v152_v31, %v125_v32 }
  0x94   :  { %v187_v40 = vld [vmem:[#allocation2] sm:$0x1] }
  0x95   :  { %176 = vst [vmem:[#allocation2 + $0x8] sm:$0xff] %v168_v33  ;;  %v4341_v43 = vadd.f32 %v4336_v36, %v187_v40  ;;  %v222_v46 = vpop.f32.mrf.mxu2 }
  0x97   :  { %3645 = vtanh.f32 %v4341_v43  ;;  %v3518_v32 = vmul.f32 -1.442695, %v4341_v43 }
  0x9a   :  { %v128_v39 = vpop.f32.mrf.mxu1 }
  0x9b   :  { %v169_v41 = vadd.f32 %v153_v37, %v128_v39 }
  0x9c   :  { %v188_v44 = vld [vmem:[#allocation2 + $0x8] sm:$0x1] }
  0x9d   :  { %177 = vst [vmem:[#allocation2 + $0x10] sm:$0xff] %v169_v41  ;;  %v4344_v45 = vadd.f32 %v225_v38, %v188_v44  ;;  %v3646_v50 = vpop.eup %3645 }
  0x9e   :  { %424 = vrot.lane.b32.xlu1 %v3646_v50, %s4169_s0 }
  0x9f   :  { %3647 = vtanh.f32 %v4344_v45  ;;  %v3519_v33 = vmul.f32 -1.442695, %v4344_v45 }
  0xa2   :  { %v130_v49 = vpop.f32.mrf.mxu1 }
  0xa3   :  { %v170_v51 = vadd.f32 %v154_v47, %v130_v49 }
  0xa4   :  { %v189_v52 = vld [vmem:[#allocation2 + $0x10] sm:$0x1] }
  0xa5   :  { %178 = vst [vmem:[#allocation2 + $0x18] sm:$0xff] %v170_v51  ;;  %v242_v54 = vadd.f32 %v226_v48, %v189_v52  ;;  %v3648_v55 = vpop.eup %3647 }
  0xa6   :  { %426 = vrot.lane.b32.xlu0 %v3648_v55, %s4169_s0 }
  0xa7   :  { %3649 = vtanh.f32 %v242_v54  ;;  %v3520_v36 = vmul.f32 -1.442695, %v242_v54 }
  0xaa   :  { %v133_v58 = vpop.f32.mrf.mxu1 }
  0xab   :  { %v171_v59 = vadd.f32 %v155_v56, %v133_v58 }
  0xac   :  { %v190_v60 = vld [vmem:[#allocation2 + $0x18] sm:$0x1] }
  0xad   :  { %v3650_v61 = vpop.eup %3649  ;;  %179 = vst [vmem:[#allocation2 + $0x20] sm:$0xff] %v171_v59  ;;  %v243_v63 = vadd.f32 %v227_v57, %v190_v60 }
  0xae   :  { %428 = vrot.lane.b32.xlu0 %v3650_v61, %s4169_s0 }
  0xaf   :  { %3651 = vtanh.f32 %v243_v63  ;;  %v3521_v40 = vmul.f32 -1.442695, %v243_v63 }
  0xb2   :  { %v135_v1 = vpop.f32.mrf.mxu1 }
  0xb3   :  { %v172_v2 = vadd.f32 %v156_v0, %v135_v1 }
  0xb4   :  { %v191_v4 = vld [vmem:[#allocation2 + $0x20] sm:$0x1] }
  0xb5   :  { %v3652_v5 = vpop.eup %3651  ;;  %180 = vst [vmem:[#allocation2 + $0x28] sm:$0xff] %v172_v2  ;;  %v244_v8 = vadd.f32 %v228_v3, %v191_v4 }
  0xb6   :  { %430 = vrot.lane.b32.xlu1 %v3652_v5, %s4169_s0 }
  0xb7   :  { %3653 = vtanh.f32 %v244_v8  ;;  %v3522_v41 = vmul.f32 -1.442695, %v244_v8 }
  0xba   :  { %v138_v10 = vpop.f32.mrf.mxu1 }
  0xbb   :  { %v173_v14 = vadd.f32 %v157_v9, %v138_v10 }
  0xbc   :  { %v192_v16 = vld [vmem:[#allocation2 + $0x28] sm:$0x1] }
  0xbd   :  { %v3654_v17 = vpop.eup %3653  ;;  %181 = vst [vmem:[#allocation2 + $0x30] sm:$0xff] %v173_v14  ;;  %v245_v19 = vadd.f32 %v229_v15, %v192_v16 }
  0xbe   :  { %432 = vrot.lane.b32.xlu2 %v3654_v17, %s4169_s0 }
  0xbf   :  { %3655 = vtanh.f32 %v245_v19  ;;  %v3523_v35 = vmul.f32 -1.442695, %v245_v19 }
  0xc2   :  { %v140_v21 = vpop.f32.mrf.mxu1 }
  0xc3   :  { %v174_v22 = vadd.f32 %v158_v20, %v140_v21 }
  0xc4   :  { %v193_v24 = vld [vmem:[#allocation2 + $0x30] sm:$0x1] }
  0xc5   :  { %v3656_v25 = vpop.eup %3655  ;;  %182 = vst [vmem:[#allocation2 + $0x38] sm:$0xff] %v174_v22  ;;  %v4361_v26 = vadd.f32 %v230_v23, %v193_v24 }
  0xc6   :  { %434 = vrot.lane.b32.xlu2 %v3656_v25, %s4169_s0 }
  0xc7   :  { %3657 = vtanh.f32 %v4361_v26  ;;  %v3524_v8 = vmul.f32 -1.442695, %v4361_v26 }
  0xcc   :  { %v194_v28 = vld [vmem:[#allocation2 + $0x38] sm:$0x1] }
  0xcd   :  { %v3658_v29 = vpop.eup %3657  ;;  %v4366_v30 = vadd.f32 %v231_v27, %v194_v28 }
  0xce   :  { %436 = vrot.lane.b32.xlu0 %v3658_v29, %s4169_s0 }
  0xcf   :  { %3659 = vtanh.f32 %v4366_v30 }
  0xd0   :  { %3661 = vpow2.f32 %v3518_v32 }
  0xd1   :  { %3663 = vpow2.f32 %v3519_v33 }
  0xd2   :  { %3665 = vpow2.f32 %v3523_v35 }
  0xd3   :  { %3667 = vpow2.f32 %v3520_v36  ;;  %v3525_v36 = vmul.f32 -1.442695, %v4366_v30 }
  0xd5   :  { %v3660_v31 = vpop.eup %3659 }
  0xd6   :  { %438 = vrot.lane.b32.xlu1 %v3660_v31, %s4169_s0  ;;  %v3662_v34 = vpop.eup %3661 }
  0xd7   :  { %v3664_v37 = vpop.eup %3663  ;;  %v272_v38 = vadd.f32 1.0, %v3662_v34 }
  0xd8   :  { %v273_v39 = vadd.f32 1.0, %v3664_v37  ;;  %v3666_v42 = vpop.eup %3665 }
  0xd9   :  { %3669 = vrcp.f32 %v272_v38  ;;  %v3668_v44 = vpop.eup %3667  ;;  %v4373_v45 = vadd.f32 1.0, %v3666_v42  ;;  %v291_v63 = vand.u32 2147483648, %v272_v38  ;;  %vm285_vm5 = vweird.f32 %v272_v38 }
  0xda   :  { %3671 = vrcp.f32 %v273_v39  ;;  %v4375_v46 = vadd.f32 1.0, %v3668_v44  ;;  %v289_v0 = vand.u32 2147483647, %v272_v38  ;;  %v306_v10 = vand.u32 2147483648, %v273_v39 }
  0xdb   :  { %3673 = vpow2.f32 %v3521_v40  ;;  %v292_v14 = vor.u32 1.1754944e-38, %v291_v63  ;;  %vm300_vm8 = vweird.f32 %v273_v39  ;;  %v304_v15 = vand.u32 2147483647, %v273_v39 }
  0xdc   :  { %3675 = vpow2.f32 %v3522_v41  ;;  %vm290_vm9 = vcmp.eq.f32.partialorder %v289_v0, 8.507059e+37  ;;  %v307_v25 = vor.u32 1.1754944e-38, %v306_v10  ;;  %v366_v35 = vand.u32 2147483648, %v4373_v45 }
  0xdd   :  { %3677 = vrcp.f32 %v4373_v45  ;;  %vm305_vm11 = vcmp.eq.f32.partialorder %v304_v15, 8.507059e+37  ;;  %v321_v37 = vand.u32 2147483648, %v4375_v46  ;;  %vm360_vm14 = vweird.f32 %v4373_v45 }
  0xde   :  { %3679 = vrcp.f32 %v4375_v46  ;;  %vm315_vm15 = vweird.f32 %v4375_v46 }
  0xdf   :  { %v3670_v43 = vpop.eup %3669 }
  0xe0   :  { %v3672_v47 = vpop.eup %3671  ;;  %v281_v48 = vmul.f32 %v3670_v43, %v272_v38  ;;  %vm286_vm4 = vweird.f32 %v3670_v43  ;;  %v364_v38 = vand.u32 2147483647, %v4373_v45 }
  0xe1   :  { %v3674_v49 = vpop.eup %3673  ;;  %v296_v51 = vmul.f32 %v3672_v47, %v273_v39  ;;  %vm4395_vm6 = vmor %vm285_vm5, %vm286_vm4  ;;  %vm301_vm7 = vweird.f32 %v3672_v47  ;;  %v319_v39 = vand.u32 2147483647, %v4375_v46 }
  0xe2   :  { %v3676_v50 = vpop.eup %3675  ;;  %v282_v52 = vsub.f32 1.0, %v281_v48  ;;  %v4379_v53 = vadd.f32 1.0, %v3674_v49  ;;  %vm4404_vm10 = vmor %vm300_vm8, %vm301_vm7  ;;  %vm365_vm2 = vcmp.eq.f32.partialorder %v364_v38, 8.507059e+37 }
  0xe3   :  { %v4381_v54 = vadd.f32 1.0, %v3676_v50  ;;  %v4383_v55 = vpop.eup %3677  ;;  %v297_v56 = vsub.f32 1.0, %v296_v51  ;;  %vm320_vm4 = vcmp.eq.f32.partialorder %v319_v39, 8.507059e+37 }
  0xe4   :  { %v4385_v57 = vpop.eup %3679  ;;  %v283_v58 = vmul.f32 %v3670_v43, %v282_v52  ;;  %3681 = vrcp.f32 %v4379_v53  ;;  %v356_v59 = vmul.f32 %v4383_v55, %v4373_v45  ;;  %vm361_vm13 = vweird.f32 %v4383_v55 }
  0xe5   :  { %3683 = vrcp.f32 %v4381_v54  ;;  %v298_v60 = vmul.f32 %v3672_v47, %v297_v56  ;;  %v311_v61 = vmul.f32 %v4385_v57, %v4375_v46  ;;  %vm316_vm12 = vweird.f32 %v4385_v57  ;;  %vm362_vm0 = vmor %vm360_vm14, %vm361_vm13 }
  0xe6   :  { %v284_v62 = vadd.f32 %v3670_v43, %v283_v58  ;;  %v357_v1 = vsub.f32 1.0, %v356_v59  ;;  %3685 = vpow2.f32 %v3524_v8  ;;  %vm317_vm1 = vmor %vm315_vm15, %vm316_vm12  ;;  %v322_v45 = vor.u32 1.1754944e-38, %v321_v37 }
  0xe7   :  { %v299_v4 = vadd.f32 %v3672_v47, %v298_v60  ;;  %v312_v5 = vsub.f32 1.0, %v311_v61  ;;  %3687 = vpow2.f32 %v3525_v36  ;;  %v351_v58 = vand.u32 2147483648, %v4381_v54 }
  0xe8   :  { %v288_v9 = vsel %vm4395_vm6, %v3670_v43, %v284_v62  ;;  %v358_v17 = vmul.f32 %v4383_v55, %v357_v1  ;;  %v367_v43 = vor.u32 1.1754944e-38, %v366_v35  ;;  %vm330_vm7 = vweird.f32 %v4379_v53 }
  0xe9   :  { %v4411_v20 = vsel %vm290_vm9, %v292_v14, %v288_v9  ;;  %v303_v21 = vsel %vm4404_vm10, %v3672_v47, %v299_v4  ;;  %v313_v23 = vmul.f32 %v4385_v57, %v312_v5  ;;  %v334_v59 = vand.u32 2147483647, %v4379_v53 }
  0xea   :  { %v4393_v2 = vpop.eup %3681  ;;  %v4422_v28 = vsel %vm305_vm11, %v307_v25, %v303_v21  ;;  %v359_v29 = vadd.f32 %v4383_v55, %v358_v17  ;;  %vm345_vm8 = vweird.f32 %v4381_v54  ;;  %v349_v60 = vand.u32 2147483647, %v4381_v54 }
  0xeb   :  { %v4399_v7 = vpop.eup %3683  ;;  %v326_v18 = vmul.f32 %v4393_v2, %v4379_v53  ;;  %v314_v34 = vadd.f32 %v4385_v57, %v313_v23  ;;  %vm331_vm5 = vweird.f32 %v4393_v2  ;;  %v352_v1 = vor.u32 1.1754944e-38, %v351_v58 }
  0xec   :  { %v341_v22 = vmul.f32 %v4399_v7, %v4381_v54  ;;  %v3686_v40 = vpop.eup %3685  ;;  %v363_v41 = vsel %vm362_vm0, %v4383_v55, %v359_v29  ;;  %vm346_vm6 = vweird.f32 %v4399_v7  ;;  %vm332_vm9 = vmor %vm330_vm7, %vm331_vm5  ;;  %vm335_vm11 = vcmp.eq.f32.partialorder %v334_v59, 8.507059e+37 }
  0xed   :  { %v327_v31 = vsub.f32 1.0, %v326_v18  ;;  %v318_v44 = vsel %vm317_vm1, %v4385_v57, %v314_v34  ;;  %v4443_v46 = vsel %vm365_vm2, %v367_v43, %v363_v41  ;;  %v278_v48 = vadd.f32 1.0, %v3686_v40  ;;  %v3688_v61 = vpop.eup %3687  ;;  %vm347_vm10 = vmor %vm345_vm8, %vm346_vm6 }
  0xee   :  { %v342_v33 = vsub.f32 1.0, %v341_v22  ;;  %v4445_v50 = vsel %vm320_vm4, %v322_v45, %v318_v44  ;;  %v336_v57 = vand.u32 2147483648, %v4379_v53  ;;  %vm350_vm12 = vcmp.eq.f32.partialorder %v349_v60, 8.507059e+37 }
  0xef   :  { %v328_v30 = vmul.f32 %v4393_v2, %v327_v31  ;;  %3689 = vrcp.f32 %v278_v48  ;;  %v279_v4 = vadd.f32 1.0, %v3688_v61  ;;  %v381_v18 = vand.u32 2147483648, %v278_v48 }
  0xf0   :  { %v343_v42 = vmul.f32 %v4399_v7, %v342_v33  ;;  %v337_v0 = vor.u32 1.1754944e-38, %v336_v57  ;;  %vm375_vm14 = vweird.f32 %v278_v48  ;;  %v409_v37 = vmul.f32 0.0, %v4422_v28 }
  0xf1   :  { %v329_v52 = vadd.f32 %v4393_v2, %v328_v30  ;;  %3691 = vrcp.f32 %v279_v4  ;;  %v382_v23 = vor.u32 1.1754944e-38, %v381_v18  ;;  %v396_v29 = vand.u32 2147483648, %v279_v4 }
  0xf2   :  { %v344_v55 = vadd.f32 %v4399_v7, %v343_v42  ;;  %vm390_vm2 = vweird.f32 %v279_v4  ;;  %v394_v31 = vand.u32 2147483647, %v279_v4  ;;  %v408_v44 = vmul.f32 0.0, %v4411_v20 }
  0xf3   :  { %v333_v62 = vsel %vm332_vm9, %v4393_v2, %v329_v52  ;;  %v397_v33 = vor.u32 1.1754944e-38, %v396_v29  ;;  %vm577_vm6 = vcmask 1041409   ;;  %vm580_vm7 = vcmask 1042434  }
  0xf4   :  { %v348_v63 = vsel %vm347_vm10, %v4399_v7, %v344_v55  ;;  %v4463_v53 = vsel %vm335_vm11, %v337_v0, %v333_v62  ;;  %vm395_vm5 = vcmp.eq.f32.partialorder %v394_v31, 8.507059e+37  ;;  %vm583_vm8 = vcmask 1043459  }
  0xf5   :  { %v4465_v5 = vsel %vm350_vm12, %v352_v1, %v348_v63  ;;  %v3690_v8 = vpop.eup %3689  ;;  %v411_v41 = vmul.f32 0.0, %v4463_v53  ;;  %vm586_vm9 = vcmask 1044484   ;;  %vm589_vm10 = vcmask 1045509  }
  0xf6   :  { %v371_v2 = vmul.f32 %v3690_v8, %v278_v48  ;;  %vm376_vm13 = vweird.f32 %v3690_v8  ;;  %v412_v59 = vmul.f32 0.0, %v4465_v5  ;;  %vm592_vm11 = vcmask 1046534  }
  0xf7   :  { %v3692_v10 = vpop.eup %3691  ;;  %vm377_vm15 = vmor %vm375_vm14, %vm376_vm13  ;;  %vm595_vm12 = vcmask 1047559   ;;  %vm207_vm13 = vcmask 261120  }
  0xf8   :  { %v372_v7 = vsub.f32 1.0, %v371_v2  ;;  %v386_v15 = vmul.f32 %v3692_v10, %v279_v4  ;;  %vm391_vm1 = vweird.f32 %v3692_v10 }
  0xf9   :  { %vm392_vm4 = vmor %vm390_vm2, %vm391_vm1 }
  0xfa   :  { %v373_v14 = vmul.f32 %v3690_v8, %v372_v7  ;;  %v387_v17 = vsub.f32 1.0, %v386_v15 }
  0xfc   :  { %v374_v16 = vadd.f32 %v3690_v8, %v373_v14  ;;  %v388_v22 = vmul.f32 %v3692_v10, %v387_v17 }
  0xfe   :  { %v378_v21 = vsel %vm377_vm15, %v3690_v8, %v374_v16 }
 0x110   :  { %v425_v19 = vpop.permute.xlu1 %424 }
 0x111   :  { %v448_v24 = vmul.f32 %v425_v19, %v4411_v20  ;;  %v379_v19 = vand.u32 2147483647, %v278_v48 }
 0x113   :  { %464 = vrot.lane.b32.xlu1 %v448_v24, %s4170_s5  ;;  %vm380_vm0 = vcmp.eq.f32.partialorder %v379_v19, 8.507059e+37 }
 0x114   :  { %v4472_v25 = vsel %vm380_vm0, %v382_v23, %v378_v21 }
 0x115   :  { %v414_v58 = vmul.f32 0.0, %v4472_v25 }
 0x118   :  { %v4419_v26 = vpop.permute.xlu2 %432  ;;  %v427_v27 = vpop.permute.xlu0 %426 }
 0x119   :  { %v449_v32 = vmul.f32 %v427_v27, %v4422_v28  ;;  %v452_v9 = vmul.f32 %v4419_v26, %v4465_v5  ;;  %v389_v27 = vadd.f32 %v3692_v10, %v388_v22 }
 0x11b   :  { %466 = vrot.lane.b32.xlu2 %v449_v32, %s4170_s5  ;;  %v393_v32 = vsel %vm392_vm4, %v3692_v10, %v389_v27 }
 0x11c   :  { %v4476_v35 = vsel %vm395_vm5, %v397_v33, %v393_v32 }
 0x120   :  { %v435_v47 = vpop.permute.xlu2 %434  ;;  %v429_v49 = vpop.permute.xlu0 %428 }
 0x121   :  { %v453_v51 = vmul.f32 %v435_v47, %v4443_v46  ;;  %v450_v56 = vmul.f32 %v429_v49, %v4445_v50  ;;  %v413_v49 = vmul.f32 0.0, %v4443_v46 }
 0x123   :  { %474 = vrot.lane.b32.xlu1 %v453_v51, %s4170_s5  ;;  %468 = vrot.lane.b32.xlu0 %v450_v56, %s4170_s5  ;;  %v410_v51 = vmul.f32 0.0, %v4445_v50 }
 0x128   :  { %v431_v3 = vpop.permute.xlu1 %430 }
 0x129   :  { %v451_v54 = vmul.f32 %v431_v3, %v4463_v53 }
 0x12b   :  { %470 = vrot.lane.b32.xlu2 %v451_v54, %s4170_s5  ;;  %472 = vrot.lane.b32.xlu0 %v452_v9, %s4170_s5  ;;  %v415_v54 = vmul.f32 0.0, %v4476_v35 }
 0x140   :  { %v437_v24 = vpop.permute.xlu0 %436 }
 0x141   :  { %v454_v26 = vmul.f32 %v437_v24, %v4472_v25 }
 0x143   :  { %476 = vrot.lane.b32.xlu2 %v454_v26, %s4170_s5 }
 0x148   :  { %v439_v34 = vpop.permute.xlu1 %438 }
 0x149   :  { %v455_v36 = vmul.f32 %v439_v34, %v4476_v35 }
 0x14b   :  { %478 = vrot.lane.b32.xlu0 %v455_v36, %s4170_s5 }
 0x175   :  { %v467_v38 = vpop.permute.xlu2 %466 }
 0x176   :  { %v4481_v39 = vadd.f32 %v467_v38, %v409_v37 }
 0x178   :  { %3693 = vtanh.f32 %v4481_v39 }
 0x17e   :  { %v3694_v40 = vpop.eup %3693 }
 0x17f   :  { %514 = vrot.lane.b32.xlu1 %v3694_v40, %s4169_s0 }
 0x185   :  { %v471_v30 = vpop.permute.xlu2 %470  ;;  %v465_v43 = vpop.permute.xlu1 %464 }
 0x186   :  { %v4486_v42 = vadd.f32 %v471_v30, %v411_v41  ;;  %v4490_v45 = vadd.f32 %v465_v43, %v408_v44 }
 0x188   :  { %3695 = vtanh.f32 %v4486_v42 }
 0x189   :  { %3697 = vtanh.f32 %v4490_v45 }
 0x18e   :  { %v3696_v47 = vpop.eup %3695 }
 0x18f   :  { %518 = vrot.lane.b32.xlu1 %v3696_v47, %s4169_s0  ;;  %v3698_v48 = vpop.eup %3697 }
 0x190   :  { %512 = vrot.lane.b32.xlu0 %v3698_v48, %s4169_s0 }
 0x195   :  { %v475_v52 = vpop.permute.xlu1 %474  ;;  %v469_v55 = vpop.permute.xlu0 %468 }
 0x196   :  { %v4497_v56 = vadd.f32 %v475_v52, %v413_v49  ;;  %v4499_v57 = vadd.f32 %v469_v55, %v410_v51 }
 0x198   :  { %3699 = vtanh.f32 %v4497_v56 }
 0x199   :  { %3701 = vtanh.f32 %v4499_v57 }
 0x19d   :  { %v477_v60 = vpop.permute.xlu2 %476  ;;  %v473_v62 = vpop.permute.xlu0 %472 }
 0x19e   :  { %v3700_v61 = vpop.eup %3699  ;;  %v4505_v63 = vadd.f32 %v477_v60, %v414_v58  ;;  %v4507_v1 = vadd.f32 %v473_v62, %v412_v59 }
 0x19f   :  { %v3702_v0 = vpop.eup %3701  ;;  %522 = vrot.lane.b32.xlu0 %v3700_v61, %s4169_s0 }
 0x1a0   :  { %3703 = vtanh.f32 %v4505_v63  ;;  %516 = vrot.lane.b32.xlu2 %v3702_v0, %s4169_s0 }
 0x1a1   :  { %3705 = vtanh.f32 %v4507_v1 }
 0x1a6   :  { %v3704_v3 = vpop.eup %3703 }
 0x1a7   :  { %v3706_v4 = vpop.eup %3705  ;;  %524 = vrot.lane.b32.xlu1 %v3704_v3, %s4169_s0 }
 0x1a8   :  { %520 = vrot.lane.b32.xlu2 %v3706_v4, %s4169_s0 }
 0x1bd   :  { %v479_v8 = vpop.permute.xlu0 %478 }
 0x1be   :  { %v4516_v9 = vadd.f32 %v479_v8, %v415_v54  ;;  %v544_v54 = vld [vmem:[#allocation2 + $0x1] sm:$0x1] }
 0x1c0   :  { %3707 = vtanh.f32 %v4516_v9 }
 0x1c6   :  { %v3708_v2 = vpop.eup %3707 }
 0x1c7   :  { %526 = vrot.lane.b32.xlu2 %v3708_v2, %s4169_s0 }
 0x1f1   :  { %v515_v7 = vpop.permute.xlu1 %514 }
 0x1f2   :  { %v537_v15 = vmul.f32 %v515_v7, %v4422_v28 }
 0x1f4   :  { %v553_v19 = vpack.c.bf16 %v537_v15, %v537_v15  ;;  %v545_v15 = vld [vmem:[#allocation2 + $0x9] sm:$0x1] }
 0x1f6   :  { %v569_v27 = vunpack.c.l.b16 %v553_v19 }
 0x1fa   :  { %v517_v10 = vpop.permute.xlu2 %516 }
 0x1fb   :  { %v538_v18 = vmul.f32 %v517_v10, %v4445_v50  ;;  %v576_v50 = vrot.slane %v569_v27, 7  ;;  %v546_v10 = vld [vmem:[#allocation2 + $0x11] sm:$0x1] }
 0x1fd   :  { %v554_v26 = vpack.c.bf16 %v538_v18, %v538_v18  ;;  %v549_v18 = vld [vmem:[#allocation2 + $0x29] sm:$0x1] }
 0x201   :  { %v519_v16 = vpop.permute.xlu1 %518 }
 0x202   :  { %v513_v14 = vpop.permute.xlu0 %512  ;;  %v521_v22 = vpop.permute.xlu2 %520  ;;  %v539_v23 = vmul.f32 %v519_v16, %v4463_v53 }
 0x203   :  { %v536_v17 = vmul.f32 %v513_v14, %v4411_v20  ;;  %v540_v31 = vmul.f32 %v521_v22, %v4465_v5  ;;  %v570_v20 = vunpack.c.l.b16 %v554_v26  ;;  %v547_v26 = vld [vmem:[#allocation2 + $0x19] sm:$0x1] }
 0x204   :  { %v555_v33 = vpack.c.bf16 %v539_v23, %v539_v23 }
 0x205   :  { %v552_v24 = vpack.c.bf16 %v536_v17, %v536_v17  ;;  %v556_v37 = vpack.c.bf16 %v540_v31, %v540_v31  ;;  %v579_v41 = vrot.slane %v570_v20, 6 }
 0x206   :  { %v571_v40 = vunpack.c.l.b16 %v555_v33 }
 0x207   :  { %v568_v28 = vunpack.c.l.b16 %v552_v24 }
 0x208   :  { %v582_v47 = vrot.slane %v571_v40, 5 }
 0x209   :  { %v578_v53 = vsel %vm577_vm6, %v576_v50, %v568_v28  ;;  %v550_v50 = vld [vmem:[#allocation2 + $0x31] sm:$0x1] }
 0x20a   :  { %v581_v5 = vsel %vm580_vm7, %v579_v41, %v578_v53 }
 0x20b   :  { %v584_v48 = vsel %vm583_vm8, %v582_v47, %v581_v5 }
 0x211   :  { %v523_v21 = vpop.permute.xlu0 %522 }
 0x212   :  { %v541_v29 = vmul.f32 %v523_v21, %v4443_v46  ;;  %v572_v46 = vunpack.c.l.b16 %v556_v37 }
 0x214   :  { %v557_v36 = vpack.c.bf16 %v541_v29, %v541_v29  ;;  %v585_v52 = vrot.slane %v572_v46, 4 }
 0x216   :  { %v573_v30 = vunpack.c.l.b16 %v557_v36  ;;  %v587_v59 = vsel %vm586_vm9, %v585_v52, %v584_v48 }
 0x218   :  { %v588_v49 = vrot.slane %v573_v30, 3 }
 0x219   :  { %v525_v32 = vpop.permute.xlu1 %524 }
 0x21a   :  { %v542_v34 = vmul.f32 %v525_v32, %v4472_v25  ;;  %v590_v60 = vsel %vm589_vm10, %v588_v49, %v587_v59 }
 0x21c   :  { %v558_v38 = vpack.c.bf16 %v542_v34, %v542_v34  ;;  %v551_v34 = vld [vmem:[#allocation2 + $0x39] sm:$0x1] }
 0x21e   :  { %v574_v44 = vunpack.c.l.b16 %v558_v38 }
 0x220   :  { %v591_v55 = vrot.slane %v574_v44, 2 }
 0x221   :  { %v527_v43 = vpop.permute.xlu2 %526 }
 0x222   :  { %v543_v25 = vmul.f32 %v527_v43, %v4476_v35  ;;  %v593_v62 = vsel %vm592_vm11, %v591_v55, %v590_v60 }
 0x224   :  { %v559_v51 = vpack.c.bf16 %v543_v25, %v543_v25 }
 0x226   :  { %v575_v58 = vunpack.c.l.b16 %v559_v51 }
 0x228   :  { %v594_v61 = vrot.slane %v575_v58, 1 }
 0x22a   :  { %v596_v35 = vsel %vm595_vm12, %v594_v61, %v593_v62 }
 0x22b   :  { %v597_v0 = vpack.c.b16 %v596_v35, %v596_v35 }
 0x22d   :  { %598 = vrot.lane.b32.xlu0 %v597_v0, %s4170_s5 }
 0x29f   :  { %v599_v3 = vpop.permute.xlu0 %598 }
 0x2a0   :  { %3526 = vmatmul.msk.bf16.vlgmr.msra.gmra.mxu3 %vm207_vm13, %v599_v3 }
 0x2a1   :  { %2919 = vmatpush.bf16.msra.mxu3 %v4281_v11 }
 0x2a5   :  { %2920 = vmatpush.bf16.msra.mxu3 %v4289_v13  ;;  %v548_v13 = vld [vmem:[#allocation2 + $0x21] sm:$0x1] }
 0x323   :  { %v612_v4 = vpop.f32.mrf.mxu3 }
 0x324   :  { %v632_v8 = vadd.f32 %v612_v4, %v544_v54  ;;  %v618_v2 = vrot.slane %v612_v4, 2  ;;  %v617_v7 = vrot.slane %v612_v4, 1  ;;  %v621_v16 = vrot.slane %v612_v4, 5 }
 0x325   :  { %v620_v19 = vrot.slane %v612_v4, 4  ;;  %v619_v11 = vrot.slane %v612_v4, 3  ;;  %v623_v32 = vrot.slane %v612_v4, 7  ;;  %v622_v33 = vrot.slane %v612_v4, 6 }
 0x326   :  { %3709 = vtanh.f32 %v632_v8  ;;  %v634_v14 = vadd.f32 %v618_v2, %v546_v10  ;;  %v633_v17 = vadd.f32 %v617_v7, %v545_v15  ;;  %v637_v21 = vadd.f32 %v621_v16, %v549_v18 }
 0x327   :  { %v636_v24 = vadd.f32 %v620_v19, %v548_v13  ;;  %v635_v29 = vadd.f32 %v619_v11, %v547_v26  ;;  %v639_v20 = vadd.f32 %v623_v32, %v551_v34  ;;  %v638_v37 = vadd.f32 %v622_v33, %v550_v50 }
 0x328   :  { %3711 = vtanh.f32 %v634_v14  ;;  %v3529_v41 = vmul.f32 -1.442695, %v634_v14  ;;  %v3527_v47 = vmul.f32 -1.442695, %v632_v8  ;;  %v3528_v51 = vmul.f32 -1.442695, %v633_v17 }
 0x329   :  { %3713 = vtanh.f32 %v633_v17  ;;  %v3531_v30 = vmul.f32 -1.442695, %v636_v24  ;;  %v3534_v44 = vmul.f32 -1.442695, %v639_v20  ;;  %v3532_v55 = vmul.f32 -1.442695, %v637_v21 }
 0x32a   :  { %3715 = vtanh.f32 %v637_v21  ;;  %v3530_v62 = vmul.f32 -1.442695, %v635_v29  ;;  %v3533_v15 = vmul.f32 -1.442695, %v638_v37 }
 0x32b   :  { %v614_v22 = vpop.f32.mrf.mxu3  ;;  %3717 = vtanh.f32 %v636_v24 }
 0x32c   :  { %v3710_v23 = vpop.eup %3709  ;;  %3719 = vtanh.f32 %v635_v29 }
 0x32d   :  { %816 = vrot.lane.b32.xlu0 %v3710_v23, %s4169_s0  ;;  %3721 = vtanh.f32 %v639_v20 }
 0x32e   :  { %v3712_v27 = vpop.eup %3711  ;;  %3723 = vtanh.f32 %v638_v37 }
 0x32f   :  { %820 = vrot.lane.b32.xlu2 %v3712_v27, %s4169_s0  ;;  %v3714_v31 = vpop.eup %3713  ;;  %3725 = vpow2.f32 %v3529_v41 }
 0x330   :  { %818 = vrot.lane.b32.xlu1 %v3714_v31, %s4169_s0  ;;  %v3716_v28 = vpop.eup %3715  ;;  %3727 = vpow2.f32 %v3531_v30 }
 0x331   :  { %v3718_v36 = vpop.eup %3717 }
 0x332   :  { %v3720_v38 = vpop.eup %3719 }
 0x333   :  { %v3722_v40 = vpop.eup %3721 }
 0x334   :  { %v3724_v53 = vpop.eup %3723 }
 0x335   :  { %826 = vrot.lane.b32.xlu0 %v3716_v28, %s4169_s0  ;;  %v3726_v46 = vpop.eup %3725 }
 0x336   :  { %v666_v5 = vadd.f32 1.0, %v3726_v46  ;;  %v3728_v43 = vpop.eup %3727 }
 0x337   :  { %824 = vrot.lane.b32.xlu2 %v3718_v36, %s4169_s0  ;;  %v4547_v25 = vadd.f32 1.0, %v3728_v43 }
 0x338   :  { %822 = vrot.lane.b32.xlu1 %v3720_v38, %s4169_s0  ;;  %3729 = vrcp.f32 %v666_v5  ;;  %v713_v10 = vand.u32 2147483648, %v666_v5  ;;  %vm707_vm15 = vweird.f32 %v666_v5  ;;  %v711_v16 = vand.u32 2147483647, %v666_v5 }
 0x339   :  { %3731 = vpow2.f32 %v3534_v44  ;;  %v743_v31 = vand.u32 2147483648, %v4547_v25  ;;  %vm737_vm4 = vweird.f32 %v4547_v25  ;;  %v741_v28 = vand.u32 2147483647, %v4547_v25 }
 0x33a   :  { %3733 = vpow2.f32 %v3527_v47  ;;  %v714_v11 = vor.u32 1.1754944e-38, %v713_v10  ;;  %vm712_vm1 = vcmp.eq.f32.partialorder %v711_v16, 8.507059e+37 }
 0x33b   :  { %3735 = vrcp.f32 %v4547_v25  ;;  %v744_v38 = vor.u32 1.1754944e-38, %v743_v31 }
 0x33c   :  { %3737 = vpow2.f32 %v3528_v51 }
 0x33d   :  { %3739 = vpow2.f32 %v3532_v55 }
 0x33e   :  { %v3730_v48 = vpop.eup %3729 }
 0x33f   :  { %830 = vrot.lane.b32.xlu2 %v3722_v40, %s4169_s0  ;;  %v3732_v49 = vpop.eup %3731  ;;  %v703_v52 = vmul.f32 %v3730_v48, %v666_v5  ;;  %vm708_vm14 = vweird.f32 %v3730_v48 }
 0x340   :  { %828 = vrot.lane.b32.xlu1 %v3724_v53, %s4169_s0  ;;  %v4550_v58 = vadd.f32 1.0, %v3732_v49  ;;  %v3734_v59 = vpop.eup %3733  ;;  %vm709_vm0 = vmor %vm707_vm15, %vm708_vm14  ;;  %vm742_vm14 = vcmp.eq.f32.partialorder %v741_v28, 8.507059e+37 }
 0x341   :  { %v704_v60 = vsub.f32 1.0, %v703_v52  ;;  %v3736_v61 = vpop.eup %3735  ;;  %v4554_v3 = vadd.f32 1.0, %v3734_v59 }
 0x342   :  { %3741 = vrcp.f32 %v4550_v58  ;;  %v733_v0 = vmul.f32 %v3736_v61, %v4547_v25  ;;  %v3738_v4 = vpop.eup %3737  ;;  %vm738_vm2 = vweird.f32 %v3736_v61  ;;  %v788_v44 = vand.u32 2147483648, %v4550_v58 }
 0x343   :  { %v705_v35 = vmul.f32 %v3730_v48, %v704_v60  ;;  %3743 = vpow2.f32 %v3530_v62  ;;  %v3740_v54 = vpop.eup %3739  ;;  %v4559_v14 = vadd.f32 1.0, %v3738_v4  ;;  %vm739_vm5 = vmor %vm737_vm4, %vm738_vm2  ;;  %v681_v4 = vand.u32 2147483647, %v4554_v3 }
 0x344   :  { %v734_v2 = vsub.f32 1.0, %v733_v0  ;;  %3745 = vrcp.f32 %v4554_v3  ;;  %v4561_v17 = vadd.f32 1.0, %v3740_v54  ;;  %v789_v55 = vor.u32 1.1754944e-38, %v788_v44 }
 0x345   :  { %v706_v8 = vadd.f32 %v3730_v48, %v705_v35  ;;  %3747 = vrcp.f32 %v4559_v14 }
 0x346   :  { %v735_v19 = vmul.f32 %v3736_v61, %v734_v2  ;;  %3749 = vpow2.f32 %v3533_v15 }
 0x347   :  { %v710_v18 = vsel %vm709_vm0, %v3730_v48, %v706_v8  ;;  %3751 = vrcp.f32 %v4561_v17  ;;  %vm782_vm0 = vweird.f32 %v4550_v58  ;;  %v786_v48 = vand.u32 2147483647, %v4550_v58 }
 0x348   :  { %v4557_v7 = vpop.eup %3741  ;;  %v4568_v24 = vsel %vm712_vm1, %v714_v11, %v710_v18  ;;  %v736_v27 = vadd.f32 %v3736_v61, %v735_v19  ;;  %v698_v18 = vand.u32 2147483648, %v4559_v14 }
 0x349   :  { %v778_v21 = vmul.f32 %v4557_v7, %v4550_v58  ;;  %v3744_v22 = vpop.eup %3743  ;;  %vm783_vm15 = vweird.f32 %v4557_v7  ;;  %vm787_vm4 = vcmp.eq.f32.partialorder %v786_v48, 8.507059e+37 }
 0x34a   :  { %v4566_v23 = vpop.eup %3745  ;;  %v4575_v33 = vadd.f32 1.0, %v3744_v22  ;;  %v740_v50 = vsel %vm739_vm5, %v3736_v61, %v736_v27  ;;  %vm784_vm1 = vmor %vm782_vm0, %vm783_vm15  ;;  %v683_v61 = vand.u32 2147483648, %v4554_v3  ;;  %vm677_vm5 = vweird.f32 %v4554_v3 }
 0x34b   :  { %v779_v29 = vsub.f32 1.0, %v778_v21  ;;  %v673_v32 = vmul.f32 %v4566_v23, %v4554_v3  ;;  %v4580_v34 = vpop.eup %3747  ;;  %v4588_v41 = vsel %vm742_vm14, %v744_v38, %v740_v50  ;;  %vm678_vm2 = vweird.f32 %v4566_v23 }
 0x34c   :  { %v3750_v20 = vpop.eup %3749  ;;  %3753 = vrcp.f32 %v4575_v33  ;;  %v688_v53 = vmul.f32 %v4580_v34, %v4559_v14  ;;  %vm679_vm14 = vmor %vm677_vm5, %vm678_vm2  ;;  %vm693_vm15 = vweird.f32 %v4580_v34  ;;  %vm682_vm0 = vcmp.eq.f32.partialorder %v681_v4, 8.507059e+37 }
 0x34d   :  { %v780_v36 = vmul.f32 %v4557_v7, %v779_v29  ;;  %v4583_v37 = vpop.eup %3751  ;;  %v674_v40 = vsub.f32 1.0, %v673_v32  ;;  %v4597_v25 = vadd.f32 1.0, %v3750_v20  ;;  %v696_v21 = vand.u32 2147483647, %v4559_v14 }
 0x34e   :  { %v748_v47 = vmul.f32 %v4583_v37, %v4561_v17  ;;  %v689_v49 = vsub.f32 1.0, %v688_v53  ;;  %v699_v29 = vor.u32 1.1754944e-38, %v698_v18  ;;  %vm752_vm5 = vweird.f32 %v4561_v17 }
 0x34f   :  { %v781_v5 = vadd.f32 %v4557_v7, %v780_v36  ;;  %v675_v43 = vmul.f32 %v4566_v23, %v674_v40  ;;  %3755 = vrcp.f32 %v4597_v25  ;;  %v728_v38 = vand.u32 2147483648, %v4575_v33 }
 0x350   :  { %v749_v60 = vsub.f32 1.0, %v748_v47  ;;  %v690_v62 = vmul.f32 %v4580_v34, %v689_v49  ;;  %v773_v49 = vand.u32 2147483648, %v4597_v25 }
 0x351   :  { %v785_v52 = vsel %vm784_vm1, %v4557_v7, %v781_v5  ;;  %v676_v59 = vadd.f32 %v4566_v23, %v675_v43  ;;  %v684_v7 = vor.u32 1.1754944e-38, %v683_v61  ;;  %vm692_vm1 = vweird.f32 %v4559_v14 }
 0x352   :  { %v4602_v51 = vpop.eup %3753  ;;  %v4612_v35 = vsel %vm787_vm4, %v789_v55, %v785_v52  ;;  %v750_v2 = vmul.f32 %v4583_v37, %v749_v60  ;;  %v691_v10 = vadd.f32 %v4580_v34, %v690_v62  ;;  %vm694_vm2 = vmor %vm692_vm1, %vm693_vm15  ;;  %vm753_vm4 = vweird.f32 %v4583_v37 }
 0x353   :  { %v718_v58 = vmul.f32 %v4602_v51, %v4575_v33  ;;  %v680_v8 = vsel %vm679_vm14, %v4566_v23, %v676_v59  ;;  %v758_v23 = vand.u32 2147483648, %v4561_v17  ;;  %v756_v14 = vand.u32 2147483647, %v4561_v17  ;;  %vm754_vm15 = vmor %vm752_vm5, %vm753_vm4 }
 0x354   :  { %v4623_v19 = vsel %vm682_vm0, %v684_v7, %v680_v8  ;;  %v751_v11 = vadd.f32 %v4583_v37, %v750_v2  ;;  %vm697_vm14 = vcmp.eq.f32.partialorder %v696_v21, 8.507059e+37  ;;  %vm723_vm0 = vweird.f32 %v4602_v51 }
 0x355   :  { %v719_v15 = vsub.f32 1.0, %v718_v58  ;;  %v3756_v16 = vpop.eup %3755  ;;  %v759_v20 = vor.u32 1.1754944e-38, %v758_v23  ;;  %vm757_vm1 = vcmp.eq.f32.partialorder %v756_v14, 8.507059e+37  ;;  %v729_v5 = vor.u32 1.1754944e-38, %v728_v38 }
 0x356   :  { %v763_v27 = vmul.f32 %v3756_v16, %v4597_v25  ;;  %v755_v28 = vsel %vm754_vm15, %v4583_v37, %v751_v11  ;;  %v726_v37 = vand.u32 2147483647, %v4575_v33  ;;  %vm767_vm15 = vweird.f32 %v4597_v25 }
 0x357   :  { %v4645_v40 = vsel %vm757_vm1, %v759_v20, %v755_v28  ;;  %v774_v52 = vor.u32 1.1754944e-38, %v773_v49  ;;  %v800_v61 = vmul.f32 %v4623_v19, %v4490_v45  ;;  %v804_v45 = vmul.f32 %v4588_v41, %v4507_v1 }
 0x358   :  { %v764_v36 = vsub.f32 1.0, %v763_v27  ;;  %vm727_vm5 = vcmp.eq.f32.partialorder %v726_v37, 8.507059e+37 }
 0x389   :  { %v821_v13 = vpop.permute.xlu2 %820 }
 0x38a   :  { %v842_v26 = vmul.f32 %v821_v13, %v4568_v24  ;;  %v695_v13 = vsel %vm694_vm2, %v4580_v34, %v691_v10  ;;  %vm722_vm2 = vweird.f32 %v4575_v33  ;;  %v771_v33 = vand.u32 2147483647, %v4597_v25 }
 0x38b   :  { %v4637_v32 = vsel %vm697_vm14, %v699_v29, %v695_v13  ;;  %vm724_vm4 = vmor %vm722_vm2, %vm723_vm0  ;;  %vm768_vm14 = vweird.f32 %v3756_v16  ;;  %v802_v25 = vmul.f32 %v4568_v24, %v4499_v57 }
 0x38c   :  { %860 = vrot.lane.b32.xlu1 %v842_v26, %s4170_s5  ;;  %v720_v26 = vmul.f32 %v4602_v51, %v719_v15  ;;  %vm769_vm0 = vmor %vm767_vm15, %vm768_vm14  ;;  %vm772_vm1 = vcmp.eq.f32.partialorder %v771_v33, 8.507059e+37 }
 0x38e   :  { %v721_v50 = vadd.f32 %v4602_v51, %v720_v26 }
 0x391   :  { %v825_v30 = vpop.permute.xlu2 %824 }
 0x392   :  { %v844_v46 = vmul.f32 %v825_v30, %v4588_v41  ;;  %v725_v30 = vsel %vm724_vm4, %v4602_v51, %v721_v50 }
 0x393   :  { %v4652_v44 = vsel %vm727_vm5, %v729_v5, %v725_v30 }
 0x394   :  { %864 = vrot.lane.b32.xlu1 %v844_v46, %s4170_s5  ;;  %v765_v46 = vmul.f32 %v3756_v16, %v764_v36 }
 0x396   :  { %v766_v48 = vadd.f32 %v3756_v16, %v765_v46 }
 0x398   :  { %v770_v51 = vsel %vm769_vm0, %v3756_v16, %v766_v48  ;;  %v807_v16 = vmul.f32 %v4612_v35, %v4516_v9  ;;  %v803_v9 = vmul.f32 %v4652_v44, %v4486_v42 }
 0x399   :  { %v831_v0 = vpop.permute.xlu2 %830  ;;  %v4659_v55 = vsel %vm772_vm1, %v774_v52, %v770_v51 }
 0x39a   :  { %v847_v54 = vmul.f32 %v831_v0, %v4612_v35 }
 0x39c   :  { %870 = vrot.lane.b32.xlu1 %v847_v54, %s4170_s5  ;;  %v805_v54 = vmul.f32 %v4645_v40, %v4497_v56 }
 0x39f   :  { %v817_v3 = vpop.permute.xlu0 %816 }
 0x3a0   :  { %v840_v22 = vmul.f32 %v817_v3, %v4623_v19 }
 0x3a2   :  { %856 = vrot.lane.b32.xlu2 %v840_v22, %s4170_s5  ;;  %v819_v31 = vpop.permute.xlu1 %818  ;;  %v801_v22 = vmul.f32 %v4637_v32, %v4481_v39  ;;  %v806_v39 = vmul.f32 %v4659_v55, %v4505_v63 }
 0x3a3   :  { %v841_v34 = vmul.f32 %v819_v31, %v4637_v32 }
 0x3a5   :  { %858 = vrot.lane.b32.xlu0 %v841_v34, %s4170_s5 }
 0x3a7   :  { %v827_v17 = vpop.permute.xlu0 %826 }
 0x3a8   :  { %v845_v53 = vmul.f32 %v827_v17, %v4645_v40 }
 0x3aa   :  { %866 = vrot.lane.b32.xlu2 %v845_v53, %s4170_s5  ;;  %v823_v43 = vpop.permute.xlu1 %822 }
 0x3ab   :  { %v843_v47 = vmul.f32 %v823_v43, %v4652_v44 }
 0x3ad   :  { %862 = vrot.lane.b32.xlu0 %v843_v47, %s4170_s5 }
 0x3b2   :  { %v829_v59 = vpop.permute.xlu1 %828 }
 0x3b3   :  { %v846_v60 = vmul.f32 %v829_v59, %v4659_v55 }
 0x3b5   :  { %868 = vrot.lane.b32.xlu0 %v846_v60, %s4170_s5 }
 0x3fc   :  { %v857_v62 = vpop.permute.xlu2 %856 }
 0x3fd   :  { %v4665_v58 = vadd.f32 %v857_v62, %v800_v61 }
 0x3fe   :  { %v861_v0 = vpop.permute.xlu1 %860 }
 0x3ff   :  { %3757 = vtanh.f32 %v4665_v58  ;;  %v4670_v4 = vadd.f32 %v861_v0, %v802_v25 }
 0x401   :  { %3759 = vtanh.f32 %v4670_v4 }
 0x404   :  { %v867_v8 = vpop.permute.xlu2 %866 }
 0x405   :  { %v3758_v2 = vpop.eup %3757  ;;  %v4675_v7 = vadd.f32 %v867_v8, %v805_v54 }
 0x406   :  { %904 = vrot.lane.b32.xlu1 %v3758_v2, %s4169_s0  ;;  %v865_v57 = vpop.permute.xlu1 %864 }
 0x407   :  { %3761 = vtanh.f32 %v4675_v7  ;;  %v3760_v10 = vpop.eup %3759  ;;  %v4681_v15 = vadd.f32 %v865_v57, %v804_v45 }
 0x408   :  { %908 = vrot.lane.b32.xlu0 %v3760_v10, %s4169_s0 }
 0x409   :  { %3763 = vtanh.f32 %v4681_v15 }
 0x40d   :  { %v3762_v56 = vpop.eup %3761 }
 0x40e   :  { %914 = vrot.lane.b32.xlu1 %v3762_v56, %s4169_s0  ;;  %v871_v18 = vpop.permute.xlu1 %870 }
 0x40f   :  { %v3764_v3 = vpop.eup %3763  ;;  %v4688_v21 = vadd.f32 %v871_v18, %v807_v16 }
 0x410   :  { %912 = vrot.lane.b32.xlu0 %v3764_v3, %s4169_s0 }
 0x411   :  { %3765 = vtanh.f32 %v4688_v21 }
 0x417   :  { %v3766_v1 = vpop.eup %3765  ;;  %v859_v11 = vpop.permute.xlu0 %858 }
 0x418   :  { %918 = vrot.lane.b32.xlu0 %v3766_v1, %s4169_s0  ;;  %v4695_v23 = vadd.f32 %v859_v11, %v801_v22 }
 0x41a   :  { %3767 = vtanh.f32 %v4695_v23 }
 0x41f   :  { %v863_v13 = vpop.permute.xlu0 %862 }
 0x420   :  { %v3768_v26 = vpop.eup %3767  ;;  %v4700_v27 = vadd.f32 %v863_v13, %v803_v9 }
 0x421   :  { %906 = vrot.lane.b32.xlu2 %v3768_v26, %s4169_s0  ;;  %v936_v26 = vld [vmem:[#allocation2 + $0x2] sm:$0x1] }
 0x422   :  { %3769 = vtanh.f32 %v4700_v27 }
 0x427   :  { %v869_v29 = vpop.permute.xlu0 %868 }
 0x428   :  { %v3770_v14 = vpop.eup %3769  ;;  %v4706_v31 = vadd.f32 %v869_v29, %v806_v39 }
 0x429   :  { %910 = vrot.lane.b32.xlu2 %v3770_v14, %s4169_s0 }
 0x42a   :  { %3771 = vtanh.f32 %v4706_v31 }
 0x430   :  { %v3772_v42 = vpop.eup %3771 }
 0x431   :  { %916 = vrot.lane.b32.xlu2 %v3772_v42, %s4169_s0  ;;  %v938_v42 = vld [vmem:[#allocation2 + $0x12] sm:$0x1] }
 0x478   :  { %v905_v28 = vpop.permute.xlu1 %904 }
 0x479   :  { %v928_v63 = vmul.f32 %v905_v28, %v4623_v19 }
 0x47a   :  { %v909_v20 = vpop.permute.xlu0 %908 }
 0x47b   :  { %v907_v34 = vpop.permute.xlu2 %906  ;;  %v930_v50 = vmul.f32 %v909_v20, %v4568_v24  ;;  %v944_v5 = vpack.c.bf16 %v928_v63, %v928_v63  ;;  %v937_v20 = vld [vmem:[#allocation2 + $0xa] sm:$0x1] }
 0x47c   :  { %v929_v36 = vmul.f32 %v907_v34, %v4637_v32 }
 0x47d   :  { %v946_v17 = vpack.c.bf16 %v930_v50, %v930_v50  ;;  %v960_v32 = vunpack.c.l.b16 %v944_v5  ;;  %v939_v5 = vld [vmem:[#allocation2 + $0x1a] sm:$0x1] }
 0x47e   :  { %v945_v38 = vpack.c.bf16 %v929_v36, %v929_v36  ;;  %v941_v36 = vld [vmem:[#allocation2 + $0x2a] sm:$0x1] }
 0x47f   :  { %v962_v47 = vunpack.c.l.b16 %v946_v17 }
 0x480   :  { %v961_v37 = vunpack.c.l.b16 %v945_v38  ;;  %v915_v30 = vpop.permute.xlu1 %914 }
 0x481   :  { %v933_v24 = vmul.f32 %v915_v30, %v4645_v40  ;;  %v970_v52 = vrot.slane %v962_v47, 6  ;;  %v940_v30 = vld [vmem:[#allocation2 + $0x22] sm:$0x1] }
 0x482   :  { %v913_v53 = vpop.permute.xlu0 %912  ;;  %v968_v33 = vrot.slane %v961_v37, 7 }
 0x483   :  { %v932_v46 = vmul.f32 %v913_v53, %v4588_v41  ;;  %v911_v43 = vpop.permute.xlu2 %910  ;;  %v949_v61 = vpack.c.bf16 %v933_v24, %v933_v24 }
 0x484   :  { %v931_v49 = vmul.f32 %v911_v43, %v4652_v44  ;;  %v969_v60 = vsel %vm577_vm6, %v968_v33, %v960_v32 }
 0x485   :  { %v948_v48 = vpack.c.bf16 %v932_v46, %v932_v46  ;;  %v971_v8 = vsel %vm580_vm7, %v970_v52, %v969_v60  ;;  %v965_v40 = vunpack.c.l.b16 %v949_v61  ;;  %v942_v52 = vld [vmem:[#allocation2 + $0x32] sm:$0x1] }
 0x486   :  { %v947_v51 = vpack.c.bf16 %v931_v49, %v931_v49 }
 0x487   :  { %v964_v59 = vunpack.c.l.b16 %v948_v48  ;;  %v976_v18 = vrot.slane %v965_v40, 3 }
 0x488   :  { %v963_v19 = vunpack.c.l.b16 %v947_v51  ;;  %v943_v51 = vld [vmem:[#allocation2 + $0x3a] sm:$0x1] }
 0x489   :  { %v974_v54 = vrot.slane %v964_v59, 4 }
 0x48a   :  { %v919_v62 = vpop.permute.xlu0 %918  ;;  %v972_v25 = vrot.slane %v963_v19, 5 }
 0x48b   :  { %v935_v41 = vmul.f32 %v919_v62, %v4612_v35  ;;  %v917_v0 = vpop.permute.xlu2 %916 }
 0x48c   :  { %v934_v2 = vmul.f32 %v917_v0, %v4659_v55  ;;  %v973_v45 = vsel %vm583_vm8, %v972_v25, %v971_v8 }
 0x48d   :  { %v951_v44 = vpack.c.bf16 %v935_v41, %v935_v41  ;;  %v975_v56 = vsel %vm586_vm9, %v974_v54, %v973_v45 }
 0x48e   :  { %v950_v10 = vpack.c.bf16 %v934_v2, %v934_v2  ;;  %v977_v35 = vsel %vm589_vm10, %v976_v18, %v975_v56 }
 0x48f   :  { %v967_v57 = vunpack.c.l.b16 %v951_v44 }
 0x490   :  { %v966_v16 = vunpack.c.l.b16 %v950_v10 }
 0x491   :  { %v980_v3 = vrot.slane %v967_v57, 1 }
 0x492   :  { %v978_v1 = vrot.slane %v966_v16, 2 }
 0x494   :  { %v979_v22 = vsel %vm592_vm11, %v978_v1, %v977_v35 }
 0x495   :  { %v981_v11 = vsel %vm595_vm12, %v980_v3, %v979_v22 }
 0x496   :  { %v982_v9 = vpack.c.b16 %v981_v11, %v981_v11 }
 0x498   :  { %983 = vrot.lane.b32.xlu1 %v982_v9, %s4170_s5 }
 0x50a   :  { %v984_v55 = vpop.permute.xlu1 %983 }
 0x50b   :  { %3535 = vmatmul.msk.bf16.vlgmr.msrb.gmra.mxu0 %vm207_vm13, %v984_v55 }
 0x588   :  { %v997_v13 = vpop.f32.mrf.mxu0 }
 0x589   :  { %v1017_v39 = vadd.f32 %v997_v13, %v936_v26  ;;  %v1003_v29 = vrot.slane %v997_v13, 2  ;;  %v1002_v14 = vrot.slane %v997_v13, 1  ;;  %v1006_v34 = vrot.slane %v997_v13, 5 }
 0x58a   :  { %v1005_v38 = vrot.slane %v997_v13, 4  ;;  %v1004_v37 = vrot.slane %v997_v13, 3  ;;  %v1008_v49 = vrot.slane %v997_v13, 7  ;;  %v1007_v33 = vrot.slane %v997_v13, 6 }
 0x58b   :  { %3773 = vtanh.f32 %v1017_v39  ;;  %v1019_v28 = vadd.f32 %v1003_v29, %v938_v42  ;;  %v1018_v50 = vadd.f32 %v1002_v14, %v937_v20  ;;  %v1022_v63 = vadd.f32 %v1006_v34, %v941_v36 }
 0x58c   :  { %v1021_v46 = vadd.f32 %v1005_v38, %v940_v30  ;;  %v1020_v47 = vadd.f32 %v1004_v37, %v939_v5  ;;  %v1024_v32 = vadd.f32 %v1008_v49, %v943_v51  ;;  %v1023_v19 = vadd.f32 %v1007_v33, %v942_v52 }
 0x58d   :  { %3775 = vtanh.f32 %v1019_v28  ;;  %v3537_v25 = vmul.f32 -1.442695, %v1018_v50  ;;  %v3536_v2 = vmul.f32 -1.442695, %v1017_v39  ;;  %v3538_v45 = vmul.f32 -1.442695, %v1019_v28 }
 0x58e   :  { %3777 = vtanh.f32 %v1018_v50  ;;  %v3539_v41 = vmul.f32 -1.442695, %v1020_v47  ;;  %v3542_v8 = vmul.f32 -1.442695, %v1023_v19  ;;  %v3541_v16 = vmul.f32 -1.442695, %v1022_v63 }
 0x58f   :  { %3779 = vtanh.f32 %v1022_v63  ;;  %v3540_v1 = vmul.f32 -1.442695, %v1021_v46  ;;  %v3543_v29 = vmul.f32 -1.442695, %v1024_v32 }
 0x590   :  { %v999_v17 = vpop.f32.mrf.mxu0  ;;  %3781 = vtanh.f32 %v1021_v46 }
 0x591   :  { %v3774_v53 = vpop.eup %3773  ;;  %3783 = vtanh.f32 %v1020_v47 }
 0x592   :  { %1201 = vrot.lane.b32.xlu1 %v3774_v53, %s4169_s0  ;;  %3785 = vtanh.f32 %v1024_v32 }
 0x593   :  { %v3776_v43 = vpop.eup %3775  ;;  %3787 = vtanh.f32 %v1023_v19 }
 0x594   :  { %1205 = vrot.lane.b32.xlu0 %v3776_v43, %s4169_s0  ;;  %v3778_v48 = vpop.eup %3777  ;;  %3789 = vpow2.f32 %v3537_v25 }
 0x595   :  { %1203 = vrot.lane.b32.xlu2 %v3778_v48, %s4169_s0  ;;  %v3780_v24 = vpop.eup %3779  ;;  %3791 = vpow2.f32 %v3539_v41 }
 0x596   :  { %v3782_v59 = vpop.eup %3781 }
 0x597   :  { %v3784_v60 = vpop.eup %3783 }
 0x598   :  { %v3786_v61 = vpop.eup %3785 }
 0x599   :  { %v3788_v62 = vpop.eup %3787 }
 0x59a   :  { %1211 = vrot.lane.b32.xlu1 %v3780_v24, %s4169_s0  ;;  %v3790_v0 = vpop.eup %3789 }
 0x59b   :  { %v1050_v54 = vadd.f32 1.0, %v3790_v0  ;;  %v3792_v44 = vpop.eup %3791 }
 0x59c   :  { %1209 = vrot.lane.b32.xlu0 %v3782_v59, %s4169_s0  ;;  %v4736_v40 = vadd.f32 1.0, %v3792_v44 }
 0x59d   :  { %1207 = vrot.lane.b32.xlu2 %v3784_v60, %s4169_s0  ;;  %3793 = vrcp.f32 %v1050_v54  ;;  %v1083_v20 = vand.u32 2147483648, %v1050_v54  ;;  %vm1077_vm4 = vweird.f32 %v1050_v54  ;;  %v1081_v50 = vand.u32 2147483647, %v1050_v54 }
 0x59e   :  { %3795 = vpow2.f32 %v3542_v8  ;;  %v1113_v24 = vand.u32 2147483648, %v4736_v40  ;;  %vm1107_vm0 = vweird.f32 %v4736_v40  ;;  %v1111_v32 = vand.u32 2147483647, %v4736_v40 }
 0x59f   :  { %3797 = vpow2.f32 %v3536_v2  ;;  %v1084_v53 = vor.u32 1.1754944e-38, %v1083_v20  ;;  %vm1082_vm14 = vcmp.eq.f32.partialorder %v1081_v50, 8.507059e+37 }
 0x5a0   :  { %3799 = vrcp.f32 %v4736_v40 }
 0x5a1   :  { %3801 = vpow2.f32 %v3538_v45 }
 0x5a2   :  { %3803 = vpow2.f32 %v3541_v16 }
 0x5a3   :  { %v3794_v57 = vpop.eup %3793 }
 0x5a4   :  { %1215 = vrot.lane.b32.xlu0 %v3786_v61, %s4169_s0  ;;  %v3796_v10 = vpop.eup %3795  ;;  %v1073_v56 = vmul.f32 %v3794_v57, %v1050_v54  ;;  %vm1078_vm2 = vweird.f32 %v3794_v57 }
 0x5a5   :  { %1213 = vrot.lane.b32.xlu2 %v3788_v62, %s4169_s0  ;;  %v3798_v18 = vpop.eup %3797  ;;  %v4739_v3 = vadd.f32 1.0, %v3796_v10  ;;  %vm1079_vm5 = vmor %vm1077_vm4, %vm1078_vm2  ;;  %v1114_v62 = vor.u32 1.1754944e-38, %v1113_v24  ;;  %vm1112_vm2 = vcmp.eq.f32.partialorder %v1111_v32, 8.507059e+37 }
 0x5a6   :  { %v1074_v35 = vsub.f32 1.0, %v1073_v56  ;;  %v3800_v22 = vpop.eup %3799  ;;  %v4741_v9 = vadd.f32 1.0, %v3798_v18 }
 0x5a7   :  { %v3802_v11 = vpop.eup %3801  ;;  %3805 = vrcp.f32 %v4739_v3  ;;  %v1103_v13 = vmul.f32 %v3800_v22, %v4736_v40  ;;  %vm1108_vm15 = vweird.f32 %v3800_v22  ;;  %v1156_v10 = vand.u32 2147483647, %v4739_v3 }
 0x5a8   :  { %3807 = vpow2.f32 %v3540_v1  ;;  %v1075_v55 = vmul.f32 %v3794_v57, %v1074_v35  ;;  %v4745_v26 = vadd.f32 1.0, %v3802_v11  ;;  %v3804_v39 = vpop.eup %3803  ;;  %vm1109_vm1 = vmor %vm1107_vm0, %vm1108_vm15  ;;  %vm1062_vm0 = vweird.f32 %v4741_v9 }
 0x5a9   :  { %3809 = vrcp.f32 %v4741_v9  ;;  %v1104_v42 = vsub.f32 1.0, %v1103_v13  ;;  %v4751_v36 = vadd.f32 1.0, %v3804_v39 }
 0x5aa   :  { %v1076_v14 = vadd.f32 %v3794_v57, %v1075_v55  ;;  %3811 = vrcp.f32 %v4745_v26  ;;  %v1066_v55 = vand.u32 2147483647, %v4741_v9 }
 0x5ab   :  { %3813 = vpow2.f32 %v3543_v29  ;;  %v1105_v17 = vmul.f32 %v3800_v22, %v1104_v42 }
 0x5ac   :  { %v1080_v63 = vsel %vm1079_vm5, %v3794_v57, %v1076_v14  ;;  %3815 = vrcp.f32 %v4751_v36  ;;  %v1158_v57 = vand.u32 2147483648, %v4739_v3  ;;  %vm1152_vm5 = vweird.f32 %v4739_v3 }
 0x5ad   :  { %v4748_v28 = vpop.eup %3805  ;;  %v4762_v43 = vsel %vm1082_vm14, %v1084_v53, %v1080_v63  ;;  %v1106_v49 = vadd.f32 %v3800_v22, %v1105_v17  ;;  %v1096_v17 = vand.u32 2147483647, %v4745_v26 }
 0x5ae   :  { %v3808_v34 = vpop.eup %3807  ;;  %v1148_v37 = vmul.f32 %v4748_v28, %v4739_v3  ;;  %vm1153_vm4 = vweird.f32 %v4748_v28  ;;  %v1068_v3 = vand.u32 2147483648, %v4741_v9  ;;  %v1159_v11 = vor.u32 1.1754944e-38, %v1158_v57 }
 0x5af   :  { %v4753_v38 = vpop.eup %3809  ;;  %v4757_v30 = vadd.f32 1.0, %v3808_v34  ;;  %v1110_v60 = vsel %vm1109_vm1, %v3800_v22, %v1106_v49  ;;  %vm4797_vm14 = vmor %vm1152_vm5, %vm1153_vm4  ;;  %vm1157_vm1 = vcmp.eq.f32.partialorder %v1156_v10, 8.507059e+37  ;;  %vm1092_vm5 = vweird.f32 %v4745_v26 }
 0x5b0   :  { %v4760_v46 = vpop.eup %3811  ;;  %v1058_v47 = vmul.f32 %v4753_v38, %v4741_v9  ;;  %v1149_v33 = vsub.f32 1.0, %v1148_v37  ;;  %v4781_v54 = vsel %vm1112_vm2, %v1114_v62, %v1110_v60  ;;  %vm1063_vm15 = vweird.f32 %v4753_v38 }
 0x5b1   :  { %3817 = vrcp.f32 %v4757_v30  ;;  %v3814_v51 = vpop.eup %3813  ;;  %v1088_v52 = vmul.f32 %v4760_v46, %v4745_v26  ;;  %vm4809_vm2 = vmor %vm1062_vm0, %vm1063_vm15  ;;  %vm1093_vm4 = vweird.f32 %v4760_v46  ;;  %v1098_v9 = vand.u32 2147483648, %v4745_v26 }
 0x5b2   :  { %v1059_v59 = vsub.f32 1.0, %v1058_v47  ;;  %v4774_v19 = vpop.eup %3815  ;;  %v1150_v61 = vmul.f32 %v4748_v28, %v1149_v33  ;;  %v4777_v25 = vadd.f32 1.0, %v3814_v51  ;;  %v1069_v63 = vor.u32 1.1754944e-38, %v1068_v3  ;;  %vm1094_vm15 = vmor %vm1092_vm5, %vm1093_vm4 }
 0x5b3   :  { %v1089_v41 = vsub.f32 1.0, %v1088_v52  ;;  %v1133_v2 = vmul.f32 %v4774_v19, %v4751_v36  ;;  %v1099_v49 = vor.u32 1.1754944e-38, %v1098_v9  ;;  %vm1138_vm0 = vweird.f32 %v4774_v19 }
 0x5b4   :  { %v1060_v44 = vmul.f32 %v4753_v38, %v1059_v59  ;;  %v1151_v45 = vadd.f32 %v4748_v28, %v1150_v61  ;;  %3819 = vrcp.f32 %v4777_v25  ;;  %v1143_v26 = vand.u32 2147483648, %v4751_v36 }
 0x5b5   :  { %v1090_v56 = vmul.f32 %v4760_v46, %v1089_v41  ;;  %v1134_v35 = vsub.f32 1.0, %v1133_v2  ;;  %v1128_v61 = vand.u32 2147483648, %v4757_v30  ;;  %v1126_v41 = vand.u32 2147483647, %v4757_v30 }
 0x5b6   :  { %v1061_v1 = vadd.f32 %v4753_v38, %v1060_v44  ;;  %v1155_v22 = vsel %vm4797_vm14, %v4748_v28, %v1151_v45  ;;  %vm1067_vm14 = vcmp.eq.f32.partialorder %v1066_v55, 8.507059e+37  ;;  %v1144_v62 = vor.u32 1.1754944e-38, %v1143_v26 }
 0x5b7   :  { %v4779_v0 = vpop.eup %3817  ;;  %v1091_v39 = vadd.f32 %v4760_v46, %v1090_v56  ;;  %v4817_v42 = vsel %vm1157_vm1, %v1159_v11, %v1155_v22  ;;  %v1135_v34 = vmul.f32 %v4774_v19, %v1134_v35  ;;  %vm1097_vm1 = vcmp.eq.f32.partialorder %v1096_v17, 8.507059e+37 }
 0x5b8   :  { %v1118_v16 = vmul.f32 %v4779_v0, %v4757_v30  ;;  %v1065_v20 = vsel %vm4809_vm2, %v4753_v38, %v1061_v1  ;;  %vm1137_vm2 = vweird.f32 %v4751_v36  ;;  %vm1123_vm5 = vweird.f32 %v4779_v0 }
 0x5b9   :  { %v4828_v53 = vsel %vm1067_vm14, %v1069_v63, %v1065_v20  ;;  %v1095_v38 = vsel %vm1094_vm15, %v4760_v46, %v1091_v39  ;;  %v1136_v33 = vadd.f32 %v4774_v19, %v1135_v34  ;;  %v1141_v46 = vand.u32 2147483647, %v4751_v36  ;;  %vm1139_vm4 = vmor %vm1137_vm2, %vm1138_vm0 }
 0x5ba   :  { %v1119_v29 = vsub.f32 1.0, %v1118_v16  ;;  %v4815_v14 = vpop.eup %3819  ;;  %v4838_v51 = vsel %vm1097_vm1, %v1099_v49, %v1095_v38  ;;  %vm1122_vm14 = vweird.f32 %v4757_v30  ;;  %vm1127_vm0 = vcmp.eq.f32.partialorder %v1126_v41, 8.507059e+37 }
 0x5bb   :  { %v1163_v47 = vmul.f32 %v4815_v14, %v4777_v25  ;;  %v1140_v60 = vsel %vm1139_vm4, %v4774_v19, %v1136_v33  ;;  %vm1142_vm15 = vcmp.eq.f32.partialorder %v1141_v46, 8.507059e+37  ;;  %vm1124_vm1 = vmor %vm1122_vm14, %vm1123_vm5  ;;  %vm1168_vm2 = vweird.f32 %v4815_v14 }
 0x5bc   :  { %v1173_v56 = vand.u32 2147483648, %v4777_v25  ;;  %vm1167_vm4 = vweird.f32 %v4777_v25  ;;  %v1187_v3 = vmul.f32 %v4838_v51, %v4670_v4  ;;  %v1188_v4 = vmul.f32 %v4781_v54, %v4700_v27 }
 0x5bd   :  { %v1164_v59 = vsub.f32 1.0, %v1163_v47  ;;  %vm1169_vm5 = vmor %vm1167_vm4, %vm1168_vm2  ;;  %v1191_v27 = vmul.f32 %v4817_v42, %v4706_v31 }
 0x5be   :  { %v1174_v18 = vor.u32 1.1754944e-38, %v1173_v56 }
 0x5bf   :  { %v1165_v2 = vmul.f32 %v4815_v14, %v1164_v59 }
 0x5c1   :  { %v1166_v10 = vadd.f32 %v4815_v14, %v1165_v2 }
 0x5c3   :  { %v1170_v16 = vsel %vm1169_vm5, %v4815_v14, %v1166_v10 }
 0x5ef   :  { %v1204_v5 = vpop.permute.xlu2 %1203 }
 0x5f0   :  { %v1226_v48 = vmul.f32 %v1204_v5, %v4762_v43  ;;  %v1120_v5 = vmul.f32 %v4779_v0, %v1119_v29 }
 0x5f2   :  { %1243 = vrot.lane.b32.xlu1 %v1226_v48, %s4170_s5  ;;  %v1121_v52 = vadd.f32 %v4779_v0, %v1120_v5 }
 0x5f4   :  { %v1125_v44 = vsel %vm1124_vm1, %v4779_v0, %v1121_v52  ;;  %v1171_v0 = vand.u32 2147483647, %v4777_v25  ;;  %v1186_v25 = vmul.f32 %v4762_v43, %v4695_v23 }
 0x5f6   :  { %vm1172_vm14 = vcmp.eq.f32.partialorder %v1171_v0, 8.507059e+37 }
 0x5f7   :  { %v1208_v8 = vpop.permute.xlu2 %1207  ;;  %v4867_v1 = vsel %vm1172_vm14, %v1174_v18, %v1170_v16 }
 0x5f8   :  { %v1228_v40 = vmul.f32 %v1208_v8, %v4781_v54  ;;  %v4851_v8 = vsel %vm1142_vm15, %v1144_v62, %v1140_v60 }
 0x5f9   :  { %v1190_v33 = vmul.f32 %v4851_v8, %v4675_v7 }
 0x5fa   :  { %1247 = vrot.lane.b32.xlu1 %v1228_v40, %s4170_s5  ;;  %v1129_v40 = vor.u32 1.1754944e-38, %v1128_v61 }
 0x5fc   :  { %v4856_v45 = vsel %vm1127_vm0, %v1129_v40, %v1125_v44 }
 0x5fd   :  { %v1189_v29 = vmul.f32 %v4856_v45, %v4681_v15  ;;  %v1192_v15 = vmul.f32 %v4867_v1, %v4688_v21  ;;  %v1185_v21 = vmul.f32 %v4828_v53, %v4665_v58 }
 0x5ff   :  { %v1214_v28 = vpop.permute.xlu2 %1213 }
 0x600   :  { %v1231_v50 = vmul.f32 %v1214_v28, %v4817_v42 }
 0x602   :  { %1253 = vrot.lane.b32.xlu1 %v1231_v50, %s4170_s5 }
 0x604   :  { %v1202_v37 = vpop.permute.xlu1 %1201 }
 0x605   :  { %v1225_v48 = vmul.f32 %v1202_v37, %v4828_v53 }
 0x606   :  { %v1206_v24 = vpop.permute.xlu0 %1205 }
 0x607   :  { %1241 = vrot.lane.b32.xlu0 %v1225_v48, %s4170_s5  ;;  %v1227_v32 = vmul.f32 %v1206_v24, %v4838_v51 }
 0x609   :  { %1245 = vrot.lane.b32.xlu2 %v1227_v32, %s4170_s5 }
 0x60c   :  { %v1212_v36 = vpop.permute.xlu1 %1211 }
 0x60d   :  { %v1230_v19 = vmul.f32 %v1212_v36, %v4851_v8 }
 0x60e   :  { %v1210_v57 = vpop.permute.xlu0 %1209 }
 0x60f   :  { %1251 = vrot.lane.b32.xlu0 %v1230_v19, %s4170_s5  ;;  %v1229_v30 = vmul.f32 %v1210_v57, %v4856_v45 }
 0x611   :  { %1249 = vrot.lane.b32.xlu2 %v1229_v30, %s4170_s5 }
 0x616   :  { %v1216_v35 = vpop.permute.xlu0 %1215 }
 0x617   :  { %v1232_v22 = vmul.f32 %v1216_v35, %v4867_v1 }
 0x619   :  { %1255 = vrot.lane.b32.xlu2 %v1232_v22, %s4170_s5 }
 0x663   :  { %v1246_v11 = vpop.permute.xlu2 %1245 }
 0x664   :  { %v4873_v55 = vadd.f32 %v1246_v11, %v1187_v3  ;;  %v1244_v13 = vpop.permute.xlu1 %1243 }
 0x665   :  { %v4878_v39 = vadd.f32 %v1244_v13, %v1186_v25 }
 0x666   :  { %3821 = vtanh.f32 %v4873_v55 }
 0x667   :  { %3823 = vtanh.f32 %v4878_v39 }
 0x66b   :  { %v1250_v14 = vpop.permute.xlu2 %1249 }
 0x66c   :  { %v3822_v28 = vpop.eup %3821  ;;  %v4883_v20 = vadd.f32 %v1250_v14, %v1189_v29  ;;  %v1248_v9 = vpop.permute.xlu1 %1247 }
 0x66d   :  { %1293 = vrot.lane.b32.xlu1 %v3822_v28, %s4169_s0  ;;  %v3824_v23 = vpop.eup %3823  ;;  %v4889_v34 = vadd.f32 %v1248_v9, %v1188_v4 }
 0x66e   :  { %3825 = vtanh.f32 %v4883_v20  ;;  %1291 = vrot.lane.b32.xlu0 %v3824_v23, %s4169_s0 }
 0x66f   :  { %3827 = vtanh.f32 %v4889_v34 }
 0x673   :  { %v1256_v50 = vpop.permute.xlu2 %1255 }
 0x674   :  { %v3826_v63 = vpop.eup %3825  ;;  %v4895_v17 = vadd.f32 %v1256_v50, %v1192_v15  ;;  %v1254_v37 = vpop.permute.xlu1 %1253 }
 0x675   :  { %1297 = vrot.lane.b32.xlu1 %v3826_v63, %s4169_s0  ;;  %v3828_v38 = vpop.eup %3827  ;;  %v4901_v5 = vadd.f32 %v1254_v37, %v1191_v27 }
 0x676   :  { %3829 = vtanh.f32 %v4895_v17  ;;  %1295 = vrot.lane.b32.xlu0 %v3828_v38, %s4169_s0 }
 0x677   :  { %3831 = vtanh.f32 %v4901_v5 }
 0x679   :  { %v1242_v47 = vpop.permute.xlu0 %1241 }
 0x67a   :  { %v4907_v48 = vadd.f32 %v1242_v47, %v1185_v21 }
 0x67c   :  { %3833 = vtanh.f32 %v4907_v48  ;;  %v3830_v31 = vpop.eup %3829 }
 0x67d   :  { %1303 = vrot.lane.b32.xlu1 %v3830_v31, %s4169_s0  ;;  %v3832_v49 = vpop.eup %3831 }
 0x67e   :  { %1301 = vrot.lane.b32.xlu0 %v3832_v49, %s4169_s0  ;;  %v1321_v49 = vld [vmem:[#allocation2 + $0x3] sm:$0x1] }
 0x681   :  { %v1252_v26 = vpop.permute.xlu0 %1251 }
 0x682   :  { %v3834_v24 = vpop.eup %3833  ;;  %v4914_v46 = vadd.f32 %v1252_v26, %v1190_v33 }
 0x683   :  { %1289 = vrot.lane.b32.xlu2 %v3834_v24, %s4169_s0 }
 0x684   :  { %3835 = vtanh.f32 %v4914_v46 }
 0x68a   :  { %v3836_v58 = vpop.eup %3835 }
 0x68b   :  { %1299 = vrot.lane.b32.xlu2 %v3836_v58, %s4169_s0  ;;  %v1323_v58 = vld [vmem:[#allocation2 + $0x13] sm:$0x1] }
 0x6dd   :  { %v1290_v32 = vpop.permute.xlu2 %1289 }
 0x6de   :  { %v1313_v7 = vmul.f32 %v1290_v32, %v4828_v53  ;;  %v1322_v32 = vld [vmem:[#allocation2 + $0xb] sm:$0x1] }
 0x6df   :  { %v1294_v52 = vpop.permute.xlu1 %1293 }
 0x6e0   :  { %v1292_v59 = vpop.permute.xlu0 %1291  ;;  %v1315_v60 = vmul.f32 %v1294_v52, %v4838_v51  ;;  %v1329_v40 = vpack.c.bf16 %v1313_v7, %v1313_v7 }
 0x6e1   :  { %v1314_v61 = vmul.f32 %v1292_v59, %v4762_v43 }
 0x6e2   :  { %v1331_v41 = vpack.c.bf16 %v1315_v60, %v1315_v60  ;;  %v1345_v43 = vunpack.c.l.b16 %v1329_v40  ;;  %v1324_v40 = vld [vmem:[#allocation2 + $0x1b] sm:$0x1] }
 0x6e3   :  { %v1330_v62 = vpack.c.bf16 %v1314_v61, %v1314_v61 }
 0x6e4   :  { %v1347_v30 = vunpack.c.l.b16 %v1331_v41 }
 0x6e5   :  { %v1346_v36 = vunpack.c.l.b16 %v1330_v62  ;;  %v1300_v2 = vpop.permute.xlu2 %1299  ;;  %v1326_v62 = vld [vmem:[#allocation2 + $0x2b] sm:$0x1] }
 0x6e6   :  { %v1318_v51 = vmul.f32 %v1300_v2, %v4851_v8  ;;  %v1355_v18 = vrot.slane %v1347_v30, 6 }
 0x6e7   :  { %v1298_v44 = vpop.permute.xlu1 %1297  ;;  %v1353_v0 = vrot.slane %v1346_v36, 7 }
 0x6e8   :  { %v1317_v19 = vmul.f32 %v1298_v44, %v4856_v45  ;;  %v1296_v57 = vpop.permute.xlu0 %1295  ;;  %v1334_v3 = vpack.c.bf16 %v1318_v51, %v1318_v51  ;;  %v1325_v44 = vld [vmem:[#allocation2 + $0x23] sm:$0x1]  ;;  %v1328_v51 = vld [vmem:[#allocation2 + $0x3b] sm:$0x1] }
 0x6e9   :  { %v1316_v56 = vmul.f32 %v1296_v57, %v4781_v54  ;;  %v1354_v22 = vsel %vm577_vm6, %v1353_v0, %v1345_v43 }
 0x6ea   :  { %v1333_v10 = vpack.c.bf16 %v1317_v19, %v1317_v19  ;;  %v1356_v14 = vsel %vm580_vm7, %v1355_v18, %v1354_v22  ;;  %v1350_v8 = vunpack.c.l.b16 %v1334_v3  ;;  %v1327_v18 = vld [vmem:[#allocation2 + $0x33] sm:$0x1] }
 0x6eb   :  { %v1332_v16 = vpack.c.bf16 %v1316_v56, %v1316_v56 }
 0x6ec   :  { %v1349_v35 = vunpack.c.l.b16 %v1333_v10  ;;  %v1361_v63 = vrot.slane %v1350_v8, 3 }
 0x6ed   :  { %v1348_v53 = vunpack.c.l.b16 %v1332_v16 }
 0x6ee   :  { %v1359_v29 = vrot.slane %v1349_v35, 4 }
 0x6ef   :  { %v1304_v11 = vpop.permute.xlu1 %1303  ;;  %v1357_v25 = vrot.slane %v1348_v53, 5 }
 0x6f0   :  { %v1320_v45 = vmul.f32 %v1304_v11, %v4867_v1  ;;  %v1302_v13 = vpop.permute.xlu0 %1301 }
 0x6f1   :  { %v1319_v28 = vmul.f32 %v1302_v13, %v4817_v42  ;;  %v1358_v4 = vsel %vm583_vm8, %v1357_v25, %v1356_v14 }
 0x6f2   :  { %v1336_v54 = vpack.c.bf16 %v1320_v45, %v1320_v45  ;;  %v1360_v15 = vsel %vm586_vm9, %v1359_v29, %v1358_v4 }
 0x6f3   :  { %v1335_v23 = vpack.c.bf16 %v1319_v28, %v1319_v28  ;;  %v1362_v1 = vsel %vm589_vm10, %v1361_v63, %v1360_v15 }
 0x6f4   :  { %v1352_v9 = vunpack.c.l.b16 %v1336_v54 }
 0x6f5   :  { %v1351_v50 = vunpack.c.l.b16 %v1335_v23 }
 0x6f6   :  { %v1365_v27 = vrot.slane %v1352_v9, 1 }
 0x6f7   :  { %v1363_v37 = vrot.slane %v1351_v50, 2 }
 0x6f9   :  { %v1364_v38 = vsel %vm592_vm11, %v1363_v37, %v1362_v1 }
 0x6fa   :  { %v1366_v21 = vsel %vm595_vm12, %v1365_v27, %v1364_v38 }
 0x6fb   :  { %v1367_v47 = vpack.c.b16 %v1366_v21, %v1366_v21 }
 0x6fd   :  { %1368 = vrot.lane.b32.xlu2 %v1367_v47, %s4170_s5 }
 0x757   :  { %v1369_v42 = vpop.permute.xlu2 %1368 }
 0x758   :  { %3544 = vmatmul.msk.bf16.vlgmr.msrb.gmra.mxu2 %vm207_vm13, %v1369_v42 }
 0x7db   :  { %v1382_v31 = vpop.f32.mrf.mxu2 }
 0x7dc   :  { %v1402_v33 = vadd.f32 %v1382_v31, %v1321_v49  ;;  %v1388_v26 = vrot.slane %v1382_v31, 2  ;;  %v1387_v24 = vrot.slane %v1382_v31, 1  ;;  %v1391_v60 = vrot.slane %v1382_v31, 5 }
 0x7dd   :  { %v1390_v61 = vrot.slane %v1382_v31, 4  ;;  %v1389_v7 = vrot.slane %v1382_v31, 3  ;;  %v1393_v56 = vrot.slane %v1382_v31, 7  ;;  %v1392_v0 = vrot.slane %v1382_v31, 6 }
 0x7de   :  { %3837 = vtanh.f32 %v1402_v33  ;;  %v1404_v52 = vadd.f32 %v1388_v26, %v1323_v58  ;;  %v1403_v59 = vadd.f32 %v1387_v24, %v1322_v32  ;;  %v1407_v41 = vadd.f32 %v1391_v60, %v1326_v62 }
 0x7df   :  { %v1406_v19 = vadd.f32 %v1390_v61, %v1325_v44  ;;  %v1405_v57 = vadd.f32 %v1389_v7, %v1324_v40  ;;  %v1409_v43 = vadd.f32 %v1393_v56, %v1328_v51  ;;  %v1408_v35 = vadd.f32 %v1392_v0, %v1327_v18 }
 0x7e0   :  { %3839 = vtanh.f32 %v1404_v52  ;;  %v3545_v25 = vmul.f32 -1.442695, %v1402_v33  ;;  %v3550_v45 = vmul.f32 -1.442695, %v1407_v41  ;;  %v3547_v8 = vmul.f32 -1.442695, %v1404_v52 }
 0x7e1   :  { %3841 = vtanh.f32 %v1403_v59  ;;  %v3546_v9 = vmul.f32 -1.442695, %v1403_v59  ;;  %v3549_v50 = vmul.f32 -1.442695, %v1406_v19  ;;  %v3548_v37 = vmul.f32 -1.442695, %v1405_v57 }
 0x7e2   :  { %3843 = vtanh.f32 %v1407_v41  ;;  %v3552_v26 = vmul.f32 -1.442695, %v1409_v43  ;;  %v3551_v32 = vmul.f32 -1.442695, %v1408_v35 }
 0x7e3   :  { %v1384_v36 = vpop.f32.mrf.mxu2  ;;  %3845 = vtanh.f32 %v1406_v19 }
 0x7e4   :  { %v3838_v2 = vpop.eup %3837  ;;  %3847 = vtanh.f32 %v1405_v57 }
 0x7e5   :  { %1586 = vrot.lane.b32.xlu2 %v3838_v2, %s4169_s0  ;;  %3849 = vtanh.f32 %v1409_v43 }
 0x7e6   :  { %v3840_v30 = vpop.eup %3839  ;;  %3851 = vtanh.f32 %v1408_v35 }
 0x7e7   :  { %v3842_v10 = vpop.eup %3841  ;;  %1590 = vrot.lane.b32.xlu1 %v3840_v30, %s4169_s0  ;;  %3853 = vpow2.f32 %v3545_v25 }
 0x7e8   :  { %1588 = vrot.lane.b32.xlu0 %v3842_v10, %s4169_s0  ;;  %v3844_v16 = vpop.eup %3843  ;;  %3855 = vpow2.f32 %v3550_v45 }
 0x7e9   :  { %v3846_v53 = vpop.eup %3845 }
 0x7ea   :  { %v3848_v22 = vpop.eup %3847 }
 0x7eb   :  { %v3850_v3 = vpop.eup %3849 }
 0x7ec   :  { %v3852_v11 = vpop.eup %3851 }
 0x7ed   :  { %1596 = vrot.lane.b32.xlu2 %v3844_v16, %s4169_s0  ;;  %v3854_v13 = vpop.eup %3853 }
 0x7ee   :  { %v1434_v29 = vadd.f32 1.0, %v3854_v13  ;;  %v3856_v14 = vpop.eup %3855 }
 0x7ef   :  { %1594 = vrot.lane.b32.xlu1 %v3846_v53, %s4169_s0  ;;  %v1439_v54 = vadd.f32 1.0, %v3856_v14 }
 0x7f0   :  { %1592 = vrot.lane.b32.xlu0 %v3848_v22, %s4169_s0  ;;  %3857 = vrcp.f32 %v1434_v29  ;;  %v1453_v42 = vand.u32 2147483648, %v1434_v29  ;;  %vm1447_vm1 = vweird.f32 %v1434_v29  ;;  %v1451_v49 = vand.u32 2147483647, %v1434_v29 }
 0x7f1   :  { %3859 = vrcp.f32 %v1439_v54  ;;  %v1528_v36 = vand.u32 2147483648, %v1439_v54  ;;  %vm1522_vm5 = vweird.f32 %v1439_v54  ;;  %v1526_v2 = vand.u32 2147483647, %v1439_v54 }
 0x7f2   :  { %3861 = vpow2.f32 %v3547_v8  ;;  %v1454_v52 = vor.u32 1.1754944e-38, %v1453_v42  ;;  %vm1452_vm2 = vcmp.eq.f32.partialorder %v1451_v49, 8.507059e+37 }
 0x7f3   :  { %3863 = vpow2.f32 %v3546_v9  ;;  %v1529_v10 = vor.u32 1.1754944e-38, %v1528_v36 }
 0x7f4   :  { %3865 = vpow2.f32 %v3549_v50 }
 0x7f5   :  { %3867 = vpow2.f32 %v3548_v37 }
 0x7f6   :  { %v3858_v28 = vpop.eup %3857 }
 0x7f7   :  { %1600 = vrot.lane.b32.xlu1 %v3850_v3, %s4169_s0  ;;  %v1443_v4 = vmul.f32 %v3858_v28, %v1434_v29  ;;  %v3860_v15 = vpop.eup %3859  ;;  %vm1448_vm15 = vweird.f32 %v3858_v28 }
 0x7f8   :  { %1598 = vrot.lane.b32.xlu0 %v3852_v11, %s4169_s0  ;;  %v1518_v27 = vmul.f32 %v3860_v15, %v1439_v54  ;;  %v3862_v1 = vpop.eup %3861  ;;  %vm1449_vm0 = vmor %vm1447_vm1, %vm1448_vm15  ;;  %vm1523_vm4 = vweird.f32 %v3860_v15  ;;  %vm1527_vm15 = vcmp.eq.f32.partialorder %v1526_v2, 8.507059e+37 }
 0x7f9   :  { %v1444_v23 = vsub.f32 1.0, %v1443_v4  ;;  %v3864_v38 = vpop.eup %3863  ;;  %v4944_v31 = vadd.f32 1.0, %v3862_v1  ;;  %vm1524_vm14 = vmor %vm1522_vm5, %vm1523_vm4 }
 0x7fa   :  { %v1519_v47 = vsub.f32 1.0, %v1518_v27  ;;  %v4946_v33 = vadd.f32 1.0, %v3864_v38  ;;  %v3866_v59 = vpop.eup %3865 }
 0x7fb   :  { %v1445_v63 = vmul.f32 %v3858_v28, %v1444_v23  ;;  %3869 = vrcp.f32 %v4944_v31  ;;  %v3868_v60 = vpop.eup %3867  ;;  %v4953_v44 = vadd.f32 1.0, %v3866_v59  ;;  %v1483_v9 = vand.u32 2147483648, %v4944_v31 }
 0x7fc   :  { %v1520_v58 = vmul.f32 %v3860_v15, %v1519_v47  ;;  %3871 = vrcp.f32 %v4946_v33  ;;  %v4956_v19 = vadd.f32 1.0, %v3868_v60  ;;  %v1468_v27 = vand.u32 2147483648, %v4946_v33 }
 0x7fd   :  { %v1446_v21 = vadd.f32 %v3858_v28, %v1445_v63  ;;  %3873 = vpow2.f32 %v3552_v26  ;;  %v1481_v63 = vand.u32 2147483647, %v4944_v31  ;;  %vm1462_vm5 = vweird.f32 %v4946_v33 }
 0x7fe   :  { %v1521_v41 = vadd.f32 %v3860_v15, %v1520_v58  ;;  %3875 = vpow2.f32 %v3551_v32  ;;  %v1466_v37 = vand.u32 2147483647, %v4946_v33  ;;  %v1484_v42 = vor.u32 1.1754944e-38, %v1483_v9 }
 0x7ff   :  { %v1450_v24 = vsel %vm1449_vm0, %v3858_v28, %v1446_v21  ;;  %3877 = vrcp.f32 %v4953_v44  ;;  %v1513_v32 = vand.u32 2147483648, %v4953_v44 }
 0x800   :  { %v4950_v62 = vsel %vm1452_vm2, %v1454_v52, %v1450_v24  ;;  %v1525_v30 = vsel %vm1524_vm14, %v3860_v15, %v1521_v41  ;;  %3879 = vrcp.f32 %v4956_v19  ;;  %vm1477_vm2 = vweird.f32 %v4944_v31 }
 0x801   :  { %v3870_v40 = vpop.eup %3869  ;;  %v4961_v43 = vsel %vm1527_vm15, %v1529_v10, %v1525_v30  ;;  %vm1482_vm15 = vcmp.eq.f32.partialorder %v1481_v63, 8.507059e+37  ;;  %v1496_v30 = vand.u32 2147483647, %v4956_v19 }
 0x802   :  { %v3872_v57 = vpop.eup %3871  ;;  %v1473_v0 = vmul.f32 %v3870_v40, %v4944_v31  ;;  %vm1478_vm1 = vweird.f32 %v3870_v40 }
 0x803   :  { %v3874_v56 = vpop.eup %3873  ;;  %v1458_v18 = vmul.f32 %v3872_v57, %v4946_v33  ;;  %vm1463_vm0 = vweird.f32 %v3872_v57  ;;  %vm1479_vm4 = vmor %vm1477_vm2, %vm1478_vm1  ;;  %v1469_v33 = vor.u32 1.1754944e-38, %v1468_v27  ;;  %vm1467_vm1 = vcmp.eq.f32.partialorder %v1466_v37, 8.507059e+37 }
 0x804   :  { %v3876_v51 = vpop.eup %3875  ;;  %v4965_v53 = vadd.f32 1.0, %v3874_v56  ;;  %v1474_v22 = vsub.f32 1.0, %v1473_v0  ;;  %vm4990_vm14 = vmor %vm1462_vm5, %vm1463_vm0  ;;  %v1514_v0 = vor.u32 1.1754944e-38, %v1513_v32 }
 0x805   :  { %v4968_v3 = vadd.f32 1.0, %v3876_v51  ;;  %v4970_v11 = vpop.eup %3877  ;;  %v1459_v25 = vsub.f32 1.0, %v1458_v18 }
 0x806   :  { %v4972_v45 = vpop.eup %3879  ;;  %3881 = vrcp.f32 %v4965_v53  ;;  %v1475_v13 = vmul.f32 %v3870_v40, %v1474_v22  ;;  %v1503_v29 = vmul.f32 %v4970_v11, %v4953_v44  ;;  %vm1508_vm0 = vweird.f32 %v4970_v11 }
 0x807   :  { %3883 = vrcp.f32 %v4968_v3  ;;  %v1460_v14 = vmul.f32 %v3872_v57, %v1459_v25  ;;  %v1488_v54 = vmul.f32 %v4972_v45, %v4956_v19  ;;  %vm1493_vm2 = vweird.f32 %v4972_v45 }
 0x808   :  { %v1476_v28 = vadd.f32 %v3870_v40, %v1475_v13  ;;  %v1504_v8 = vsub.f32 1.0, %v1503_v29 }
 0x809   :  { %v1461_v23 = vadd.f32 %v3872_v57, %v1460_v14  ;;  %v1489_v15 = vsub.f32 1.0, %v1488_v54  ;;  %v1556_v14 = vand.u32 2147483647, %v4965_v53  ;;  %v1543_v54 = vand.u32 2147483648, %v4968_v3 }
 0x80a   :  { %v1480_v1 = vsel %vm1479_vm4, %v3870_v40, %v1476_v28  ;;  %v1505_v21 = vmul.f32 %v4970_v11, %v1504_v8  ;;  %vm1507_vm4 = vweird.f32 %v4953_v44  ;;  %v1511_v40 = vand.u32 2147483647, %v4953_v44 }
 0x80b   :  { %v1465_v31 = vsel %vm4990_vm14, %v3872_v57, %v1461_v23  ;;  %v1490_v49 = vmul.f32 %v4972_v45, %v1489_v15  ;;  %v5002_v58 = vsel %vm1482_vm15, %v1484_v42, %v1480_v1  ;;  %v1498_v57 = vand.u32 2147483648, %v4956_v19  ;;  %vm1509_vm5 = vmor %vm1507_vm4, %vm1508_vm0 }
 0x80c   :  { %v4980_v4 = vpop.eup %3881  ;;  %v5007_v60 = vsel %vm1467_vm1, %v1469_v33, %v1465_v31  ;;  %vm1492_vm14 = vweird.f32 %v4956_v19  ;;  %vm1512_vm1 = vcmp.eq.f32.partialorder %v1511_v40, 8.507059e+37  ;;  %vm1497_vm0 = vcmp.eq.f32.partialorder %v1496_v30, 8.507059e+37 }
 0x80d   :  { %v4983_v50 = vpop.eup %3883  ;;  %v1548_v47 = vmul.f32 %v4980_v4, %v4965_v53  ;;  %v1491_v36 = vadd.f32 %v4972_v45, %v1490_v49  ;;  %vm1494_vm15 = vmor %vm1492_vm14, %vm1493_vm2  ;;  %vm1553_vm2 = vweird.f32 %v4980_v4  ;;  %v1541_v28 = vand.u32 2147483647, %v4968_v3 }
 0x80e   :  { %v1533_v26 = vmul.f32 %v4983_v50, %v4968_v3  ;;  %vm1538_vm4 = vweird.f32 %v4983_v50  ;;  %v1544_v15 = vor.u32 1.1754944e-38, %v1543_v54  ;;  %v1575_v31 = vmul.f32 %v4961_v43, %v4914_v46 }
 0x80f   :  { %v1495_v51 = vsel %vm1494_vm15, %v4972_v45, %v1491_v36  ;;  %v1558_v45 = vand.u32 2147483648, %v4965_v53  ;;  %vm1537_vm15 = vweird.f32 %v4968_v3  ;;  %vm1542_vm3 = vcmp.eq.f32.partialorder %v1541_v28, 8.507059e+37 }
 0x810   :  { %v1534_v2 = vsub.f32 1.0, %v1533_v26  ;;  %v1570_v3 = vmul.f32 %v4950_v62, %v4907_v48 }
 0x811   :  { %v1559_v9 = vor.u32 1.1754944e-38, %v1558_v45 }
 0x812   :  { %v1535_v44 = vmul.f32 %v4983_v50, %v1534_v2 }
 0x814   :  { %v1536_v29 = vadd.f32 %v4983_v50, %v1535_v44 }
 0x83f   :  { %v1587_v61 = vpop.permute.xlu2 %1586 }
 0x840   :  { %v1610_v7 = vmul.f32 %v1587_v61, %v4950_v62  ;;  %v1506_v61 = vadd.f32 %v4970_v11, %v1505_v21  ;;  %v1571_v21 = vmul.f32 %v5007_v60, %v4878_v39 }
 0x842   :  { %1626 = vrot.lane.b32.xlu1 %v1610_v7, %s4170_s5  ;;  %v1549_v7 = vsub.f32 1.0, %v1548_v47  ;;  %v1510_v10 = vsel %vm1509_vm5, %v4970_v11, %v1506_v61  ;;  %vm1552_vm5 = vweird.f32 %v4965_v53 }
 0x843   :  { %v5026_v18 = vsel %vm1512_vm1, %v1514_v0, %v1510_v10  ;;  %vm1554_vm14 = vmor %vm1552_vm5, %vm1553_vm2 }
 0x844   :  { %v1550_v56 = vmul.f32 %v4980_v4, %v1549_v7  ;;  %vm1539_vm1 = vmor %vm1537_vm15, %vm1538_vm4 }
 0x845   :  { %v1540_v23 = vsel %vm1539_vm1, %v4983_v50, %v1536_v29 }
 0x846   :  { %v1551_v11 = vadd.f32 %v4980_v4, %v1550_v56  ;;  %v5049_v37 = vsel %vm1542_vm3, %v1544_v15, %v1540_v23 }
 0x847   :  { %v1597_v16 = vpop.permute.xlu2 %1596 }
 0x848   :  { %v1615_v35 = vmul.f32 %v1597_v16, %v4961_v43  ;;  %v1499_v16 = vor.u32 1.1754944e-38, %v1498_v57  ;;  %v1555_v8 = vsel %vm1554_vm14, %v4980_v4, %v1551_v11 }
 0x84a   :  { %1636 = vrot.lane.b32.xlu1 %v1615_v35, %s4170_s5  ;;  %v5029_v25 = vsel %vm1497_vm0, %v1499_v16, %v1495_v51  ;;  %vm1557_vm0 = vcmp.eq.f32.partialorder %v1556_v14, 8.507059e+37 }
 0x84b   :  { %v5046_v63 = vsel %vm1557_vm0, %v1559_v9, %v1555_v8  ;;  %v1573_v48 = vmul.f32 %v5029_v25, %v4889_v34  ;;  %v1572_v34 = vmul.f32 %v5002_v58, %v4873_v55 }
 0x84c   :  { %v1577_v55 = vmul.f32 %v5046_v63, %v4895_v17 }
 0x859   :  { %v1591_v24 = vpop.permute.xlu1 %1590 }
 0x85a   :  { %v1612_v52 = vmul.f32 %v1591_v24, %v5002_v58  ;;  %v1589_v59 = vpop.permute.xlu0 %1588 }
 0x85b   :  { %v1611_v41 = vmul.f32 %v1589_v59, %v5007_v60 }
 0x85c   :  { %1630 = vrot.lane.b32.xlu0 %v1612_v52, %s4170_s5  ;;  %v1576_v52 = vmul.f32 %v5049_v37, %v4901_v5  ;;  %v1574_v5 = vmul.f32 %v5026_v18, %v4883_v20 }
 0x85d   :  { %1628 = vrot.lane.b32.xlu2 %v1611_v41, %s4170_s5 }
 0x861   :  { %v1595_v35 = vpop.permute.xlu1 %1594 }
 0x862   :  { %v1614_v22 = vmul.f32 %v1595_v35, %v5026_v18  ;;  %v1593_v19 = vpop.permute.xlu0 %1592 }
 0x863   :  { %v1613_v13 = vmul.f32 %v1593_v19, %v5029_v25 }
 0x864   :  { %1634 = vrot.lane.b32.xlu0 %v1614_v22, %s4170_s5 }
 0x865   :  { %1632 = vrot.lane.b32.xlu2 %v1613_v13, %s4170_s5 }
 0x869   :  { %v1601_v53 = vpop.permute.xlu1 %1600 }
 0x86a   :  { %v1617_v27 = vmul.f32 %v1601_v53, %v5046_v63  ;;  %v1599_v1 = vpop.permute.xlu0 %1598 }
 0x86b   :  { %v1616_v38 = vmul.f32 %v1599_v1, %v5049_v37 }
 0x86c   :  { %1640 = vrot.lane.b32.xlu0 %v1617_v27, %s4170_s5 }
 0x86d   :  { %1638 = vrot.lane.b32.xlu2 %v1616_v38, %s4170_s5 }
 0x8b4   :  { %v1627_v4 = vpop.permute.xlu1 %1626 }
 0x8b5   :  { %v5056_v50 = vadd.f32 %v1627_v4, %v1570_v3 }
 0x8b7   :  { %3885 = vtanh.f32 %v5056_v50  ;;  %v1629_v47 = vpop.permute.xlu2 %1628 }
 0x8b8   :  { %v5061_v42 = vadd.f32 %v1629_v47, %v1571_v21 }
 0x8ba   :  { %3887 = vtanh.f32 %v5061_v42 }
 0x8bc   :  { %v1637_v49 = vpop.permute.xlu1 %1636 }
 0x8bd   :  { %v3886_v26 = vpop.eup %3885  ;;  %v5066_v33 = vadd.f32 %v1637_v49, %v1575_v31 }
 0x8be   :  { %1674 = vrot.lane.b32.xlu0 %v3886_v26, %s4169_s0 }
 0x8bf   :  { %3889 = vtanh.f32 %v5066_v33  ;;  %v1633_v39 = vpop.permute.xlu2 %1632 }
 0x8c0   :  { %v3888_v24 = vpop.eup %3887  ;;  %v5072_v32 = vadd.f32 %v1633_v39, %v1573_v48 }
 0x8c1   :  { %1676 = vrot.lane.b32.xlu1 %v3888_v24, %s4169_s0 }
 0x8c2   :  { %3891 = vtanh.f32 %v5072_v32 }
 0x8c5   :  { %v3890_v46 = vpop.eup %3889 }
 0x8c6   :  { %1684 = vrot.lane.b32.xlu0 %v3890_v46, %s4169_s0 }
 0x8c7   :  { %v1639_v59 = vpop.permute.xlu2 %1638 }
 0x8c8   :  { %v3892_v61 = vpop.eup %3891  ;;  %v5079_v7 = vadd.f32 %v1639_v59, %v1576_v52 }
 0x8c9   :  { %1680 = vrot.lane.b32.xlu1 %v3892_v61, %s4169_s0 }
 0x8ca   :  { %3893 = vtanh.f32 %v5079_v7 }
 0x8ce   :  { %v1631_v41 = vpop.permute.xlu0 %1630 }
 0x8cf   :  { %v5085_v36 = vadd.f32 %v1631_v41, %v1572_v34 }
 0x8d0   :  { %v3894_v2 = vpop.eup %3893 }
 0x8d1   :  { %3895 = vtanh.f32 %v5085_v36  ;;  %1686 = vrot.lane.b32.xlu1 %v3894_v2, %s4169_s0 }
 0x8d6   :  { %v1635_v40 = vpop.permute.xlu0 %1634 }
 0x8d7   :  { %v3896_v57 = vpop.eup %3895  ;;  %v5091_v30 = vadd.f32 %v1635_v40, %v1574_v5 }
 0x8d8   :  { %1678 = vrot.lane.b32.xlu2 %v3896_v57, %s4169_s0 }
 0x8d9   :  { %3897 = vtanh.f32 %v5091_v30 }
 0x8de   :  { %v1641_v10 = vpop.permute.xlu0 %1640 }
 0x8df   :  { %v3898_v56 = vpop.eup %3897  ;;  %v5097_v0 = vadd.f32 %v1641_v10, %v1577_v55  ;;  %v1706_v10 = vld [vmem:[#allocation2 + $0x4] sm:$0x1] }
 0x8e0   :  { %1682 = vrot.lane.b32.xlu2 %v3898_v56, %s4169_s0 }
 0x8e1   :  { %3899 = vtanh.f32 %v5097_v0 }
 0x8e7   :  { %v3900_v20 = vpop.eup %3899 }
 0x8e8   :  { %1688 = vrot.lane.b32.xlu2 %v3900_v20, %s4169_s0 }
 0x930   :  { %v1675_v51 = vpop.permute.xlu0 %1674 }
 0x931   :  { %v1698_v17 = vmul.f32 %v1675_v51, %v4950_v62 }
 0x932   :  { %v1679_v44 = vpop.permute.xlu2 %1678 }
 0x933   :  { %v1677_v16 = vpop.permute.xlu1 %1676  ;;  %v1700_v35 = vmul.f32 %v1679_v44, %v5002_v58  ;;  %v1714_v14 = vpack.c.bf16 %v1698_v17, %v1698_v17  ;;  %v1708_v44 = vld [vmem:[#allocation2 + $0x14] sm:$0x1] }
 0x934   :  { %v1699_v22 = vmul.f32 %v1677_v16, %v5007_v60  ;;  %v1707_v16 = vld [vmem:[#allocation2 + $0xc] sm:$0x1] }
 0x935   :  { %v1716_v11 = vpack.c.bf16 %v1700_v35, %v1700_v35  ;;  %v1730_v60 = vunpack.c.l.b16 %v1714_v14 }
 0x936   :  { %v1715_v19 = vpack.c.bf16 %v1699_v22, %v1699_v22 }
 0x937   :  { %v1732_v8 = vunpack.c.l.b16 %v1716_v11  ;;  %v1711_v11 = vld [vmem:[#allocation2 + $0x2c] sm:$0x1] }
 0x938   :  { %v1731_v13 = vunpack.c.l.b16 %v1715_v19  ;;  %v1685_v45 = vpop.permute.xlu0 %1684 }
 0x939   :  { %v1703_v15 = vmul.f32 %v1685_v45, %v4961_v43  ;;  %v1740_v27 = vrot.slane %v1732_v8, 6 }
 0x93a   :  { %v1683_v29 = vpop.permute.xlu2 %1682  ;;  %v1738_v23 = vrot.slane %v1731_v13, 7 }
 0x93b   :  { %v1702_v54 = vmul.f32 %v1683_v29, %v5026_v18  ;;  %v1681_v28 = vpop.permute.xlu1 %1680  ;;  %v1719_v3 = vpack.c.bf16 %v1703_v15, %v1703_v15  ;;  %v1710_v29 = vld [vmem:[#allocation2 + $0x24] sm:$0x1] }
 0x93c   :  { %v1701_v9 = vmul.f32 %v1681_v28, %v5029_v25  ;;  %v1739_v38 = vsel %vm577_vm6, %v1738_v23, %v1730_v60  ;;  %v1709_v28 = vld [vmem:[#allocation2 + $0x1c] sm:$0x1] }
 0x93d   :  { %v1718_v58 = vpack.c.bf16 %v1702_v54, %v1702_v54  ;;  %v1741_v25 = vsel %vm580_vm7, %v1740_v27, %v1739_v38  ;;  %v1735_v43 = vunpack.c.l.b16 %v1719_v3 }
 0x93e   :  { %v1717_v53 = vpack.c.bf16 %v1701_v9, %v1701_v9 }
 0x93f   :  { %v1734_v1 = vunpack.c.l.b16 %v1718_v58  ;;  %v1746_v59 = vrot.slane %v1735_v43, 3 }
 0x940   :  { %v1733_v62 = vunpack.c.l.b16 %v1717_v53  ;;  %v1713_v53 = vld [vmem:[#allocation2 + $0x3c] sm:$0x1] }
 0x941   :  { %v1744_v31 = vrot.slane %v1734_v1, 4  ;;  %v1712_v1 = vld [vmem:[#allocation2 + $0x34] sm:$0x1] }
 0x942   :  { %v1742_v4 = vrot.slane %v1733_v62, 5  ;;  %v1689_v21 = vpop.permute.xlu2 %1688 }
 0x943   :  { %v1705_v18 = vmul.f32 %v1689_v21, %v5046_v63  ;;  %v1687_v47 = vpop.permute.xlu1 %1686 }
 0x944   :  { %v1704_v49 = vmul.f32 %v1687_v47, %v5049_v37  ;;  %v1743_v26 = vsel %vm583_vm8, %v1742_v4, %v1741_v25  ;;  %v3365_v37 = vld [vmem:[%s5935_s12] sm:$0x3] }
 0x945   :  { %v1721_v48 = vpack.c.bf16 %v1705_v18, %v1705_v18  ;;  %v1745_v46 = vsel %vm586_vm9, %v1744_v31, %v1743_v26  ;;  %v3367_v40 = vand.u32 %v3365_v37, %v4269_v6 }
 0x946   :  { %v1720_v39 = vpack.c.bf16 %v1704_v49, %v1704_v49  ;;  %v1747_v63 = vsel %vm589_vm10, %v1746_v59, %v1745_v46 }
 0x947   :  { %v1737_v24 = vunpack.c.l.b16 %v1721_v48 }
 0x948   :  { %v1736_v52 = vunpack.c.l.b16 %v1720_v39 }
 0x949   :  { %v1750_v61 = vrot.slane %v1737_v24, 1 }
 0x94a   :  { %v1748_v34 = vrot.slane %v1736_v52, 2 }
 0x94c   :  { %v1749_v41 = vsel %vm592_vm11, %v1748_v34, %v1747_v63 }
 0x94d   :  { %v1751_v2 = vsel %vm595_vm12, %v1750_v61, %v1749_v41 }
 0x94e   :  { %v1752_v5 = vpack.c.b16 %v1751_v2, %v1751_v2 }
 0x950   :  { %1753 = vrot.lane.b32.xlu0 %v1752_v5, %s4170_s5 }
 0x9c2   :  { %v1754_v57 = vpop.permute.xlu0 %1753 }
 0x9c3   :  { %3553 = vmatmul.msk.bf16.vlgmr.msrb.gmra.mxu3 %vm207_vm13, %v1754_v57 }
 0x9c4   :  { %3376 = vmatpush.bf16.msrb.mxu3 %v3367_v40 }
 0xa46   :  { %v1767_v55 = vpop.f32.mrf.mxu3 }
 0xa47   :  { %v1787_v56 = vadd.f32 %v1767_v55, %v1706_v10  ;;  %v1773_v20 = vrot.slane %v1767_v55, 2  ;;  %v1772_v51 = vrot.slane %v1767_v55, 1  ;;  %v1776_v19 = vrot.slane %v1767_v55, 5 }
 0xa48   :  { %v1775_v17 = vrot.slane %v1767_v55, 4  ;;  %v1774_v6 = vrot.slane %v1767_v55, 3  ;;  %v1778_v15 = vrot.slane %v1767_v55, 7  ;;  %v1777_v58 = vrot.slane %v1767_v55, 6 }
 0xa49   :  { %3901 = vtanh.f32 %v1787_v56  ;;  %v1789_v35 = vadd.f32 %v1773_v20, %v1708_v44  ;;  %v1788_v22 = vadd.f32 %v1772_v51, %v1707_v16  ;;  %v1792_v13 = vadd.f32 %v1776_v19, %v1711_v11 }
 0xa4a   :  { %v1791_v54 = vadd.f32 %v1775_v17, %v1710_v29  ;;  %v1790_v8 = vadd.f32 %v1774_v6, %v1709_v28  ;;  %v1794_v27 = vadd.f32 %v1778_v15, %v1713_v53  ;;  %v1793_v62 = vadd.f32 %v1777_v58, %v1712_v1 }
 0xa4b   :  { %3903 = vtanh.f32 %v1789_v35  ;;  %v3556_v18 = vmul.f32 -1.442695, %v1789_v35  ;;  %v3554_v48 = vmul.f32 -1.442695, %v1787_v56  ;;  %v3555_v24 = vmul.f32 -1.442695, %v1788_v22 }
 0xa4c   :  { %3905 = vtanh.f32 %v1788_v22  ;;  %v3558_v47 = vmul.f32 -1.442695, %v1791_v54  ;;  %v3561_v49 = vmul.f32 -1.442695, %v1794_v27  ;;  %v3559_v61 = vmul.f32 -1.442695, %v1792_v13 }
 0xa4d   :  { %3907 = vtanh.f32 %v1792_v13  ;;  %v3557_v2 = vmul.f32 -1.442695, %v1790_v8  ;;  %v3560_v35 = vmul.f32 -1.442695, %v1793_v62 }
 0xa4e   :  { %v1769_v45 = vpop.f32.mrf.mxu3  ;;  %3909 = vtanh.f32 %v1791_v54 }
 0xa4f   :  { %v3902_v14 = vpop.eup %3901  ;;  %3911 = vtanh.f32 %v1790_v8 }
 0xa50   :  { %1971 = vrot.lane.b32.xlu0 %v3902_v14, %s4169_s0  ;;  %3913 = vtanh.f32 %v1794_v27 }
 0xa51   :  { %v3904_v9 = vpop.eup %3903  ;;  %3915 = vtanh.f32 %v1793_v62 }
 0xa52   :  { %v3906_v23 = vpop.eup %3905  ;;  %1975 = vrot.lane.b32.xlu2 %v3904_v9, %s4169_s0  ;;  %3917 = vpow2.f32 %v3556_v18 }
 0xa53   :  { %1973 = vrot.lane.b32.xlu1 %v3906_v23, %s4169_s0  ;;  %v3908_v60 = vpop.eup %3907  ;;  %3919 = vpow2.f32 %v3558_v47 }
 0xa54   :  { %v3910_v38 = vpop.eup %3909 }
 0xa55   :  { %v3912_v3 = vpop.eup %3911 }
 0xa56   :  { %v3914_v4 = vpop.eup %3913 }
 0xa57   :  { %v3916_v21 = vpop.eup %3915 }
 0xa58   :  { %1981 = vrot.lane.b32.xlu0 %v3908_v60, %s4169_s0  ;;  %v3918_v31 = vpop.eup %3917 }
 0xa59   :  { %v1821_v25 = vadd.f32 1.0, %v3918_v31  ;;  %v3920_v43 = vpop.eup %3919 }
 0xa5a   :  { %1979 = vrot.lane.b32.xlu2 %v3910_v38, %s4169_s0  ;;  %v5131_v26 = vadd.f32 1.0, %v3920_v43 }
 0xa5b   :  { %1977 = vrot.lane.b32.xlu1 %v3912_v3, %s4169_s0  ;;  %3921 = vrcp.f32 %v1821_v25  ;;  %v1868_v51 = vand.u32 2147483648, %v1821_v25  ;;  %vm1862_vm2 = vweird.f32 %v1821_v25  ;;  %v1866_v16 = vand.u32 2147483647, %v1821_v25 }
 0xa5c   :  { %3923 = vpow2.f32 %v3561_v49  ;;  %v1898_v23 = vand.u32 2147483648, %v5131_v26  ;;  %vm1892_vm15 = vweird.f32 %v5131_v26  ;;  %v1896_v58 = vand.u32 2147483647, %v5131_v26 }
 0xa5d   :  { %3925 = vrcp.f32 %v5131_v26  ;;  %v1869_v6 = vor.u32 1.1754944e-38, %v1868_v51  ;;  %vm1867_vm5 = vcmp.eq.f32.partialorder %v1866_v16, 8.507059e+37 }
 0xa5e   :  { %3927 = vpow2.f32 %v3554_v48  ;;  %v1899_v62 = vor.u32 1.1754944e-38, %v1898_v23  ;;  %vm1897_vm0 = vcmp.eq.f32.partialorder %v1896_v58, 8.507059e+37 }
 0xa5f   :  { %3929 = vpow2.f32 %v3555_v24 }
 0xa61   :  { %v3922_v39 = vpop.eup %3921 }
 0xa62   :  { %1985 = vrot.lane.b32.xlu2 %v3914_v4, %s4169_s0  ;;  %v3924_v46 = vpop.eup %3923  ;;  %v1858_v52 = vmul.f32 %v3922_v39, %v1821_v25  ;;  %vm1863_vm3 = vweird.f32 %v3922_v39 }
 0xa63   :  { %1983 = vrot.lane.b32.xlu1 %v3916_v21, %s4169_s0  ;;  %v5134_v59 = vadd.f32 1.0, %v3924_v46  ;;  %v3926_v63 = vpop.eup %3925  ;;  %vm1864_vm4 = vmor %vm1862_vm2, %vm1863_vm3 }
 0xa64   :  { %v1859_v34 = vsub.f32 1.0, %v1858_v52  ;;  %v3928_v41 = vpop.eup %3927  ;;  %v1888_v37 = vmul.f32 %v3926_v63, %v5131_v26  ;;  %vm1893_vm14 = vweird.f32 %v3926_v63 }
 0xa65   :  { %3931 = vrcp.f32 %v5134_v59  ;;  %v3930_v40 = vpop.eup %3929  ;;  %v5138_v57 = vadd.f32 1.0, %v3928_v41  ;;  %vm1894_vm1 = vmor %vm1892_vm15, %vm1893_vm14  ;;  %v1943_v49 = vand.u32 2147483648, %v5134_v59  ;;  %vm1937_vm2 = vweird.f32 %v5134_v59 }
 0xa66   :  { %v1860_v5 = vmul.f32 %v3922_v39, %v1859_v34  ;;  %3933 = vpow2.f32 %v3559_v61  ;;  %v1889_v10 = vsub.f32 1.0, %v1888_v37  ;;  %v5140_v56 = vadd.f32 1.0, %v3930_v40 }
 0xa67   :  { %3935 = vpow2.f32 %v3557_v2  ;;  %v1941_v48 = vand.u32 2147483647, %v5134_v59  ;;  %v1944_v52 = vor.u32 1.1754944e-38, %v1943_v49  ;;  %vm1832_vm15 = vweird.f32 %v5138_v57 }
 0xa68   :  { %v1861_v55 = vadd.f32 %v3922_v39, %v1860_v5  ;;  %3937 = vrcp.f32 %v5138_v57  ;;  %v1890_v19 = vmul.f32 %v3926_v63, %v1889_v10  ;;  %v1838_v5 = vand.u32 2147483648, %v5138_v57 }
 0xa69   :  { %3939 = vrcp.f32 %v5140_v56  ;;  %v1836_v40 = vand.u32 2147483647, %v5138_v57  ;;  %v1853_v16 = vand.u32 2147483648, %v5140_v56 }
 0xa6a   :  { %v1865_v22 = vsel %vm1864_vm4, %v3922_v39, %v1861_v55  ;;  %3941 = vpow2.f32 %v3560_v35  ;;  %v1891_v28 = vadd.f32 %v3926_v63, %v1890_v19  ;;  %v1839_v35 = vor.u32 1.1754944e-38, %v1838_v5 }
 0xa6b   :  { %v5142_v20 = vpop.eup %3931  ;;  %v5152_v14 = vsel %vm1867_vm5, %v1869_v6, %v1865_v22  ;;  %vm1942_vm5 = vcmp.eq.f32.partialorder %v1941_v48, 8.507059e+37  ;;  %v1851_v22 = vand.u32 2147483647, %v5140_v56 }
 0xa6c   :  { %v3934_v44 = vpop.eup %3933  ;;  %v1933_v17 = vmul.f32 %v5142_v20, %v5134_v59  ;;  %v1895_v60 = vsel %vm1894_vm1, %v3926_v63, %v1891_v28  ;;  %vm1938_vm3 = vweird.f32 %v5142_v20 }
 0xa6d   :  { %v3936_v11 = vpop.eup %3935  ;;  %v5148_v13 = vadd.f32 1.0, %v3934_v44  ;;  %v5172_v21 = vsel %vm1897_vm0, %v1899_v62, %v1895_v60  ;;  %vm1939_vm4 = vmor %vm1937_vm2, %vm1938_vm3  ;;  %vm1847_vm3 = vweird.f32 %v5140_v56  ;;  %vm1837_vm2 = vcmp.eq.f32.partialorder %v1836_v40, 8.507059e+37 }
 0xa6e   :  { %v5150_v45 = vpop.eup %3937  ;;  %v1934_v8 = vsub.f32 1.0, %v1933_v17  ;;  %v5155_v9 = vadd.f32 1.0, %v3936_v11 }
 0xa6f   :  { %3943 = vrcp.f32 %v5148_v13  ;;  %v5159_v15 = vpop.eup %3939  ;;  %v1828_v53 = vmul.f32 %v5150_v45, %v5138_v57  ;;  %vm1833_vm14 = vweird.f32 %v5150_v45 }
 0xa70   :  { %v1935_v27 = vmul.f32 %v5142_v20, %v1934_v8  ;;  %3945 = vrcp.f32 %v5155_v9  ;;  %v3942_v1 = vpop.eup %3941  ;;  %v1843_v38 = vmul.f32 %v5159_v15, %v5140_v56  ;;  %vm5201_vm1 = vmor %vm1832_vm15, %vm1833_vm14  ;;  %vm1848_vm0 = vweird.f32 %v5159_v15 }
 0xa71   :  { %v1829_v3 = vsub.f32 1.0, %v1828_v53  ;;  %v5177_v25 = vadd.f32 1.0, %v3942_v1  ;;  %vm1852_vm14 = vcmp.eq.f32.partialorder %v1851_v22, 8.507059e+37  ;;  %v1913_v56 = vand.u32 2147483648, %v5148_v13 }
 0xa72   :  { %v1936_v31 = vadd.f32 %v5142_v20, %v1935_v27  ;;  %v1844_v43 = vsub.f32 1.0, %v1843_v38  ;;  %vm1907_vm15 = vweird.f32 %v5148_v13  ;;  %v1883_v1 = vand.u32 2147483648, %v5155_v9 }
 0xa73   :  { %v1830_v39 = vmul.f32 %v5150_v45, %v1829_v3  ;;  %3947 = vrcp.f32 %v5177_v25  ;;  %v1914_v62 = vor.u32 1.1754944e-38, %v1913_v56  ;;  %v1881_v38 = vand.u32 2147483647, %v5155_v9 }
 0xa74   :  { %v1940_v46 = vsel %vm1939_vm4, %v5142_v20, %v1936_v31  ;;  %v1845_v61 = vmul.f32 %v5159_v15, %v1844_v43  ;;  %vm1849_vm4 = vmor %vm1847_vm3, %vm1848_vm0  ;;  %vm1877_vm3 = vweird.f32 %v5155_v9 }
 0xa75   :  { %v5170_v4 = vpop.eup %3943  ;;  %v1831_v63 = vadd.f32 %v5150_v45, %v1830_v39  ;;  %v5195_v41 = vsel %vm1942_vm5, %v1944_v52, %v1940_v46  ;;  %v1928_v39 = vand.u32 2147483648, %v5177_v25 }
 0xa76   :  { %v5180_v26 = vpop.eup %3945  ;;  %v1903_v24 = vmul.f32 %v5170_v4, %v5148_v13  ;;  %v1846_v10 = vadd.f32 %v5159_v15, %v1845_v61  ;;  %vm1908_vm5 = vweird.f32 %v5170_v4 }
 0xa77   :  { %v1873_v34 = vmul.f32 %v5180_v26, %v5155_v9  ;;  %v1835_v44 = vsel %vm5201_vm1, %v5150_v45, %v1831_v63  ;;  %vm1909_vm1 = vmor %vm1907_vm15, %vm1908_vm5  ;;  %vm1878_vm0 = vweird.f32 %v5180_v26  ;;  %vm1882_vm5 = vcmp.eq.f32.partialorder %v1881_v38, 8.507059e+37 }
 0xa78   :  { %v1904_v59 = vsub.f32 1.0, %v1903_v24  ;;  %v5215_v17 = vsel %vm1837_vm2, %v1839_v35, %v1835_v44  ;;  %v1850_v11 = vsel %vm1849_vm4, %v5159_v15, %v1846_v10  ;;  %v1911_v15 = vand.u32 2147483647, %v5148_v13  ;;  %vm1879_vm4 = vmor %vm1877_vm3, %vm1878_vm0 }
 0xa79   :  { %v1874_v20 = vsub.f32 1.0, %v1873_v34  ;;  %v3948_v51 = vpop.eup %3947  ;;  %vm1922_vm15 = vweird.f32 %v5177_v25  ;;  %v1929_v46 = vor.u32 1.1754944e-38, %v1928_v39  ;;  %v1955_v63 = vmul.f32 %v5215_v17, %v5056_v50 }
 0xa7a   :  { %v1905_v57 = vmul.f32 %v5170_v4, %v1904_v59  ;;  %v1918_v45 = vmul.f32 %v3948_v51, %v5177_v25  ;;  %vm1912_vm2 = vcmp.eq.f32.partialorder %v1911_v15, 8.507059e+37  ;;  %v1959_v50 = vmul.f32 %v5172_v21, %v5091_v30 }
 0xa7b   :  { %v1875_v6 = vmul.f32 %v5180_v26, %v1874_v20 }
 0xa7c   :  { %v1906_v28 = vadd.f32 %v5170_v4, %v1905_v57  ;;  %v1919_v60 = vsub.f32 1.0, %v1918_v45 }
 0xa7d   :  { %v1876_v53 = vadd.f32 %v5180_v26, %v1875_v6 }
 0xa7e   :  { %v1910_v27 = vsel %vm1909_vm1, %v5170_v4, %v1906_v28  ;;  %v1884_v4 = vor.u32 1.1754944e-38, %v1883_v1 }
 0xa7f   :  { %v5237_v3 = vsel %vm1912_vm2, %v1914_v62, %v1910_v27 }
 0xa80   :  { %v1960_v40 = vmul.f32 %v5237_v3, %v5066_v33 }
 0xaac   :  { %v1976_v29 = vpop.permute.xlu2 %1975 }
 0xaad   :  { %v1997_v54 = vmul.f32 %v1976_v29, %v5152_v14 }
 0xaaf   :  { %2015 = vrot.lane.b32.xlu1 %v1997_v54, %s4170_s5  ;;  %v1854_v54 = vor.u32 1.1754944e-38, %v1853_v16  ;;  %v1962_v16 = vmul.f32 %v5195_v41, %v5097_v0 }
 0xab1   :  { %v5224_v23 = vsel %vm1852_vm14, %v1854_v54, %v1850_v11  ;;  %vm1923_vm14 = vweird.f32 %v3948_v51 }
 0xab2   :  { %vm1924_vm1 = vmor %vm1922_vm15, %vm1923_vm14  ;;  %v1956_v22 = vmul.f32 %v5224_v23, %v5061_v42 }
 0xab4   :  { %v1980_v18 = vpop.permute.xlu2 %1979 }
 0xab5   :  { %v1999_v47 = vmul.f32 %v1980_v18, %v5172_v21  ;;  %v1880_v18 = vsel %vm1879_vm4, %v5180_v26, %v1876_v53  ;;  %v1926_v26 = vand.u32 2147483647, %v5177_v25  ;;  %v1957_v25 = vmul.f32 %v5152_v14, %v5085_v36 }
 0xab6   :  { %v5241_v49 = vsel %vm1882_vm5, %v1884_v4, %v1880_v18 }
 0xab7   :  { %2019 = vrot.lane.b32.xlu1 %v1999_v47, %s4170_s5  ;;  %v1920_v47 = vmul.f32 %v3948_v51, %v1919_v60  ;;  %vm1927_vm0 = vcmp.eq.f32.partialorder %v1926_v26, 8.507059e+37  ;;  %v1958_v0 = vmul.f32 %v5241_v49, %v5072_v32 }
 0xab9   :  { %v1921_v9 = vadd.f32 %v3948_v51, %v1920_v47 }
 0xabb   :  { %v1925_v24 = vsel %vm1924_vm1, %v3948_v51, %v1921_v9 }
 0xabc   :  { %v1986_v2 = vpop.permute.xlu2 %1985  ;;  %v5249_v52 = vsel %vm1927_vm0, %v1929_v46, %v1925_v24 }
 0xabd   :  { %v2002_v37 = vmul.f32 %v1986_v2, %v5195_v41  ;;  %v1961_v42 = vmul.f32 %v5249_v52, %v5079_v7 }
 0xabf   :  { %2025 = vrot.lane.b32.xlu1 %v2002_v37, %s4170_s5 }
 0xac2   :  { %v1972_v19 = vpop.permute.xlu0 %1971 }
 0xac3   :  { %v1995_v29 = vmul.f32 %v1972_v19, %v5215_v17 }
 0xac5   :  { %v1974_v8 = vpop.permute.xlu1 %1973  ;;  %2011 = vrot.lane.b32.xlu2 %v1995_v29, %s4170_s5 }
 0xac6   :  { %v1996_v58 = vmul.f32 %v1974_v8, %v5224_v23 }
 0xac8   :  { %2013 = vrot.lane.b32.xlu0 %v1996_v58, %s4170_s5 }
 0xaca   :  { %v1982_v13 = vpop.permute.xlu0 %1981 }
 0xacb   :  { %v2000_v31 = vmul.f32 %v1982_v13, %v5237_v3 }
 0xacd   :  { %v1978_v43 = vpop.permute.xlu1 %1977  ;;  %2021 = vrot.lane.b32.xlu2 %v2000_v31, %s4170_s5 }
 0xace   :  { %v1998_v48 = vmul.f32 %v1978_v43, %v5241_v49 }
 0xad0   :  { %2017 = vrot.lane.b32.xlu0 %v1998_v48, %s4170_s5 }
 0xad5   :  { %v1984_v61 = vpop.permute.xlu1 %1983 }
 0xad6   :  { %v2001_v34 = vmul.f32 %v1984_v61, %v5249_v52 }
 0xad8   :  { %2023 = vrot.lane.b32.xlu0 %v2001_v34, %s4170_s5 }
 0xb1f   :  { %v2012_v59 = vpop.permute.xlu2 %2011 }
 0xb20   :  { %v5255_v2 = vadd.f32 %v2012_v59, %v1955_v63 }
 0xb21   :  { %v2016_v5 = vpop.permute.xlu1 %2015 }
 0xb22   :  { %3949 = vtanh.f32 %v5255_v2  ;;  %v5260_v37 = vadd.f32 %v2016_v5, %v1957_v25 }
 0xb24   :  { %3951 = vtanh.f32 %v5260_v37 }
 0xb27   :  { %v2022_v55 = vpop.permute.xlu2 %2021 }
 0xb28   :  { %v3950_v10 = vpop.eup %3949  ;;  %v5265_v20 = vadd.f32 %v2022_v55, %v1960_v40 }
 0xb29   :  { %2059 = vrot.lane.b32.xlu1 %v3950_v10, %s4169_s0  ;;  %v2020_v36 = vpop.permute.xlu1 %2019 }
 0xb2a   :  { %v3952_v51 = vpop.eup %3951  ;;  %3953 = vtanh.f32 %v5265_v20  ;;  %v5271_v44 = vadd.f32 %v2020_v36, %v1959_v50 }
 0xb2b   :  { %2063 = vrot.lane.b32.xlu0 %v3952_v51, %s4169_s0 }
 0xb2c   :  { %3955 = vtanh.f32 %v5271_v44 }
 0xb30   :  { %v3954_v33 = vpop.eup %3953 }
 0xb31   :  { %2069 = vrot.lane.b32.xlu1 %v3954_v33, %s4169_s0  ;;  %v2026_v57 = vpop.permute.xlu1 %2025 }
 0xb32   :  { %v3956_v30 = vpop.eup %3955  ;;  %v5278_v35 = vadd.f32 %v2026_v57, %v1962_v16 }
 0xb33   :  { %2067 = vrot.lane.b32.xlu0 %v3956_v30, %s4169_s0 }
 0xb34   :  { %3957 = vtanh.f32 %v5278_v35 }
 0xb3a   :  { %v3958_v19 = vpop.eup %3957  ;;  %v2014_v11 = vpop.permute.xlu0 %2013 }
 0xb3b   :  { %v5284_v6 = vadd.f32 %v2014_v11, %v1956_v22  ;;  %2073 = vrot.lane.b32.xlu0 %v3958_v19, %s4169_s0 }
 0xb3d   :  { %3959 = vtanh.f32 %v5284_v6 }
 0xb42   :  { %v2018_v45 = vpop.permute.xlu0 %2017 }
 0xb43   :  { %v3960_v29 = vpop.eup %3959  ;;  %v5290_v54 = vadd.f32 %v2018_v45, %v1958_v0  ;;  %v2091_v45 = vld [vmem:[#allocation2 + $0x5] sm:$0x1] }
 0xb44   :  { %2061 = vrot.lane.b32.xlu2 %v3960_v29, %s4169_s0 }
 0xb45   :  { %3961 = vtanh.f32 %v5290_v54 }
 0xb4a   :  { %v2024_v28 = vpop.permute.xlu0 %2023 }
 0xb4b   :  { %v3962_v56 = vpop.eup %3961  ;;  %v5296_v8 = vadd.f32 %v2024_v28, %v1961_v42 }
 0xb4c   :  { %2065 = vrot.lane.b32.xlu2 %v3962_v56, %s4169_s0  ;;  %v2093_v56 = vld [vmem:[#allocation2 + $0x15] sm:$0x1] }
 0xb4d   :  { %3963 = vtanh.f32 %v5296_v8 }
 0xb53   :  { %v3964_v32 = vpop.eup %3963 }
 0xb54   :  { %2071 = vrot.lane.b32.xlu2 %v3964_v32, %s4169_s0  ;;  %v2092_v32 = vld [vmem:[#allocation2 + $0xd] sm:$0x1] }
 0xb9b   :  { %v2060_v15 = vpop.permute.xlu1 %2059 }
 0xb9c   :  { %v2083_v7 = vmul.f32 %v2060_v15, %v5215_v17 }
 0xb9d   :  { %v2064_v58 = vpop.permute.xlu0 %2063 }
 0xb9e   :  { %v2062_v53 = vpop.permute.xlu2 %2061  ;;  %v2085_v60 = vmul.f32 %v2064_v58, %v5152_v14  ;;  %v2099_v47 = vpack.c.bf16 %v2083_v7, %v2083_v7 }
 0xb9f   :  { %v2084_v27 = vmul.f32 %v2062_v53, %v5224_v23 }
 0xba0   :  { %v2101_v62 = vpack.c.bf16 %v2085_v60, %v2085_v60  ;;  %v2115_v23 = vunpack.c.l.b16 %v2099_v47  ;;  %v2094_v47 = vld [vmem:[#allocation2 + $0x1d] sm:$0x1] }
 0xba1   :  { %v2100_v1 = vpack.c.bf16 %v2084_v27, %v2084_v27  ;;  %v2096_v27 = vld [vmem:[#allocation2 + $0x2d] sm:$0x1] }
 0xba2   :  { %v2117_v43 = vunpack.c.l.b16 %v2101_v62 }
 0xba3   :  { %v2116_v38 = vunpack.c.l.b16 %v2100_v1  ;;  %v2070_v13 = vpop.permute.xlu1 %2069 }
 0xba4   :  { %v2088_v39 = vmul.f32 %v2070_v13, %v5237_v3  ;;  %v2125_v24 = vrot.slane %v2117_v43, 6 }
 0xba5   :  { %v2068_v18 = vpop.permute.xlu0 %2067  ;;  %v2123_v9 = vrot.slane %v2116_v38, 7  ;;  %v2095_v38 = vld [vmem:[#allocation2 + $0x25] sm:$0x1] }
 0xba6   :  { %v2087_v31 = vmul.f32 %v2068_v18, %v5172_v21  ;;  %v2066_v4 = vpop.permute.xlu2 %2065  ;;  %v2104_v34 = vpack.c.bf16 %v2088_v39, %v2088_v39  ;;  %v2098_v39 = vld [vmem:[#allocation2 + $0x3d] sm:$0x1] }
 0xba7   :  { %v2086_v48 = vmul.f32 %v2066_v4, %v5241_v49  ;;  %v2124_v61 = vsel %vm577_vm6, %v2123_v9, %v2115_v23  ;;  %v2097_v23 = vld [vmem:[#allocation2 + $0x35] sm:$0x1] }
 0xba8   :  { %v2103_v14 = vpack.c.bf16 %v2087_v31, %v2087_v31  ;;  %v2126_v49 = vsel %vm580_vm7, %v2125_v24, %v2124_v61  ;;  %v2120_v3 = vunpack.c.l.b16 %v2104_v34 }
 0xba9   :  { %v2102_v26 = vpack.c.bf16 %v2086_v48, %v2086_v48 }
 0xbaa   :  { %v2119_v46 = vunpack.c.l.b16 %v2103_v14  ;;  %v2131_v16 = vrot.slane %v2120_v3, 3 }
 0xbab   :  { %v2118_v17 = vunpack.c.l.b16 %v2102_v26 }
 0xbac   :  { %v2129_v5 = vrot.slane %v2119_v46, 4 }
 0xbad   :  { %v2127_v63 = vrot.slane %v2118_v17, 5  ;;  %v2074_v59 = vpop.permute.xlu0 %2073 }
 0xbae   :  { %v2090_v21 = vmul.f32 %v2074_v59, %v5195_v41  ;;  %v2072_v25 = vpop.permute.xlu2 %2071 }
 0xbaf   :  { %v2089_v40 = vmul.f32 %v2072_v25, %v5249_v52  ;;  %v2128_v55 = vsel %vm583_vm8, %v2127_v63, %v2126_v49 }
 0xbb0   :  { %v2106_v10 = vpack.c.bf16 %v2090_v21, %v2090_v21  ;;  %v2130_v51 = vsel %vm586_vm9, %v2129_v5, %v2128_v55 }
 0xbb1   :  { %v2105_v50 = vpack.c.bf16 %v2089_v40, %v2089_v40  ;;  %v2132_v41 = vsel %vm589_vm10, %v2131_v16, %v2130_v51 }
 0xbb2   :  { %v2122_v36 = vunpack.c.l.b16 %v2106_v10 }
 0xbb3   :  { %v2121_v33 = vunpack.c.l.b16 %v2105_v50 }
 0xbb4   :  { %v2135_v57 = vrot.slane %v2122_v36, 1 }
 0xbb5   :  { %v2133_v30 = vrot.slane %v2121_v33, 2 }
 0xbb7   :  { %v2134_v22 = vsel %vm592_vm11, %v2133_v30, %v2132_v41 }
 0xbb8   :  { %v2136_v19 = vsel %vm595_vm12, %v2135_v57, %v2134_v22 }
 0xbb9   :  { %v2137_v11 = vpack.c.b16 %v2136_v19, %v2136_v19 }
 0xbbb   :  { %2138 = vrot.lane.b32.xlu1 %v2137_v11, %s4170_s5 }
 0xc2d   :  { %v2139_v52 = vpop.permute.xlu1 %2138 }
 0xc2e   :  { %3562 = vmatmul.msk.bf16.vlgmr.msra.gmra.mxu0 %vm207_vm13, %v2139_v52 }
 0xcab   :  { %v2152_v0 = vpop.f32.mrf.mxu0 }
 0xcac   :  { %v2172_v29 = vadd.f32 %v2152_v0, %v2091_v45  ;;  %v2158_v42 = vrot.slane %v2152_v0, 2  ;;  %v2157_v28 = vrot.slane %v2152_v0, 1  ;;  %v2161_v53 = vrot.slane %v2152_v0, 5 }
 0xcad   :  { %v2160_v60 = vrot.slane %v2152_v0, 4  ;;  %v2159_v1 = vrot.slane %v2152_v0, 3  ;;  %v2163_v48 = vrot.slane %v2152_v0, 7  ;;  %v2162_v9 = vrot.slane %v2152_v0, 6 }
 0xcae   :  { %3965 = vtanh.f32 %v2172_v29  ;;  %v2174_v15 = vadd.f32 %v2158_v42, %v2093_v56  ;;  %v2173_v58 = vadd.f32 %v2157_v28, %v2092_v32  ;;  %v2177_v7 = vadd.f32 %v2161_v53, %v2096_v27 }
 0xcaf   :  { %v2176_v18 = vadd.f32 %v2160_v60, %v2095_v38  ;;  %v2175_v31 = vadd.f32 %v2159_v1, %v2094_v47  ;;  %v2179_v26 = vadd.f32 %v2163_v48, %v2098_v39  ;;  %v2178_v24 = vadd.f32 %v2162_v9, %v2097_v23 }
 0xcb0   :  { %3967 = vtanh.f32 %v2174_v15  ;;  %v3564_v63 = vmul.f32 -1.442695, %v2173_v58  ;;  %v3563_v40 = vmul.f32 -1.442695, %v2172_v29  ;;  %v3565_v10 = vmul.f32 -1.442695, %v2174_v15 }
 0xcb1   :  { %3969 = vtanh.f32 %v2173_v58  ;;  %v3566_v59 = vmul.f32 -1.442695, %v2175_v31  ;;  %v3569_v5 = vmul.f32 -1.442695, %v2178_v24  ;;  %v3568_v51 = vmul.f32 -1.442695, %v2177_v7 }
 0xcb2   :  { %3971 = vtanh.f32 %v2177_v7  ;;  %v3567_v41 = vmul.f32 -1.442695, %v2176_v18  ;;  %v3570_v56 = vmul.f32 -1.442695, %v2179_v26 }
 0xcb3   :  { %v2154_v62 = vpop.f32.mrf.mxu0  ;;  %3973 = vtanh.f32 %v2176_v18 }
 0xcb4   :  { %v3966_v13 = vpop.eup %3965  ;;  %3975 = vtanh.f32 %v2175_v31 }
 0xcb5   :  { %2356 = vrot.lane.b32.xlu1 %v3966_v13, %s4169_s0  ;;  %3977 = vtanh.f32 %v2179_v26 }
 0xcb6   :  { %v3968_v4 = vpop.eup %3967  ;;  %3979 = vtanh.f32 %v2178_v24 }
 0xcb7   :  { %v3970_v43 = vpop.eup %3969  ;;  %2360 = vrot.lane.b32.xlu0 %v3968_v4, %s4169_s0  ;;  %3981 = vpow2.f32 %v3564_v63 }
 0xcb8   :  { %2358 = vrot.lane.b32.xlu2 %v3970_v43, %s4169_s0  ;;  %v3972_v14 = vpop.eup %3971  ;;  %3983 = vpow2.f32 %v3566_v59 }
 0xcb9   :  { %v3974_v46 = vpop.eup %3973 }
 0xcba   :  { %v3976_v17 = vpop.eup %3975 }
 0xcbb   :  { %v3978_v61 = vpop.eup %3977 }
 0xcbc   :  { %v3980_v34 = vpop.eup %3979 }
 0xcbd   :  { %2366 = vrot.lane.b32.xlu1 %v3972_v14, %s4169_s0  ;;  %v3982_v21 = vpop.eup %3981 }
 0xcbe   :  { %v2205_v25 = vadd.f32 1.0, %v3982_v21  ;;  %v3984_v49 = vpop.eup %3983 }
 0xcbf   :  { %2364 = vrot.lane.b32.xlu0 %v3974_v46, %s4169_s0  ;;  %v5326_v3 = vadd.f32 1.0, %v3984_v49 }
 0xcc0   :  { %2362 = vrot.lane.b32.xlu2 %v3976_v17, %s4169_s0  ;;  %3985 = vrcp.f32 %v2205_v25  ;;  %v2238_v32 = vand.u32 2147483648, %v2205_v25  ;;  %vm2232_vm2 = vweird.f32 %v2205_v25  ;;  %v2236_v15 = vand.u32 2147483647, %v2205_v25 }
 0xcc1   :  { %3987 = vpow2.f32 %v3569_v5  ;;  %v2268_v48 = vand.u32 2147483648, %v5326_v3  ;;  %vm2262_vm15 = vweird.f32 %v5326_v3  ;;  %v2266_v39 = vand.u32 2147483647, %v5326_v3 }
 0xcc2   :  { %3989 = vpow2.f32 %v3563_v40  ;;  %v2239_v7 = vor.u32 1.1754944e-38, %v2238_v32  ;;  %vm2237_vm5 = vcmp.eq.f32.partialorder %v2236_v15, 8.507059e+37 }
 0xcc3   :  { %3991 = vrcp.f32 %v5326_v3  ;;  %v2269_v46 = vor.u32 1.1754944e-38, %v2268_v48  ;;  %vm2267_vm0 = vcmp.eq.f32.partialorder %v2266_v39, 8.507059e+37 }
 0xcc4   :  { %3993 = vpow2.f32 %v3565_v10 }
 0xcc5   :  { %3995 = vpow2.f32 %v3568_v51 }
 0xcc6   :  { %v3986_v55 = vpop.eup %3985 }
 0xcc7   :  { %2370 = vrot.lane.b32.xlu0 %v3978_v61, %s4169_s0  ;;  %v3988_v50 = vpop.eup %3987  ;;  %v2228_v36 = vmul.f32 %v3986_v55, %v2205_v25  ;;  %vm2233_vm3 = vweird.f32 %v3986_v55 }
 0xcc8   :  { %2368 = vrot.lane.b32.xlu2 %v3980_v34, %s4169_s0  ;;  %v5329_v33 = vadd.f32 1.0, %v3988_v50  ;;  %v3990_v16 = vpop.eup %3989  ;;  %vm2234_vm4 = vmor %vm2232_vm2, %vm2233_vm3 }
 0xcc9   :  { %v2229_v57 = vsub.f32 1.0, %v2228_v36  ;;  %v3992_v30 = vpop.eup %3991  ;;  %v5333_v52 = vadd.f32 1.0, %v3990_v16 }
 0xcca   :  { %v3994_v22 = vpop.eup %3993  ;;  %3997 = vrcp.f32 %v5329_v33  ;;  %v2258_v11 = vmul.f32 %v3992_v30, %v5326_v3  ;;  %vm2263_vm14 = vweird.f32 %v3992_v30  ;;  %v2313_v40 = vand.u32 2147483648, %v5329_v33 }
 0xccb   :  { %v2230_v19 = vmul.f32 %v3986_v55, %v2229_v57  ;;  %3999 = vpow2.f32 %v3567_v41  ;;  %v5335_v0 = vadd.f32 1.0, %v3994_v22  ;;  %v3996_v45 = vpop.eup %3995  ;;  %vm2264_vm1 = vmor %vm2262_vm15, %vm2263_vm14  ;;  %vm2307_vm2 = vweird.f32 %v5329_v33 }
 0xccc   :  { %v2259_v42 = vsub.f32 1.0, %v2258_v11  ;;  %4001 = vrcp.f32 %v5333_v52  ;;  %v5343_v1 = vadd.f32 1.0, %v3996_v45  ;;  %v2311_v10 = vand.u32 2147483647, %v5329_v33 }
 0xccd   :  { %v2231_v29 = vadd.f32 %v3986_v55, %v2230_v19  ;;  %4003 = vrcp.f32 %v5335_v0  ;;  %v2314_v16 = vor.u32 1.1754944e-38, %v2313_v40  ;;  %vm2217_vm15 = vweird.f32 %v5333_v52 }
 0xcce   :  { %v2260_v60 = vmul.f32 %v3992_v30, %v2259_v42  ;;  %4005 = vpow2.f32 %v3570_v56  ;;  %vm2312_vm14 = vcmp.eq.f32.partialorder %v2311_v10, 8.507059e+37  ;;  %v2223_v41 = vand.u32 2147483648, %v5333_v52 }
 0xccf   :  { %v2235_v53 = vsel %vm2234_vm4, %v3986_v55, %v2231_v29  ;;  %4007 = vrcp.f32 %v5343_v1 }
 0xcd0   :  { %v5338_v28 = vpop.eup %3997  ;;  %v5349_v18 = vsel %vm2237_vm5, %v2239_v7, %v2235_v53  ;;  %v2261_v4 = vadd.f32 %v3992_v30, %v2260_v60  ;;  %v2224_v15 = vor.u32 1.1754944e-38, %v2223_v41 }
 0xcd1   :  { %v4000_v58 = vpop.eup %3999  ;;  %v2303_v27 = vmul.f32 %v5338_v28, %v5329_v33  ;;  %vm2308_vm3 = vweird.f32 %v5338_v28  ;;  %v2221_v33 = vand.u32 2147483647, %v5333_v52 }
 0xcd2   :  { %v5345_v62 = vpop.eup %4001  ;;  %v5347_v38 = vadd.f32 1.0, %v4000_v58  ;;  %v2265_v23 = vsel %vm2264_vm1, %v3992_v30, %v2261_v4  ;;  %vm2309_vm4 = vmor %vm2307_vm2, %vm2308_vm3  ;;  %vm2247_vm3 = vweird.f32 %v5335_v0 }
 0xcd3   :  { %v5351_v47 = vpop.eup %4003  ;;  %v2304_v43 = vsub.f32 1.0, %v2303_v27  ;;  %v2213_v9 = vmul.f32 %v5345_v62, %v5333_v52  ;;  %v5369_v63 = vsel %vm2267_vm0, %v2269_v46, %v2265_v23  ;;  %vm2218_vm5 = vweird.f32 %v5345_v62 }
 0xcd4   :  { %4009 = vrcp.f32 %v5347_v38  ;;  %v4006_v14 = vpop.eup %4005  ;;  %v2243_v26 = vmul.f32 %v5351_v47, %v5335_v0  ;;  %vm2248_vm1 = vweird.f32 %v5351_v47  ;;  %vm2219_vm0 = vmor %vm2217_vm15, %vm2218_vm5  ;;  %v2251_v52 = vand.u32 2147483647, %v5335_v0 }
 0xcd5   :  { %v2305_v24 = vmul.f32 %v5338_v28, %v2304_v43  ;;  %v2214_v17 = vsub.f32 1.0, %v2213_v9  ;;  %v5365_v61 = vpop.eup %4007  ;;  %v5367_v34 = vadd.f32 1.0, %v4006_v14  ;;  %vm2249_vm2 = vmor %vm2247_vm3, %vm2248_vm1  ;;  %vm2292_vm15 = vweird.f32 %v5343_v1 }
 0xcd6   :  { %v2244_v21 = vsub.f32 1.0, %v2243_v26  ;;  %v2288_v55 = vmul.f32 %v5365_v61, %v5343_v1  ;;  %vm2252_vm5 = vcmp.eq.f32.partialorder %v2251_v52, 8.507059e+37  ;;  %v2298_v43 = vand.u32 2147483648, %v5343_v1 }
 0xcd7   :  { %v2306_v49 = vadd.f32 %v5338_v28, %v2305_v24  ;;  %v2215_v3 = vmul.f32 %v5345_v62, %v2214_v17  ;;  %4011 = vrcp.f32 %v5367_v34  ;;  %v2283_v14 = vand.u32 2147483648, %v5347_v38 }
 0xcd8   :  { %v2245_v50 = vmul.f32 %v5351_v47, %v2244_v21  ;;  %v2289_v30 = vsub.f32 1.0, %v2288_v55  ;;  %vm2277_vm3 = vweird.f32 %v5347_v38  ;;  %v2299_v23 = vor.u32 1.1754944e-38, %v2298_v43 }
 0xcd9   :  { %v2310_v51 = vsel %vm2309_vm4, %v5338_v28, %v2306_v49  ;;  %v2216_v57 = vadd.f32 %v5345_v62, %v2215_v3  ;;  %v2253_v28 = vand.u32 2147483648, %v5335_v0  ;;  %vm2222_vm4 = vcmp.eq.f32.partialorder %v2221_v33, 8.507059e+37 }
 0xcda   :  { %v5371_v25 = vpop.eup %4009  ;;  %v5393_v22 = vsel %vm2312_vm14, %v2314_v16, %v2310_v51  ;;  %v2246_v11 = vadd.f32 %v5351_v47, %v2245_v50  ;;  %v2290_v32 = vmul.f32 %v5365_v61, %v2289_v30  ;;  %vm2293_vm14 = vweird.f32 %v5365_v61 }
 0xcdb   :  { %v2273_v36 = vmul.f32 %v5371_v25, %v5347_v38  ;;  %v2220_v56 = vsel %vm2219_vm0, %v5345_v62, %v2216_v57  ;;  %v2254_v62 = vor.u32 1.1754944e-38, %v2253_v28  ;;  %vm2278_vm1 = vweird.f32 %v5371_v25  ;;  %vm2294_vm0 = vmor %vm2292_vm15, %vm2293_vm14 }
 0xcdc   :  { %v2250_v58 = vsel %vm2249_vm2, %v5351_v47, %v2246_v11  ;;  %v5410_v7 = vsel %vm2222_vm4, %v2224_v15, %v2220_v56  ;;  %v2296_v47 = vand.u32 2147483647, %v5343_v1  ;;  %v2281_v1 = vand.u32 2147483647, %v5347_v38  ;;  %vm2279_vm2 = vmor %vm2277_vm3, %vm2278_vm1 }
 0xcdd   :  { %v2274_v45 = vsub.f32 1.0, %v2273_v36  ;;  %v5397_v29 = vpop.eup %4011  ;;  %v5415_v4 = vsel %vm2252_vm5, %v2254_v62, %v2250_v58  ;;  %v2284_v21 = vor.u32 1.1754944e-38, %v2283_v14  ;;  %vm2322_vm15 = vweird.f32 %v5367_v34 }
 0xcde   :  { %v2318_v60 = vmul.f32 %v5397_v29, %v5367_v34  ;;  %vm2297_vm4 = vcmp.eq.f32.partialorder %v2296_v47, 8.507059e+37  ;;  %vm2282_vm5 = vcmp.eq.f32.partialorder %v2281_v1, 8.507059e+37  ;;  %vm2323_vm14 = vweird.f32 %v5397_v29 }
 0xcdf   :  { %v2275_v53 = vmul.f32 %v5371_v25, %v2274_v45  ;;  %v2326_v3 = vand.u32 2147483647, %v5367_v34  ;;  %vm2324_vm1 = vmor %vm2322_vm15, %vm2323_vm14  ;;  %v2342_v16 = vmul.f32 %v5415_v4, %v5260_v37  ;;  %v2341_v30 = vmul.f32 %v5349_v18, %v5284_v6 }
 0xce0   :  { %v2319_v39 = vsub.f32 1.0, %v2318_v60  ;;  %v2343_v37 = vmul.f32 %v5369_v63, %v5290_v54  ;;  %v2346_v54 = vmul.f32 %v5393_v22, %v5296_v8 }
 0xce1   :  { %v2276_v9 = vadd.f32 %v5371_v25, %v2275_v53 }
 0xce2   :  { %v2320_v46 = vmul.f32 %v5397_v29, %v2319_v39 }
 0xce3   :  { %v2280_v24 = vsel %vm2279_vm2, %v5371_v25, %v2276_v9  ;;  %v2328_v25 = vand.u32 2147483648, %v5367_v34 }
 0xce4   :  { %v5434_v49 = vsel %vm2282_vm5, %v2284_v21, %v2280_v24  ;;  %v2321_v38 = vadd.f32 %v5397_v29, %v2320_v46 }
 0xce5   :  { %v2329_v10 = vor.u32 1.1754944e-38, %v2328_v25 }
 0xce6   :  { %v2325_v55 = vsel %vm2324_vm1, %v5397_v29, %v2321_v38 }
 0xd12   :  { %v2359_v13 = vpop.permute.xlu2 %2358 }
 0xd13   :  { %v2381_v31 = vmul.f32 %v2359_v13, %v5349_v18  ;;  %v2291_v13 = vadd.f32 %v5365_v61, %v2290_v32 }
 0xd15   :  { %2398 = vrot.lane.b32.xlu1 %v2381_v31, %s4170_s5  ;;  %v2295_v26 = vsel %vm2294_vm0, %v5365_v61, %v2291_v13  ;;  %vm2327_vm0 = vcmp.eq.f32.partialorder %v2326_v3, 8.507059e+37 }
 0xd16   :  { %v5445_v50 = vsel %vm2327_vm0, %v2329_v10, %v2325_v55 }
 0xd1a   :  { %v2363_v59 = vpop.permute.xlu2 %2362 }
 0xd1b   :  { %v2383_v5 = vmul.f32 %v2363_v59, %v5369_v63  ;;  %v5431_v59 = vsel %vm2297_vm4, %v2299_v23, %v2295_v26 }
 0xd1d   :  { %2402 = vrot.lane.b32.xlu1 %v2383_v5, %s4170_s5 }
 0xd22   :  { %v2369_v19 = vpop.permute.xlu2 %2368 }
 0xd23   :  { %v2386_v42 = vmul.f32 %v2369_v19, %v5393_v22  ;;  %v2344_v19 = vmul.f32 %v5434_v49, %v5271_v44  ;;  %v2347_v44 = vmul.f32 %v5445_v50, %v5278_v35  ;;  %v2340_v35 = vmul.f32 %v5410_v7, %v5255_v2 }
 0xd25   :  { %2408 = vrot.lane.b32.xlu1 %v2386_v42, %s4170_s5 }
 0xd27   :  { %v2357_v27 = vpop.permute.xlu1 %2356 }
 0xd28   :  { %v2380_v0 = vmul.f32 %v2357_v27, %v5410_v7 }
 0xd29   :  { %v2361_v31 = vpop.permute.xlu0 %2360 }
 0xd2a   :  { %v2382_v48 = vmul.f32 %v2361_v31, %v5415_v4  ;;  %2396 = vrot.lane.b32.xlu0 %v2380_v0, %s4170_s5  ;;  %v2345_v0 = vmul.f32 %v5431_v59, %v5265_v20 }
 0xd2c   :  { %2400 = vrot.lane.b32.xlu2 %v2382_v48, %s4170_s5 }
 0xd2f   :  { %v2367_v17 = vpop.permute.xlu1 %2366 }
 0xd30   :  { %v2385_v5 = vmul.f32 %v2367_v17, %v5431_v59 }
 0xd31   :  { %v2365_v61 = vpop.permute.xlu0 %2364 }
 0xd32   :  { %v2384_v40 = vmul.f32 %v2365_v61, %v5434_v49  ;;  %2406 = vrot.lane.b32.xlu0 %v2385_v5, %s4170_s5 }
 0xd34   :  { %2404 = vrot.lane.b32.xlu2 %v2384_v40, %s4170_s5 }
 0xd39   :  { %v2371_v36 = vpop.permute.xlu0 %2370 }
 0xd3a   :  { %v2387_v51 = vmul.f32 %v2371_v36, %v5445_v50 }
 0xd3c   :  { %2410 = vrot.lane.b32.xlu2 %v2387_v51, %s4170_s5 }
 0xd86   :  { %v2401_v57 = vpop.permute.xlu2 %2400 }
 0xd87   :  { %v5453_v34 = vadd.f32 %v2401_v57, %v2342_v16  ;;  %v2399_v33 = vpop.permute.xlu1 %2398 }
 0xd88   :  { %v5455_v41 = vadd.f32 %v2399_v33, %v2341_v30 }
 0xd89   :  { %4013 = vtanh.f32 %v5453_v34 }
 0xd8a   :  { %4015 = vtanh.f32 %v5455_v41 }
 0xd8e   :  { %v2405_v11 = vpop.permute.xlu2 %2404 }
 0xd8f   :  { %v4014_v45 = vpop.eup %4013  ;;  %v5463_v29 = vadd.f32 %v2405_v11, %v2344_v19  ;;  %v2403_v6 = vpop.permute.xlu1 %2402 }
 0xd90   :  { %v4016_v42 = vpop.eup %4015  ;;  %v5465_v28 = vadd.f32 %v2403_v6, %v2343_v37  ;;  %2448 = vrot.lane.b32.xlu1 %v4014_v45, %s4169_s0 }
 0xd91   :  { %4017 = vtanh.f32 %v5463_v29  ;;  %2446 = vrot.lane.b32.xlu0 %v4016_v42, %s4169_s0 }
 0xd92   :  { %4019 = vtanh.f32 %v5465_v28 }
 0xd96   :  { %v2411_v56 = vpop.permute.xlu2 %2410 }
 0xd97   :  { %v4018_v52 = vpop.eup %4017  ;;  %v5475_v32 = vadd.f32 %v2411_v56, %v2347_v44  ;;  %v2409_v15 = vpop.permute.xlu1 %2408 }
 0xd98   :  { %v4020_v58 = vpop.eup %4019  ;;  %v5477_v53 = vadd.f32 %v2409_v15, %v2346_v54  ;;  %2452 = vrot.lane.b32.xlu1 %v4018_v52, %s4169_s0 }
 0xd99   :  { %4021 = vtanh.f32 %v5475_v32  ;;  %2450 = vrot.lane.b32.xlu0 %v4020_v58, %s4169_s0 }
 0xd9a   :  { %4023 = vtanh.f32 %v5477_v53 }
 0xd9c   :  { %v2397_v60 = vpop.permute.xlu0 %2396 }
 0xd9d   :  { %v5485_v8 = vadd.f32 %v2397_v60, %v2340_v35 }
 0xd9f   :  { %v4022_v27 = vpop.eup %4021  ;;  %4025 = vtanh.f32 %v5485_v8 }
 0xda0   :  { %v4024_v62 = vpop.eup %4023  ;;  %2458 = vrot.lane.b32.xlu1 %v4022_v27, %s4169_s0  ;;  %v2476_v27 = vld [vmem:[#allocation2 + $0x6] sm:$0x1] }
 0xda1   :  { %2456 = vrot.lane.b32.xlu0 %v4024_v62, %s4169_s0 }
 0xda4   :  { %v2407_v13 = vpop.permute.xlu0 %2406 }
 0xda5   :  { %v4026_v31 = vpop.eup %4025  ;;  %v5492_v47 = vadd.f32 %v2407_v13, %v2345_v0  ;;  %v2477_v13 = vld [vmem:[#allocation2 + $0xe] sm:$0x1] }
 0xda6   :  { %2444 = vrot.lane.b32.xlu2 %v4026_v31, %s4169_s0  ;;  %v2478_v31 = vld [vmem:[#allocation2 + $0x16] sm:$0x1] }
 0xda7   :  { %4027 = vtanh.f32 %v5492_v47 }
 0xdad   :  { %v4028_v2 = vpop.eup %4027 }
 0xdae   :  { %2454 = vrot.lane.b32.xlu2 %v4028_v2, %s4169_s0 }
 0xe00   :  { %v2445_v43 = vpop.permute.xlu2 %2444 }
 0xe01   :  { %v2468_v20 = vmul.f32 %v2445_v43, %v5410_v7 }
 0xe02   :  { %v2449_v48 = vpop.permute.xlu1 %2448 }
 0xe03   :  { %v2447_v9 = vpop.permute.xlu0 %2446  ;;  %v2470_v39 = vmul.f32 %v2449_v48, %v5415_v4  ;;  %v2484_v17 = vpack.c.bf16 %v2468_v20, %v2468_v20  ;;  %v2479_v20 = vld [vmem:[#allocation2 + $0x1e] sm:$0x1] }
 0xe04   :  { %v2469_v14 = vmul.f32 %v2447_v9, %v5349_v18 }
 0xe05   :  { %v2486_v1 = vpack.c.bf16 %v2470_v39, %v2470_v39  ;;  %v2500_v18 = vunpack.c.l.b16 %v2484_v17 }
 0xe06   :  { %v2485_v26 = vpack.c.bf16 %v2469_v14, %v2469_v14 }
 0xe07   :  { %v2502_v61 = vunpack.c.l.b16 %v2486_v1 }
 0xe08   :  { %v2501_v23 = vunpack.c.l.b16 %v2485_v26  ;;  %v2455_v24 = vpop.permute.xlu2 %2454  ;;  %v2481_v26 = vld [vmem:[#allocation2 + $0x2e] sm:$0x1] }
 0xe09   :  { %v2473_v25 = vmul.f32 %v2455_v24, %v5431_v59  ;;  %v2510_v55 = vrot.slane %v2502_v61, 6  ;;  %v2480_v24 = vld [vmem:[#allocation2 + $0x26] sm:$0x1] }
 0xe0a   :  { %v2453_v46 = vpop.permute.xlu1 %2452  ;;  %v2508_v38 = vrot.slane %v2501_v23, 7 }
 0xe0b   :  { %v2472_v21 = vmul.f32 %v2453_v46, %v5434_v49  ;;  %v2451_v5 = vpop.permute.xlu0 %2450  ;;  %v2489_v51 = vpack.c.bf16 %v2473_v25, %v2473_v25  ;;  %v2482_v25 = vld [vmem:[#allocation2 + $0x36] sm:$0x1] }
 0xe0c   :  { %v2471_v40 = vmul.f32 %v2451_v5, %v5369_v63  ;;  %v2509_v36 = vsel %vm577_vm6, %v2508_v38, %v2500_v18 }
 0xe0d   :  { %v2488_v4 = vpack.c.bf16 %v2472_v21, %v2472_v21  ;;  %v2511_v63 = vsel %vm580_vm7, %v2510_v55, %v2509_v36  ;;  %v2505_v59 = vunpack.c.l.b16 %v2489_v51 }
 0xe0e   :  { %v2487_v3 = vpack.c.bf16 %v2471_v40, %v2471_v40 }
 0xe0f   :  { %v2504_v10 = vunpack.c.l.b16 %v2488_v4  ;;  %v2516_v56 = vrot.slane %v2505_v59, 3  ;;  %v2483_v4 = vld [vmem:[#allocation2 + $0x3e] sm:$0x1] }
 0xe10   :  { %v2503_v7 = vunpack.c.l.b16 %v2487_v3 }
 0xe11   :  { %v2514_v33 = vrot.slane %v2504_v10, 4 }
 0xe12   :  { %v2512_v16 = vrot.slane %v2503_v7, 5  ;;  %v2459_v57 = vpop.permute.xlu1 %2458 }
 0xe13   :  { %v2475_v49 = vmul.f32 %v2459_v57, %v5445_v50  ;;  %v2457_v30 = vpop.permute.xlu0 %2456 }
 0xe14   :  { %v2474_v19 = vmul.f32 %v2457_v30, %v5393_v22  ;;  %v2513_v11 = vsel %vm583_vm8, %v2512_v16, %v2511_v63 }
 0xe15   :  { %v2491_v37 = vpack.c.bf16 %v2475_v49, %v2475_v49  ;;  %v2515_v42 = vsel %vm586_vm9, %v2514_v33, %v2513_v11 }
 0xe16   :  { %v2490_v45 = vpack.c.bf16 %v2474_v19, %v2474_v19  ;;  %v2517_v50 = vsel %vm589_vm10, %v2516_v56, %v2515_v42 }
 0xe17   :  { %v2507_v6 = vunpack.c.l.b16 %v2491_v37 }
 0xe18   :  { %v2506_v44 = vunpack.c.l.b16 %v2490_v45 }
 0xe19   :  { %v2520_v54 = vrot.slane %v2507_v6, 1 }
 0xe1a   :  { %v2518_v52 = vrot.slane %v2506_v44, 2 }
 0xe1c   :  { %v2519_v15 = vsel %vm592_vm11, %v2518_v52, %v2517_v50 }
 0xe1d   :  { %v2521_v58 = vsel %vm595_vm12, %v2520_v54, %v2519_v15 }
 0xe1e   :  { %v2522_v35 = vpack.c.b16 %v2521_v58, %v2521_v58 }
 0xe20   :  { %2523 = vrot.lane.b32.xlu2 %v2522_v35, %s4170_s5 }
 0xe7a   :  { %v2524_v22 = vpop.permute.xlu2 %2523 }
 0xe7b   :  { %3571 = vmatmul.msk.bf16.vlgmr.msra.gmra.mxu2 %vm207_vm13, %v2524_v22 }
 0xefe   :  { %v2537_v60 = vpop.f32.mrf.mxu2 }
 0xeff   :  { %v2542_v62 = vrot.slane %v2537_v60, 1  ;;  %v2543_v0 = vrot.slane %v2537_v60, 2  ;;  %v2557_v2 = vadd.f32 %v2537_v60, %v2476_v27  ;;  %v2546_v9 = vrot.slane %v2537_v60, 5 }
 0xf00   :  { %v2544_v39 = vrot.slane %v2537_v60, 3  ;;  %v2545_v14 = vrot.slane %v2537_v60, 4  ;;  %v2547_v40 = vrot.slane %v2537_v60, 6  ;;  %v2548_v38 = vrot.slane %v2537_v60, 7 }
 0xf01   :  { %v2558_v43 = vadd.f32 %v2542_v62, %v2477_v13  ;;  %v2559_v48 = vadd.f32 %v2543_v0, %v2478_v31  ;;  %4029 = vtanh.f32 %v2557_v2  ;;  %v2562_v1 = vadd.f32 %v2546_v9, %v2481_v26 }
 0xf02   :  { %v2560_v46 = vadd.f32 %v2544_v39, %v2479_v20  ;;  %v2561_v21 = vadd.f32 %v2545_v14, %v2480_v24  ;;  %v2563_v3 = vadd.f32 %v2547_v40, %v2482_v25  ;;  %v2564_v55 = vadd.f32 %v2548_v38, %v2483_v4 }
 0xf03   :  { %4031 = vtanh.f32 %v2558_v43  ;;  %v3572_v16 = vmul.f32 -1.442695, %v2557_v2  ;;  %v3577_v57 = vmul.f32 -1.442695, %v2562_v1  ;;  %v3573_v59 = vmul.f32 -1.442695, %v2558_v43 }
 0xf04   :  { %4033 = vtanh.f32 %v2559_v48  ;;  %v3574_v37 = vmul.f32 -1.442695, %v2559_v48  ;;  %v3576_v42 = vmul.f32 -1.442695, %v2561_v21  ;;  %v3575_v44 = vmul.f32 -1.442695, %v2560_v46 }
 0xf05   :  { %4035 = vtanh.f32 %v2562_v1  ;;  %v3579_v62 = vmul.f32 -1.442695, %v2564_v55  ;;  %v3578_v0 = vmul.f32 -1.442695, %v2563_v3 }
 0xf06   :  { %v2539_v23 = vpop.f32.mrf.mxu2  ;;  %4037 = vtanh.f32 %v2560_v46 }
 0xf07   :  { %v4030_v17 = vpop.eup %4029  ;;  %4039 = vtanh.f32 %v2561_v21 }
 0xf08   :  { %2741 = vrot.lane.b32.xlu2 %v4030_v17, %s4169_s0  ;;  %4041 = vtanh.f32 %v2563_v3 }
 0xf09   :  { %v4032_v5 = vpop.eup %4031  ;;  %4043 = vtanh.f32 %v2564_v55 }
 0xf0a   :  { %v4034_v61 = vpop.eup %4033  ;;  %2743 = vrot.lane.b32.xlu0 %v4032_v5, %s4169_s0  ;;  %4045 = vpow2.f32 %v3572_v16 }
 0xf0b   :  { %2745 = vrot.lane.b32.xlu1 %v4034_v61, %s4169_s0  ;;  %v4036_v18 = vpop.eup %4035  ;;  %4047 = vpow2.f32 %v3577_v57 }
 0xf0c   :  { %v4038_v10 = vpop.eup %4037 }
 0xf0d   :  { %v4040_v7 = vpop.eup %4039 }
 0xf0e   :  { %v4042_v36 = vpop.eup %4041 }
 0xf0f   :  { %v4044_v51 = vpop.eup %4043 }
 0xf10   :  { %2751 = vrot.lane.b32.xlu2 %v4036_v18, %s4169_s0  ;;  %v4046_v49 = vpop.eup %4045 }
 0xf11   :  { %v2589_v30 = vadd.f32 1.0, %v4046_v49  ;;  %v4048_v33 = vpop.eup %4047 }
 0xf12   :  { %2747 = vrot.lane.b32.xlu0 %v4038_v10, %s4169_s0  ;;  %v2594_v63 = vadd.f32 1.0, %v4048_v33 }
 0xf13   :  { %2749 = vrot.lane.b32.xlu1 %v4040_v7, %s4169_s0  ;;  %4049 = vrcp.f32 %v2589_v30  ;;  %v2608_v22 = vand.u32 2147483648, %v2589_v30  ;;  %vm2602_vm2 = vweird.f32 %v2589_v30  ;;  %v2606_v27 = vand.u32 2147483647, %v2589_v30 }
 0xf14   :  { %4051 = vrcp.f32 %v2594_v63  ;;  %v2683_v1 = vand.u32 2147483648, %v2594_v63  ;;  %vm2677_vm15 = vweird.f32 %v2594_v63  ;;  %v2681_v46 = vand.u32 2147483647, %v2594_v63 }
 0xf15   :  { %4053 = vpow2.f32 %v3573_v59  ;;  %v2609_v48 = vor.u32 1.1754944e-38, %v2608_v22  ;;  %vm2607_vm5 = vcmp.eq.f32.partialorder %v2606_v27, 8.507059e+37 }
 0xf16   :  { %4055 = vpow2.f32 %v3574_v37  ;;  %v2684_v40 = vor.u32 1.1754944e-38, %v2683_v1  ;;  %vm2682_vm0 = vcmp.eq.f32.partialorder %v2681_v46, 8.507059e+37 }
 0xf17   :  { %4057 = vpow2.f32 %v3576_v42 }
 0xf18   :  { %4059 = vpow2.f32 %v3575_v44 }
 0xf19   :  { %v4050_v19 = vpop.eup %4049 }
 0xf1a   :  { %2753 = vrot.lane.b32.xlu0 %v4042_v36, %s4169_s0  ;;  %v2598_v11 = vmul.f32 %v4050_v19, %v2589_v30  ;;  %v4052_v6 = vpop.eup %4051  ;;  %vm2603_vm3 = vweird.f32 %v4050_v19 }
 0xf1b   :  { %2755 = vrot.lane.b32.xlu1 %v4044_v51, %s4169_s0  ;;  %v2673_v54 = vmul.f32 %v4052_v6, %v2594_v63  ;;  %v4054_v52 = vpop.eup %4053  ;;  %vm2604_vm4 = vmor %vm2602_vm2, %vm2603_vm3  ;;  %vm2678_vm14 = vweird.f32 %v4052_v6 }
 0xf1c   :  { %v2599_v45 = vsub.f32 1.0, %v2598_v11  ;;  %v4056_v50 = vpop.eup %4055  ;;  %v5522_v35 = vadd.f32 1.0, %v4054_v52  ;;  %vm2679_vm1 = vmor %vm2677_vm15, %vm2678_vm14 }
 0xf1d   :  { %v2674_v58 = vsub.f32 1.0, %v2673_v54  ;;  %v5524_v60 = vadd.f32 1.0, %v4056_v50  ;;  %v4058_v13 = vpop.eup %4057 }
 0xf1e   :  { %v2600_v56 = vmul.f32 %v4050_v19, %v2599_v45  ;;  %4061 = vrcp.f32 %v5522_v35  ;;  %v4060_v43 = vpop.eup %4059  ;;  %v5533_v23 = vadd.f32 1.0, %v4058_v13  ;;  %v2623_v37 = vand.u32 2147483648, %v5522_v35 }
 0xf1f   :  { %v2675_v2 = vmul.f32 %v4052_v6, %v2674_v58  ;;  %4063 = vrcp.f32 %v5524_v60  ;;  %v5531_v20 = vadd.f32 1.0, %v4060_v43  ;;  %v2638_v42 = vand.u32 2147483648, %v5524_v60 }
 0xf20   :  { %v2601_v15 = vadd.f32 %v4050_v19, %v2600_v56  ;;  %4065 = vpow2.f32 %v3579_v62  ;;  %v2621_v44 = vand.u32 2147483647, %v5522_v35  ;;  %v2636_v56 = vand.u32 2147483647, %v5524_v60 }
 0xf21   :  { %4067 = vpow2.f32 %v3578_v0  ;;  %v2676_v26 = vadd.f32 %v4052_v6, %v2675_v2  ;;  %v2624_v22 = vor.u32 1.1754944e-38, %v2623_v37  ;;  %v2639_v27 = vor.u32 1.1754944e-38, %v2638_v42 }
 0xf22   :  { %v2605_v31 = vsel %vm2604_vm4, %v4050_v19, %v2601_v15  ;;  %4069 = vrcp.f32 %v5531_v20  ;;  %vm2617_vm4 = vweird.f32 %v5522_v35  ;;  %v2653_v13 = vand.u32 2147483648, %v5531_v20 }
 0xf23   :  { %v5528_v39 = vsel %vm2607_vm5, %v2609_v48, %v2605_v31  ;;  %v2680_v5 = vsel %vm2679_vm1, %v4052_v6, %v2676_v26  ;;  %4071 = vrcp.f32 %v5533_v23  ;;  %vm2632_vm5 = vweird.f32 %v5524_v60 }
 0xf24   :  { %v4062_v24 = vpop.eup %4061  ;;  %v5540_v3 = vsel %vm2682_vm0, %v2684_v40, %v2680_v5  ;;  %vm2622_vm1 = vcmp.eq.f32.partialorder %v2621_v44, 8.507059e+37  ;;  %vm2637_vm0 = vcmp.eq.f32.partialorder %v2636_v56, 8.507059e+37  ;;  %v2651_v46 = vand.u32 2147483647, %v5531_v20 }
 0xf25   :  { %v4064_v17 = vpop.eup %4063  ;;  %v2613_v38 = vmul.f32 %v4062_v24, %v5522_v35  ;;  %vm2618_vm3 = vweird.f32 %v4062_v24  ;;  %v2654_v40 = vor.u32 1.1754944e-38, %v2653_v13 }
 0xf26   :  { %v4066_v21 = vpop.eup %4065  ;;  %v2628_v25 = vmul.f32 %v4064_v17, %v5524_v60  ;;  %vm2633_vm2 = vweird.f32 %v4064_v17  ;;  %vm2619_vm14 = vmor %vm2617_vm4, %vm2618_vm3  ;;  %vm2647_vm4 = vweird.f32 %v5531_v20 }
 0xf27   :  { %v4068_v61 = vpop.eup %4067  ;;  %v2614_v10 = vsub.f32 1.0, %v2613_v38  ;;  %v5545_v7 = vadd.f32 1.0, %v4066_v21  ;;  %vm5568_vm15 = vmor %vm2632_vm5, %vm2633_vm2  ;;  %vm2662_vm5 = vweird.f32 %v5533_v23 }
 0xf28   :  { %v5543_v55 = vadd.f32 1.0, %v4068_v61  ;;  %v5547_v36 = vpop.eup %4069  ;;  %v2629_v51 = vsub.f32 1.0, %v2628_v25 }
 0xf29   :  { %v5550_v16 = vpop.eup %4071  ;;  %v2615_v57 = vmul.f32 %v4062_v24, %v2614_v10  ;;  %v2643_v49 = vmul.f32 %v5547_v36, %v5531_v20  ;;  %vm2648_vm3 = vweird.f32 %v5547_v36 }
 0xf2a   :  { %4073 = vrcp.f32 %v5543_v55  ;;  %v2630_v30 = vmul.f32 %v4064_v17, %v2629_v51  ;;  %v2658_v33 = vmul.f32 %v5550_v16, %v5533_v23  ;;  %vm2663_vm2 = vweird.f32 %v5550_v16 }
 0xf2b   :  { %4075 = vrcp.f32 %v5545_v7  ;;  %v2616_v63 = vadd.f32 %v4062_v24, %v2615_v57  ;;  %v2644_v19 = vsub.f32 1.0, %v2643_v49  ;;  %v2698_v57 = vand.u32 2147483648, %v5543_v55 }
 0xf2c   :  { %v2631_v11 = vadd.f32 %v4064_v17, %v2630_v30  ;;  %v2659_v45 = vsub.f32 1.0, %v2658_v33  ;;  %v2713_v49 = vand.u32 2147483648, %v5545_v7  ;;  %v2696_v30 = vand.u32 2147483647, %v5543_v55 }
 0xf2d   :  { %v2620_v52 = vsel %vm2619_vm14, %v4062_v24, %v2616_v63  ;;  %v2645_v50 = vmul.f32 %v5547_v36, %v2644_v19  ;;  %v2668_v24 = vand.u32 2147483648, %v5533_v23  ;;  %vm2649_vm14 = vmor %vm2647_vm4, %vm2648_vm3  ;;  %vm2692_vm4 = vweird.f32 %v5543_v55 }
 0xf2e   :  { %v2635_v58 = vsel %vm5568_vm15, %v4064_v17, %v2631_v11  ;;  %v2660_v35 = vmul.f32 %v5550_v16, %v2659_v45  ;;  %v5580_v0 = vsel %vm2622_vm1, %v2624_v22, %v2620_v52  ;;  %v2666_v17 = vand.u32 2147483647, %v5533_v23  ;;  %vm2664_vm15 = vmor %vm2662_vm5, %vm2663_vm2 }
 0xf2f   :  { %v5584_v2 = vsel %vm2637_vm0, %v2639_v27, %v2635_v58  ;;  %v2646_v48 = vadd.f32 %v5547_v36, %v2645_v50  ;;  %v2669_v20 = vor.u32 1.1754944e-38, %v2668_v24  ;;  %vm2652_vm1 = vcmp.eq.f32.partialorder %v2651_v46, 8.507059e+37 }
 0xf30   :  { %v5558_v59 = vpop.eup %4073  ;;  %v2661_v26 = vadd.f32 %v5550_v16, %v2660_v35  ;;  %vm2667_vm0 = vcmp.eq.f32.partialorder %v2666_v17, 8.507059e+37  ;;  %vm2707_vm5 = vweird.f32 %v5545_v7  ;;  %v2711_v33 = vand.u32 2147483647, %v5545_v7 }
 0xf31   :  { %v5561_v6 = vpop.eup %4075  ;;  %v2688_v15 = vmul.f32 %v5558_v59, %v5543_v55  ;;  %v2650_v21 = vsel %vm2649_vm14, %v5547_v36, %v2646_v48  ;;  %vm2693_vm3 = vweird.f32 %v5558_v59  ;;  %v2699_v11 = vor.u32 1.1754944e-38, %v2698_v57 }
 0xf32   :  { %v2703_v60 = vmul.f32 %v5561_v6, %v5545_v7  ;;  %v2665_v61 = vsel %vm2664_vm15, %v5550_v16, %v2661_v26  ;;  %v5604_v25 = vsel %vm2652_vm1, %v2654_v40, %v2650_v21  ;;  %vm2708_vm2 = vweird.f32 %v5561_v6  ;;  %vm2694_vm14 = vmor %vm2692_vm4, %vm2693_vm3 }
 0xf33   :  { %v5606_v23 = vsel %vm2667_vm0, %v2669_v20, %v2665_v61  ;;  %vm2709_vm15 = vmor %vm2707_vm5, %vm2708_vm2  ;;  %v2714_v37 = vor.u32 1.1754944e-38, %v2713_v49  ;;  %vm2697_vm1 = vcmp.eq.f32.partialorder %v2696_v30, 8.507059e+37  ;;  %vm2712_vm0 = vcmp.eq.f32.partialorder %v2711_v33, 8.507059e+37 }
 0xf34   :  { %v2704_v1 = vsub.f32 1.0, %v2703_v60  ;;  %v2726_v54 = vmul.f32 %v5580_v0, %v5455_v41  ;;  %v2730_v58 = vmul.f32 %v5540_v3, %v5492_v47  ;;  %v2727_v48 = vmul.f32 %v5584_v2, %v5453_v34 }
 0xf35   :  { %vm5963_vm3 = vcmask 23552  }
 0xf36   :  { %v2705_v38 = vmul.f32 %v5561_v6, %v2704_v1 }
 0xf38   :  { %v2706_v16 = vadd.f32 %v5561_v6, %v2705_v38 }
 0xf3a   :  { %v2710_v19 = vsel %vm2709_vm15, %v5561_v6, %v2706_v16 }
 0xf3b   :  { %v5626_v55 = vsel %vm2712_vm0, %v2714_v37, %v2710_v19 }
 0xf3c   :  { %v2732_v34 = vmul.f32 %v5626_v55, %v5475_v32 }
 0xf62   :  { %v2742_v9 = vpop.permute.xlu2 %2741 }
 0xf63   :  { %v2765_v14 = vmul.f32 %v2742_v9, %v5528_v39  ;;  %v2689_v9 = vsub.f32 1.0, %v2688_v15 }
 0xf65   :  { %2781 = vrot.lane.b32.xlu1 %v2765_v14, %s4170_s5  ;;  %v2690_v5 = vmul.f32 %v5558_v59, %v2689_v9 }
 0xf67   :  { %v2691_v36 = vadd.f32 %v5558_v59, %v2690_v5 }
 0xf69   :  { %v2695_v63 = vsel %vm2694_vm14, %v5558_v59, %v2691_v36  ;;  %v2725_v59 = vmul.f32 %v5528_v39, %v5485_v8  ;;  %v2728_v8 = vmul.f32 %v5604_v25, %v5465_v28 }
 0xf6a   :  { %v2752_v4 = vpop.permute.xlu2 %2751  ;;  %v5624_v45 = vsel %vm2697_vm1, %v2699_v11, %v2695_v63 }
 0xf6b   :  { %v2770_v18 = vmul.f32 %v2752_v4, %v5540_v3  ;;  %v2731_v47 = vmul.f32 %v5624_v45, %v5477_v53  ;;  %v2729_v53 = vmul.f32 %v5606_v23, %v5463_v29 }
 0xf6d   :  { %2791 = vrot.lane.b32.xlu1 %v2770_v18, %s4170_s5 }
 0xf7c   :  { %v2744_v62 = vpop.permute.xlu0 %2743 }
 0xf7d   :  { %v2746_v31 = vpop.permute.xlu1 %2745  ;;  %v2766_v43 = vmul.f32 %v2744_v62, %v5580_v0 }
 0xf7e   :  { %v2767_v14 = vmul.f32 %v2746_v31, %v5584_v2 }
 0xf7f   :  { %2783 = vrot.lane.b32.xlu2 %v2766_v43, %s4170_s5 }
 0xf80   :  { %2785 = vrot.lane.b32.xlu0 %v2767_v14, %s4170_s5 }
 0xf84   :  { %v2748_v4 = vpop.permute.xlu0 %2747 }
 0xf85   :  { %v2750_v18 = vpop.permute.xlu1 %2749  ;;  %v2768_v10 = vmul.f32 %v2748_v4, %v5604_v25 }
 0xf86   :  { %v2769_v51 = vmul.f32 %v2750_v18, %v5606_v23 }
 0xf87   :  { %2787 = vrot.lane.b32.xlu2 %v2768_v10, %s4170_s5 }
 0xf88   :  { %2789 = vrot.lane.b32.xlu0 %v2769_v51, %s4170_s5 }
 0xf8c   :  { %v2754_v42 = vpop.permute.xlu0 %2753 }
 0xf8d   :  { %v2756_v44 = vpop.permute.xlu1 %2755  ;;  %v2771_v56 = vmul.f32 %v2754_v42, %v5624_v45 }
 0xf8e   :  { %v2772_v7 = vmul.f32 %v2756_v44, %v5626_v55 }
 0xf8f   :  { %2793 = vrot.lane.b32.xlu2 %v2771_v56, %s4170_s5 }
 0xf90   :  { %2795 = vrot.lane.b32.xlu0 %v2772_v7, %s4170_s5 }
 0xfd7   :  { %v2782_v6 = vpop.permute.xlu1 %2781 }
 0xfd8   :  { %v5636_v52 = vadd.f32 %v2782_v6, %v2725_v59 }
 0xfd9   :  { %v2784_v50 = vpop.permute.xlu2 %2783 }
 0xfda   :  { %v5638_v15 = vadd.f32 %v2784_v50, %v2726_v54  ;;  %4077 = vtanh.f32 %v5636_v52 }
 0xfdc   :  { %4079 = vtanh.f32 %v5638_v15 }
 0xfdf   :  { %v2792_v22 = vpop.permute.xlu1 %2791 }
 0xfe0   :  { %v4078_v35 = vpop.eup %4077  ;;  %v5646_v60 = vadd.f32 %v2792_v22, %v2730_v58 }
 0xfe1   :  { %v2788_v41 = vpop.permute.xlu2 %2787  ;;  %2829 = vrot.lane.b32.xlu0 %v4078_v35, %s4169_s0 }
 0xfe2   :  { %v4080_v27 = vpop.eup %4079  ;;  %v5649_v62 = vadd.f32 %v2788_v41, %v2728_v8  ;;  %4081 = vtanh.f32 %v5646_v60 }
 0xfe3   :  { %2831 = vrot.lane.b32.xlu1 %v4080_v27, %s4169_s0 }
 0xfe4   :  { %4083 = vtanh.f32 %v5649_v62 }
 0xfe8   :  { %v4082_v13 = vpop.eup %4081 }
 0xfe9   :  { %v2794_v28 = vpop.permute.xlu2 %2793  ;;  %2839 = vrot.lane.b32.xlu0 %v4082_v13, %s4169_s0 }
 0xfea   :  { %v4084_v31 = vpop.eup %4083  ;;  %v5657_v43 = vadd.f32 %v2794_v28, %v2731_v47 }
 0xfeb   :  { %2835 = vrot.lane.b32.xlu1 %v4084_v31, %s4169_s0 }
 0xfec   :  { %4085 = vtanh.f32 %v5657_v43 }
 0xff2   :  { %v4086_v9 = vpop.eup %4085  ;;  %v2786_v14 = vpop.permute.xlu0 %2785 }
 0xff3   :  { %v5663_v26 = vadd.f32 %v2786_v14, %v2727_v48  ;;  %2841 = vrot.lane.b32.xlu1 %v4086_v9, %s4169_s0 }
 0xff5   :  { %4087 = vtanh.f32 %v5663_v26 }
 0xffa   :  { %v2790_v1 = vpop.permute.xlu0 %2789 }
 0xffb   :  { %v4088_v24 = vpop.eup %4087  ;;  %v5669_v46 = vadd.f32 %v2790_v1, %v2729_v53  ;;  %v2861_v1 = vld [vmem:[#allocation2 + $0x7] sm:$0x1] }
 0xffc   :  { %2833 = vrot.lane.b32.xlu2 %v4088_v24, %s4169_s0 }
 0xffd   :  { %4089 = vtanh.f32 %v5669_v46 }
0x1002   :  { %v2796_v17 = vpop.permute.xlu0 %2795 }
0x1003   :  { %v4090_v21 = vpop.eup %4089  ;;  %v5675_v5 = vadd.f32 %v2796_v17, %v2732_v34  ;;  %v2862_v17 = vld [vmem:[#allocation2 + $0xf] sm:$0x1] }
0x1004   :  { %2837 = vrot.lane.b32.xlu2 %v4090_v21, %s4169_s0  ;;  %v2863_v21 = vld [vmem:[#allocation2 + $0x17] sm:$0x1] }
0x1005   :  { %4091 = vtanh.f32 %v5675_v5 }
0x100b   :  { %v4092_v29 = vpop.eup %4091 }
0x100c   :  { %2843 = vrot.lane.b32.xlu2 %v4092_v29, %s4169_s0 }
0x1053   :  { %v2830_v61 = vpop.permute.xlu0 %2829 }
0x1054   :  { %v2853_v32 = vmul.f32 %v2830_v61, %v5528_v39 }
0x1055   :  { %v2832_v40 = vpop.permute.xlu1 %2831 }
0x1056   :  { %v2834_v38 = vpop.permute.xlu2 %2833  ;;  %v2854_v20 = vmul.f32 %v2832_v40, %v5580_v0  ;;  %v2869_v16 = vpack.c.bf16 %v2853_v32, %v2853_v32  ;;  %v2864_v32 = vld [vmem:[#allocation2 + $0x1f] sm:$0x1] }
0x1057   :  { %v2855_v4 = vmul.f32 %v2834_v38, %v5584_v2 }
0x1058   :  { %v2870_v18 = vpack.c.bf16 %v2854_v20, %v2854_v20  ;;  %v2885_v37 = vunpack.c.l.b16 %v2869_v16 }
0x1059   :  { %v2871_v10 = vpack.c.bf16 %v2855_v4, %v2855_v4 }
0x105a   :  { %v2886_v36 = vunpack.c.l.b16 %v2870_v18  ;;  %v2866_v18 = vld [vmem:[#allocation2 + $0x2f] sm:$0x1] }
0x105b   :  { %v2840_v51 = vpop.permute.xlu0 %2839  ;;  %v2887_v49 = vunpack.c.l.b16 %v2871_v10 }
0x105c   :  { %v2893_v63 = vrot.slane %v2886_v36, 7  ;;  %v2858_v19 = vmul.f32 %v2840_v51, %v5540_v3 }
0x105d   :  { %v2836_v57 = vpop.permute.xlu1 %2835  ;;  %v2895_v42 = vrot.slane %v2887_v49, 6 }
0x105e   :  { %v2838_v30 = vpop.permute.xlu2 %2837  ;;  %v2856_v33 = vmul.f32 %v2836_v57, %v5604_v25  ;;  %v2894_v39 = vsel %vm577_vm6, %v2893_v63, %v2885_v37  ;;  %v2874_v56 = vpack.c.bf16 %v2858_v19, %v2858_v19  ;;  %v2867_v19 = vld [vmem:[#allocation2 + $0x37] sm:$0x1] }
0x105f   :  { %v2857_v11 = vmul.f32 %v2838_v30, %v5606_v23  ;;  %v2896_v50 = vsel %vm580_vm7, %v2895_v42, %v2894_v39 }
0x1060   :  { %v2872_v0 = vpack.c.bf16 %v2856_v33, %v2856_v33  ;;  %v2890_v3 = vunpack.c.l.b16 %v2874_v56 }
0x1061   :  { %v2873_v2 = vpack.c.bf16 %v2857_v11, %v2857_v11  ;;  %v2868_v11 = vld [vmem:[#allocation2 + $0x3f] sm:$0x1] }
0x1062   :  { %v2888_v44 = vunpack.c.l.b16 %v2872_v0  ;;  %v2901_v47 = vrot.slane %v2890_v3, 3 }
0x1063   :  { %v2889_v7 = vunpack.c.l.b16 %v2873_v2 }
0x1064   :  { %v2897_v59 = vrot.slane %v2888_v44, 5 }
0x1065   :  { %v2842_v6 = vpop.permute.xlu1 %2841  ;;  %v2899_v54 = vrot.slane %v2889_v7, 4 }
0x1066   :  { %v2844_v25 = vpop.permute.xlu2 %2843  ;;  %v2859_v58 = vmul.f32 %v2842_v6, %v5624_v45  ;;  %v2898_v23 = vsel %vm583_vm8, %v2897_v59, %v2896_v50 }
0x1067   :  { %v2860_v22 = vmul.f32 %v2844_v25, %v5626_v55  ;;  %v2900_v41 = vsel %vm586_vm9, %v2899_v54, %v2898_v23 }
0x1068   :  { %v2875_v8 = vpack.c.bf16 %v2859_v58, %v2859_v58  ;;  %v2902_v48 = vsel %vm589_vm10, %v2901_v47, %v2900_v41 }
0x1069   :  { %v2876_v35 = vpack.c.bf16 %v2860_v22, %v2860_v22 }
0x106a   :  { %v2891_v27 = vunpack.c.l.b16 %v2875_v8 }
0x106b   :  { %v2892_v13 = vunpack.c.l.b16 %v2876_v35 }
0x106c   :  { %v2903_v28 = vrot.slane %v2891_v27, 2 }
0x106d   :  { %v2905_v31 = vrot.slane %v2892_v13, 1 }
0x106e   :  { %v2904_v9 = vsel %vm592_vm11, %v2903_v28, %v2902_v48 }
0x106f   :  { %v2906_v45 = vsel %vm595_vm12, %v2905_v31, %v2904_v9 }
0x1070   :  { %v2907_v14 = vpack.c.b16 %v2906_v45, %v2906_v45 }
0x1072   :  { %2908 = vrot.lane.b32.xlu0 %v2907_v14, %s4170_s5 }
0x10e4   :  { %v2909_v53 = vpop.permute.xlu0 %2908 }
0x10e5   :  { %3580 = vmatmul.msk.bf16.vlgmr.msra.gmra.mxu3 %vm207_vm13, %v2909_v53 }
0x10f5   :  { %3607 = vmatmul.msk.bf16.vlgmr.msrb.gmra.mxu3 %vm5963_vm3, %v4283_v12  ;;  %v2865_v12 = vld [vmem:[#allocation2 + $0x27] sm:$0x1] }
0x1168   :  { %v2922_v55 = vpop.f32.mrf.mxu3 }
0x1169   :  { %v2927_v24 = vrot.slane %v2922_v55, 1  ;;  %v2928_v34 = vrot.slane %v2922_v55, 2  ;;  %v2942_v29 = vadd.f32 %v2922_v55, %v2861_v1  ;;  %v2931_v38 = vrot.slane %v2922_v55, 5 }
0x116a   :  { %v2929_v20 = vrot.slane %v2922_v55, 3  ;;  %v2930_v4 = vrot.slane %v2922_v55, 4  ;;  %v2932_v33 = vrot.slane %v2922_v55, 6  ;;  %v2933_v63 = vrot.slane %v2922_v55, 7 }
0x116b   :  { %v2943_v61 = vadd.f32 %v2927_v24, %v2862_v17  ;;  %v2944_v40 = vadd.f32 %v2928_v34, %v2863_v21  ;;  %4093 = vtanh.f32 %v2942_v29  ;;  %v2947_v10 = vadd.f32 %v2931_v38, %v2866_v18 }
0x116c   :  { %v2945_v51 = vadd.f32 %v2929_v20, %v2864_v32  ;;  %v2946_v57 = vadd.f32 %v2930_v4, %v2865_v12  ;;  %v2948_v0 = vadd.f32 %v2932_v33, %v2867_v19  ;;  %v2949_v2 = vadd.f32 %v2933_v63, %v2868_v11 }
0x116d   :  { %4095 = vtanh.f32 %v2943_v61  ;;  %v3583_v7 = vmul.f32 -1.442695, %v2944_v40  ;;  %v3581_v3 = vmul.f32 -1.442695, %v2942_v29  ;;  %v3582_v22 = vmul.f32 -1.442695, %v2943_v61 }
0x116e   :  { %4097 = vtanh.f32 %v2944_v40  ;;  %v3585_v59 = vmul.f32 -1.442695, %v2946_v57  ;;  %v3588_v50 = vmul.f32 -1.442695, %v2949_v2  ;;  %v3586_v47 = vmul.f32 -1.442695, %v2947_v10 }
0x116f   :  { %4099 = vtanh.f32 %v2947_v10  ;;  %v3584_v28 = vmul.f32 -1.442695, %v2945_v51  ;;  %v3587_v17 = vmul.f32 -1.442695, %v2948_v0 }
0x1170   :  { %v2924_v36 = vpop.f32.mrf.mxu3  ;;  %4101 = vtanh.f32 %v2945_v51 }
0x1171   :  { %v4094_v16 = vpop.eup %4093  ;;  %4103 = vtanh.f32 %v2946_v57 }
0x1172   :  { %3126 = vrot.lane.b32.xlu0 %v4094_v16, %s4169_s0  ;;  %4105 = vtanh.f32 %v2948_v0 }
0x1173   :  { %v4096_v49 = vpop.eup %4095  ;;  %4107 = vtanh.f32 %v2949_v2 }
0x1174   :  { %v4098_v30 = vpop.eup %4097  ;;  %3128 = vrot.lane.b32.xlu1 %v4096_v49, %s4169_s0  ;;  %4109 = vpow2.f32 %v3583_v7 }
0x1175   :  { %3130 = vrot.lane.b32.xlu2 %v4098_v30, %s4169_s0  ;;  %v4100_v37 = vpop.eup %4099  ;;  %4111 = vpow2.f32 %v3585_v59 }
0x1176   :  { %v4102_v42 = vpop.eup %4101 }
0x1177   :  { %v4104_v44 = vpop.eup %4103 }
0x1178   :  { %v4106_v39 = vpop.eup %4105 }
0x1179   :  { %v4108_v56 = vpop.eup %4107 }
0x117a   :  { %3136 = vrot.lane.b32.xlu0 %v4100_v37, %s4169_s0  ;;  %v4110_v6 = vpop.eup %4109 }
0x117b   :  { %v2976_v54 = vadd.f32 1.0, %v4110_v6  ;;  %v4112_v25 = vpop.eup %4111 }
0x117c   :  { %3132 = vrot.lane.b32.xlu1 %v4102_v42, %s4169_s0  ;;  %v5707_v58 = vadd.f32 1.0, %v4112_v25 }
0x117d   :  { %3134 = vrot.lane.b32.xlu2 %v4104_v44, %s4169_s0  ;;  %4113 = vrcp.f32 %v2976_v54  ;;  %v3023_v34 = vand.u32 2147483648, %v2976_v54  ;;  %vm3017_vm4 = vweird.f32 %v2976_v54  ;;  %v3021_v29 = vand.u32 2147483647, %v2976_v54 }
0x117e   :  { %4115 = vpow2.f32 %v3588_v50  ;;  %v3053_v30 = vand.u32 2147483648, %v5707_v58  ;;  %vm3047_vm1 = vweird.f32 %v5707_v58  ;;  %v3051_v33 = vand.u32 2147483647, %v5707_v58 }
0x117f   :  { %4117 = vrcp.f32 %v5707_v58  ;;  %v3024_v4 = vor.u32 1.1754944e-38, %v3023_v34  ;;  %vm3022_vm14 = vcmp.eq.f32.partialorder %v3021_v29, 8.507059e+37 }
0x1180   :  { %4119 = vpow2.f32 %v3581_v3  ;;  %v3054_v2 = vor.u32 1.1754944e-38, %v3053_v30  ;;  %vm3052_vm3 = vcmp.eq.f32.partialorder %v3051_v33, 8.507059e+37 }
0x1181   :  { %4121 = vpow2.f32 %v3582_v22 }
0x1183   :  { %v4114_v23 = vpop.eup %4113 }
0x1184   :  { %3138 = vrot.lane.b32.xlu1 %v4106_v39, %s4169_s0  ;;  %v4116_v8 = vpop.eup %4115  ;;  %v3013_v35 = vmul.f32 %v4114_v23, %v2976_v54  ;;  %vm3018_vm2 = vweird.f32 %v4114_v23 }
0x1185   :  { %3140 = vrot.lane.b32.xlu2 %v4108_v56, %s4169_s0  ;;  %v5710_v41 = vadd.f32 1.0, %v4116_v8  ;;  %v4118_v13 = vpop.eup %4117  ;;  %vm3019_vm5 = vmor %vm3017_vm4, %vm3018_vm2 }
0x1186   :  { %v3014_v27 = vsub.f32 1.0, %v3013_v35  ;;  %v4120_v31 = vpop.eup %4119  ;;  %v3043_v45 = vmul.f32 %v4118_v13, %v5707_v58  ;;  %vm3048_vm15 = vweird.f32 %v4118_v13 }
0x1187   :  { %v4122_v48 = vpop.eup %4121  ;;  %4123 = vrcp.f32 %v5710_v41  ;;  %v5714_v14 = vadd.f32 1.0, %v4120_v31  ;;  %vm3049_vm0 = vmor %vm3047_vm1, %vm3048_vm15  ;;  %vm3092_vm4 = vweird.f32 %v5710_v41  ;;  %v3098_v25 = vand.u32 2147483648, %v5710_v41 }
0x1188   :  { %v3015_v9 = vmul.f32 %v4114_v23, %v3014_v27  ;;  %4125 = vpow2.f32 %v3586_v47  ;;  %v5716_v53 = vadd.f32 1.0, %v4122_v48  ;;  %v3044_v1 = vsub.f32 1.0, %v3043_v45 }
0x1189   :  { %4127 = vpow2.f32 %v3584_v28  ;;  %v3096_v58 = vand.u32 2147483647, %v5710_v41  ;;  %v3099_v27 = vor.u32 1.1754944e-38, %v3098_v25  ;;  %v2993_v47 = vand.u32 2147483648, %v5714_v14 }
0x118a   :  { %v3016_v55 = vadd.f32 %v4114_v23, %v3015_v9  ;;  %4129 = vrcp.f32 %v5714_v14  ;;  %v3045_v38 = vmul.f32 %v4118_v13, %v3044_v1  ;;  %v2991_v1 = vand.u32 2147483647, %v5714_v14 }
0x118b   :  { %4131 = vrcp.f32 %v5716_v53  ;;  %v3006_v34 = vand.u32 2147483647, %v5716_v53  ;;  %v2994_v29 = vor.u32 1.1754944e-38, %v2993_v47 }
0x118c   :  { %v3020_v40 = vsel %vm3019_vm5, %v4114_v23, %v3016_v55  ;;  %4133 = vpow2.f32 %v3587_v17  ;;  %v3046_v57 = vadd.f32 %v4118_v13, %v3045_v38 }
0x118d   :  { %v5718_v24 = vpop.eup %4123  ;;  %v5730_v12 = vsel %vm3022_vm14, %v3024_v4, %v3020_v40  ;;  %vm3097_vm14 = vcmp.eq.f32.partialorder %v3096_v58, 8.507059e+37 }
0x118e   :  { %v4126_v21 = vpop.eup %4125  ;;  %v3088_v20 = vmul.f32 %v5718_v24, %v5710_v41  ;;  %v3050_v0 = vsel %vm3049_vm0, %v4118_v13, %v3046_v57  ;;  %vm3093_vm2 = vweird.f32 %v5718_v24  ;;  %vm2987_vm0 = vweird.f32 %v5714_v14 }
0x118f   :  { %v4128_v61 = vpop.eup %4127  ;;  %v5724_v18 = vadd.f32 1.0, %v4126_v21  ;;  %v5750_v56 = vsel %vm3052_vm3, %v3054_v2, %v3050_v0  ;;  %vm3094_vm5 = vmor %vm3092_vm4, %vm3093_vm2  ;;  %vm3002_vm2 = vweird.f32 %v5716_v53 }
0x1190   :  { %v5726_v32 = vadd.f32 1.0, %v4128_v61  ;;  %v5728_v10 = vpop.eup %4129  ;;  %v3089_v49 = vsub.f32 1.0, %v3088_v20 }
0x1191   :  { %v5732_v51 = vpop.eup %4131  ;;  %4135 = vrcp.f32 %v5724_v18  ;;  %v2983_v63 = vmul.f32 %v5728_v10, %v5714_v14  ;;  %vm2988_vm15 = vweird.f32 %v5728_v10  ;;  %v3066_v33 = vand.u32 2147483647, %v5724_v18 }
0x1192   :  { %4137 = vrcp.f32 %v5726_v32  ;;  %v4134_v19 = vpop.eup %4133  ;;  %v2998_v11 = vmul.f32 %v5732_v51, %v5716_v53  ;;  %v3090_v37 = vmul.f32 %v5718_v24, %v3089_v49  ;;  %vm3003_vm1 = vweird.f32 %v5732_v51  ;;  %vm2989_vm3 = vmor %vm2987_vm0, %vm2988_vm15 }
0x1193   :  { %v2984_v42 = vsub.f32 1.0, %v2983_v63  ;;  %v5746_v44 = vadd.f32 1.0, %v4134_v19  ;;  %vm3004_vm4 = vmor %vm3002_vm2, %vm3003_vm1  ;;  %vm3062_vm0 = vweird.f32 %v5724_v18  ;;  %v3038_v63 = vand.u32 2147483648, %v5726_v32 }
0x1194   :  { %v2999_v59 = vsub.f32 1.0, %v2998_v11  ;;  %v3091_v50 = vadd.f32 %v5718_v24, %v3090_v37  ;;  %vm3032_vm2 = vweird.f32 %v5726_v32  ;;  %v3036_v19 = vand.u32 2147483647, %v5726_v32 }
0x1195   :  { %v2985_v3 = vmul.f32 %v5728_v10, %v2984_v42  ;;  %4139 = vrcp.f32 %v5746_v44  ;;  %v3039_v42 = vor.u32 1.1754944e-38, %v3038_v63  ;;  %v3081_v25 = vand.u32 2147483647, %v5746_v44 }
0x1196   :  { %v3000_v22 = vmul.f32 %v5732_v51, %v2999_v59  ;;  %v3095_v35 = vsel %vm3094_vm5, %v5718_v24, %v3091_v50  ;;  %v3008_v24 = vand.u32 2147483648, %v5716_v53  ;;  %vm2992_vm5 = vcmp.eq.f32.partialorder %v2991_v1, 8.507059e+37 }
0x1197   :  { %v5748_v39 = vpop.eup %4135  ;;  %v2986_v41 = vadd.f32 %v5728_v10, %v2985_v3  ;;  %v5772_v28 = vsel %vm3097_vm14, %v3099_v27, %v3095_v35  ;;  %vm3007_vm14 = vcmp.eq.f32.partialorder %v3006_v34, 8.507059e+37  ;;  %v3068_v53 = vand.u32 2147483648, %v5724_v18 }
0x1198   :  { %v5752_v6 = vpop.eup %4137  ;;  %v3058_v23 = vmul.f32 %v5748_v39, %v5724_v18  ;;  %v3001_v48 = vadd.f32 %v5732_v51, %v3000_v22  ;;  %v3009_v38 = vor.u32 1.1754944e-38, %v3008_v24  ;;  %vm3063_vm15 = vweird.f32 %v5748_v39 }
0x1199   :  { %v3028_v8 = vmul.f32 %v5752_v6, %v5726_v32  ;;  %v2990_v17 = vsel %vm2989_vm3, %v5728_v10, %v2986_v41  ;;  %vm3033_vm1 = vweird.f32 %v5752_v6  ;;  %vm3064_vm3 = vmor %vm3062_vm0, %vm3063_vm15  ;;  %v3069_v0 = vor.u32 1.1754944e-38, %v3068_v53 }
0x119a   :  { %v3059_v13 = vsub.f32 1.0, %v3058_v23  ;;  %v3005_v61 = vsel %vm3004_vm4, %v5732_v51, %v3001_v48  ;;  %v5791_v4 = vsel %vm2992_vm5, %v2994_v29, %v2990_v17  ;;  %vm3034_vm4 = vmor %vm3032_vm2, %vm3033_vm1  ;;  %vm3067_vm5 = vcmp.eq.f32.partialorder %v3066_v33, 8.507059e+37 }
0x119b   :  { %v3029_v9 = vsub.f32 1.0, %v3028_v8  ;;  %v5776_v45 = vpop.eup %4139  ;;  %vm3077_vm1 = vweird.f32 %v5746_v44  ;;  %v3110_v35 = vmul.f32 %v5791_v4, %v5636_v52  ;;  %v3117_v34 = vmul.f32 %v5772_v28, %v5675_v5 }
0x119c   :  { %v3060_v21 = vmul.f32 %v5748_v39, %v3059_v13  ;;  %v3073_v14 = vmul.f32 %v5776_v45, %v5746_v44  ;;  %vm3078_vm15 = vweird.f32 %v5776_v45  ;;  %vm3499_vm2 = vcmask 425344  }
0x119d   :  { %v3030_v40 = vmul.f32 %v5752_v6, %v3029_v9  ;;  %vm3079_vm0 = vmor %vm3077_vm1, %vm3078_vm15 }
0x119e   :  { %v3061_v51 = vadd.f32 %v5748_v39, %v3060_v21  ;;  %v3074_v30 = vsub.f32 1.0, %v3073_v14 }
0x119f   :  { %v3031_v49 = vadd.f32 %v5752_v6, %v3030_v40 }
0x11a0   :  { %v3065_v11 = vsel %vm3064_vm3, %v5748_v39, %v3061_v51  ;;  %v3075_v2 = vmul.f32 %v5776_v45, %v3074_v30  ;;  %vm3082_vm3 = vcmp.eq.f32.partialorder %v3081_v25, 8.507059e+37  ;;  %v3625_v30 = vld [vmem:[%s5937_s7] sm:$0xff] }
0x11a1   :  { %v3035_v37 = vsel %vm3034_vm4, %v5752_v6, %v3031_v49  ;;  %v3083_v6 = vand.u32 2147483648, %v5746_v44  ;;  %v3112_v44 = vmul.f32 %v5730_v12, %v5663_v26 }
0x11a2   :  { %v3076_v39 = vadd.f32 %v5776_v45, %v3075_v2 }
0x11a3   :  { %v3084_v3 = vor.u32 1.1754944e-38, %v3083_v6 }
0x11a4   :  { %v3080_v58 = vsel %vm3079_vm0, %v5776_v45, %v3076_v39 }
0x11a5   :  { %v5826_v23 = vsel %vm3082_vm3, %v3084_v3, %v3080_v58 }
0x11a6   :  { %v3116_v53 = vmul.f32 %v5826_v23, %v5657_v43  ;;  %v3627_v43 = vld [vmem:[%s5936_s9] sm:$0xff] }
0x11cf   :  { %v3131_v36 = vpop.permute.xlu2 %3130 }
0x11d0   :  { %v3152_v16 = vmul.f32 %v3131_v36, %v5730_v12 }
0x11d2   :  { %3170 = vrot.lane.b32.xlu1 %v3152_v16, %s4170_s5  ;;  %v5795_v16 = vsel %vm3007_vm14, %v3009_v38, %v3005_v61  ;;  %vm3037_vm14 = vcmp.eq.f32.partialorder %v3036_v19, 8.507059e+37 }
0x11d7   :  { %v3135_v7 = vpop.permute.xlu2 %3134 }
0x11d8   :  { %v3154_v54 = vmul.f32 %v3135_v7, %v5750_v56  ;;  %v5812_v7 = vsel %vm3067_vm5, %v3069_v0, %v3065_v11 }
0x11da   :  { %3174 = vrot.lane.b32.xlu1 %v3154_v54, %s4170_s5  ;;  %v5815_v54 = vsel %vm3037_vm14, %v3039_v42, %v3035_v37 }
0x11db   :  { %v3113_v5 = vmul.f32 %v5815_v54, %v5649_v62  ;;  %v3628_v62 = vld [vmem:[%s5936_s9 + $0x8] sm:$0xff] }
0x11dc   :  { %3349 = vmatpush.bf16.msrb.mxu2 %v3628_v62 }
0x11df   :  { %v3141_v31 = vpop.permute.xlu2 %3140 }
0x11e0   :  { %v3157_v55 = vmul.f32 %v3141_v31, %v5772_v28  ;;  %v3115_v31 = vmul.f32 %v5812_v7, %v5646_v60  ;;  %3350 = vmatpush.bf16.msrb.mxu2 %v3627_v43 }
0x11e2   :  { %3180 = vrot.lane.b32.xlu1 %v3157_v55, %s4170_s5  ;;  %v3114_v55 = vmul.f32 %v5750_v56, %v5669_v46  ;;  %v3111_v46 = vmul.f32 %v5795_v16, %v5638_v15 }
0x11e4   :  { %v3127_v20 = vpop.permute.xlu0 %3126 }
0x11e5   :  { %v3150_v10 = vmul.f32 %v3127_v20, %v5791_v4 }
0x11e6   :  { %v3129_v36 = vpop.permute.xlu1 %3128 }
0x11e7   :  { %v3151_v57 = vmul.f32 %v3129_v36, %v5795_v16  ;;  %3166 = vrot.lane.b32.xlu2 %v3150_v10, %s4170_s5 }
0x11e9   :  { %3168 = vrot.lane.b32.xlu0 %v3151_v57, %s4170_s5  ;;  %v3626_v57 = vld [vmem:[%s5937_s7 + $0x8] sm:$0xff] }
0x11ea   :  { %3316 = vmatpush.bf16.msrb.mxu0 %v3626_v57 }
0x11ec   :  { %v3137_v18 = vpop.permute.xlu0 %3136 }
0x11ed   :  { %v3155_v59 = vmul.f32 %v3137_v18, %v5812_v7 }
0x11ee   :  { %v3133_v50 = vpop.permute.xlu1 %3132  ;;  %3317 = vmatpush.bf16.msrb.mxu0 %v3625_v30 }
0x11ef   :  { %v3153_v32 = vmul.f32 %v3133_v50, %v5815_v54  ;;  %3176 = vrot.lane.b32.xlu2 %v3155_v59, %s4170_s5 }
0x11f1   :  { %3172 = vrot.lane.b32.xlu0 %v3153_v32, %s4170_s5 }
0x11f6   :  { %v3139_v22 = vpop.permute.xlu1 %3138 }
0x11f7   :  { %v3156_v8 = vmul.f32 %v3139_v22, %v5826_v23 }
0x11f9   :  { %3178 = vrot.lane.b32.xlu0 %v3156_v8, %s4170_s5 }
0x1241   :  { %v3167_v27 = vpop.permute.xlu2 %3166 }
0x1242   :  { %v3190_v47 = vadd.f32 %v3167_v27, %v3110_v35 }
0x1244   :  { %v3171_v41 = vpop.permute.xlu1 %3170  ;;  %4141 = vtanh.f32 %v3190_v47 }
0x1245   :  { %v3192_v13 = vadd.f32 %v3171_v41, %v3112_v44 }
0x1247   :  { %4143 = vtanh.f32 %v3192_v13 }
0x1249   :  { %v3177_v48 = vpop.permute.xlu2 %3176 }
0x124a   :  { %v4142_v9 = vpop.eup %4141  ;;  %v3195_v45 = vadd.f32 %v3177_v48, %v3115_v31 }
0x124b   :  { %3214 = vrot.lane.b32.xlu1 %v4142_v9, %s4169_s0 }
0x124c   :  { %v3175_v52 = vpop.permute.xlu1 %3174  ;;  %4145 = vtanh.f32 %v3195_v45 }
0x124d   :  { %v4144_v1 = vpop.eup %4143  ;;  %v3194_v24 = vadd.f32 %v3175_v52, %v3114_v55 }
0x124e   :  { %3218 = vrot.lane.b32.xlu0 %v4144_v1, %s4169_s0 }
0x124f   :  { %4147 = vtanh.f32 %v3194_v24 }
0x1252   :  { %v4146_v26 = vpop.eup %4145 }
0x1253   :  { %3224 = vrot.lane.b32.xlu1 %v4146_v26, %s4169_s0 }
0x1254   :  { %v3181_v60 = vpop.permute.xlu1 %3180 }
0x1255   :  { %v4148_v17 = vpop.eup %4147  ;;  %v3197_v21 = vadd.f32 %v3181_v60, %v3117_v34 }
0x1256   :  { %3222 = vrot.lane.b32.xlu0 %v4148_v17, %s4169_s0 }
0x1257   :  { %4149 = vtanh.f32 %v3197_v21 }
0x125b   :  { %v3169_v29 = vpop.permute.xlu0 %3168 }
0x125c   :  { %v3191_v61 = vadd.f32 %v3169_v29, %v3111_v46 }
0x125d   :  { %v4150_v40 = vpop.eup %4149 }
0x125e   :  { %4151 = vtanh.f32 %v3191_v61  ;;  %3228 = vrot.lane.b32.xlu0 %v4150_v40, %s4169_s0  ;;  %v3378_v61 = vpop.f32.mrf.mxu3  ;;  %v3641_v40 = vld [vmem:[%s5938_s8] ss:$0 sm:$0xff] }
0x1263   :  { %v3173_v14 = vpop.permute.xlu0 %3172 }
0x1264   :  { %v4152_v38 = vpop.eup %4151  ;;  %v3193_v20 = vadd.f32 %v3173_v14, %v3113_v5  ;;  %v4171_v5 = vmov 0.0  }
0x1265   :  { %3216 = vrot.lane.b32.xlu2 %v4152_v38, %s4169_s0  ;;  %3481 = vst [vmem:[%s5942_s16] sm:$0xff] %v4171_v5 }
0x1266   :  { %4153 = vtanh.f32 %v3193_v20  ;;  %v3380_v20 = vpop.f32.mrf.mxu3 }
0x126b   :  { %v3179_v10 = vpop.permute.xlu0 %3178 }
0x126c   :  { %v4154_v15 = vpop.eup %4153  ;;  %v3196_v36 = vadd.f32 %v3179_v10, %v3116_v53  ;;  %v3642_v53 = vld [vmem:[%s5939_s10] ss:$0 sm:$0xff] }
0x126d   :  { %3220 = vrot.lane.b32.xlu2 %v4154_v15, %s4169_s0 }
0x126e   :  { %4155 = vtanh.f32 %v3196_v36 }
0x1274   :  { %v4156_v51 = vpop.eup %4155 }
0x1275   :  { %3226 = vrot.lane.b32.xlu2 %v4156_v51, %s4169_s0 }
0x12bd   :  { %v3215_v49 = vpop.permute.xlu1 %3214 }
0x12be   :  { %v3238_v37 = vmul.f32 %v3215_v49, %v5791_v4  ;;  %v3356_v49 = vld [vmem:[%s5943_s2] sm:$0xff] }
0x12bf   :  { %v3217_v33 = vpop.permute.xlu2 %3216 }
0x12c0   :  { %v3219_v63 = vpop.permute.xlu0 %3218  ;;  %v3239_v19 = vmul.f32 %v3217_v33, %v5795_v16  ;;  %v3246_v59 = vpack.c.bf16 %v3238_v37, %v3238_v37 }
0x12c1   :  { %v3240_v11 = vmul.f32 %v3219_v63, %v5730_v12 }
0x12c2   :  { %v3247_v0 = vpack.c.bf16 %v3239_v19, %v3239_v19  ;;  %v3270_v3 = vunpack.c.l.b16 %v3246_v59  ;;  %v3643_v19 = vld [vmem:[%s5940_s13] ss:$0 sm:$0xff] }
0x12c3   :  { %v3248_v2 = vpack.c.bf16 %v3240_v11, %v3240_v11 }
0x12c4   :  { %v3271_v42 = vunpack.c.l.b16 %v3247_v0 }
0x12c5   :  { %v3225_v18 = vpop.permute.xlu1 %3224  ;;  %v3272_v32 = vunpack.c.l.b16 %v3248_v2 }
0x12c6   :  { %v3278_v25 = vrot.slane %v3271_v42, 7  ;;  %v3243_v58 = vmul.f32 %v3225_v18, %v5812_v7 }
0x12c7   :  { %v3221_v50 = vpop.permute.xlu2 %3220  ;;  %v3280_v8 = vrot.slane %v3272_v32, 6 }
0x12c8   :  { %v3223_v39 = vpop.permute.xlu0 %3222  ;;  %v3241_v6 = vmul.f32 %v3221_v50, %v5815_v54  ;;  %v3279_v4 = vsel %vm577_vm6, %v3278_v25, %v3270_v3  ;;  %v3251_v27 = vpack.c.bf16 %v3243_v58, %v3243_v58  ;;  %vm3388_vm6 = vcmask 130048  }
0x12c9   :  { %v3242_v16 = vmul.f32 %v3223_v39, %v5750_v56  ;;  %v3281_v31 = vsel %vm580_vm7, %v3280_v8, %v3279_v4 }
0x12ca   :  { %v3249_v12 = vpack.c.bf16 %v3241_v6, %v3241_v6  ;;  %v3275_v7 = vunpack.c.l.b16 %v3251_v27 }
0x12cb   :  { %v3250_v22 = vpack.c.bf16 %v3242_v16, %v3242_v16 }
0x12cc   :  { %v3273_v35 = vunpack.c.l.b16 %v3249_v12  ;;  %v3286_v24 = vrot.slane %v3275_v7, 3 }
0x12cd   :  { %v3274_v47 = vunpack.c.l.b16 %v3250_v22 }
0x12ce   :  { %v3282_v44 = vrot.slane %v3273_v35, 5 }
0x12cf   :  { %v3227_v41 = vpop.permute.xlu2 %3226  ;;  %v3284_v13 = vrot.slane %v3274_v47, 4 }
0x12d0   :  { %v3229_v54 = vpop.permute.xlu0 %3228  ;;  %v3244_v48 = vmul.f32 %v3227_v41, %v5826_v23  ;;  %v3283_v56 = vsel %vm583_vm8, %v3282_v44, %v3281_v31  ;;  %v3631_v44 = vld [vmem:[%s5944_s14 + $0x8] sm:$0xff]  ;;  %v3630_v41 = vld [vmem:[%s5944_s14] sm:$0xff]  ;;  %s4174_s14 = smov 48  }
0x12d1   :  { %v3245_v9 = vmul.f32 %v3229_v54, %v5772_v28  ;;  %v3285_v52 = vsel %vm586_vm9, %v3284_v13, %v3283_v56  ;;  %v3629_v28 = vld [vmem:[%s5941_s11] sm:$0xff]  ;;  %3474 = vmatpush.bf16.msrb.mxu1 %v3631_v44 }
0x12d2   :  { %v3252_v45 = vpack.c.bf16 %v3244_v48, %v3244_v48  ;;  %v3287_v17 = vsel %vm589_vm10, %v3286_v24, %v3285_v52  ;;  %3399 = vmatpush.bf16.msra.mxu0 %v3629_v28  ;;  %v3644_v56 = vld [vmem:[%s5945_s15] ss:$0 sm:$0xff] }
0x12d3   :  { %v3253_v55 = vpack.c.bf16 %v3245_v9, %v3245_v9 }
0x12d4   :  { %v3276_v1 = vunpack.c.l.b16 %v3252_v45 }
0x12d5   :  { %v3277_v26 = vunpack.c.l.b16 %v3253_v55  ;;  %3475 = vmatpush.bf16.msrb.mxu1 %v3630_v41 }
0x12d6   :  { %v3288_v34 = vrot.slane %v3276_v1, 2 }
0x12d7   :  { %v3290_v60 = vrot.slane %v3277_v26, 1 }
0x12d8   :  { %v3289_v21 = vsel %vm592_vm11, %v3288_v34, %v3287_v17  ;;  %vm3487_vm11 = vcmask 261248  }
0x12d9   :  { %v3291_v23 = vsel %vm595_vm12, %v3290_v60, %v3289_v21  ;;  %vm3493_vm12 = vcmask 392448  }
0x12da   :  { %v3292_v46 = vpack.c.b16 %v3291_v23, %v3291_v23 }
0x12dc   :  { %3293 = vrot.lane.b32.xlu1 %v3292_v46, %s4170_s5 }
0x134e   :  { %v3294_v29 = vpop.permute.xlu1 %3293 }
0x134f   :  { %3597 = vmatmul.msk.bf16.vlgmr.msrb.gmra.mxu0 %vm207_vm13, %v3294_v29  ;;  %3606 = vmatmul.msk.bf16.vlgmr.msrb.gmra.mxu2 %vm207_vm13, %v3294_v29 }
0x13cc   :  { %v3319_v14 = vpop.f32.mrf.mxu0 }
0x13cd   :  { %v3320_v38 = vadd.f32 %v3641_v40, %v3319_v14 }
0x13cf   :  { %3482 = vst.msk [vmem:[%s5942_s16] sm:$0xff] %vm3388_vm6, %v3320_v38 }
0x13d2   :  { %v3352_v10 = vpop.f32.mrf.mxu2 }
0x13d3   :  { %v3353_v15 = vadd.f32 %v3642_v53, %v3352_v10 }
0x13d4   :  { %v3321_v36 = vpop.f32.mrf.mxu0 }
0x13d5   :  { %v3357_v51 = vmul.f32 0.5, %v3353_v15 }
0x13d7   :  { %v3358_v62 = vmul.f32 1.442695, %v3357_v51 }
0x13d9   :  { %4157 = vpow2.f32 %v3358_v62 }
0x13da   :  { %v3354_v57 = vpop.f32.mrf.mxu2 }
0x13df   :  { %v4158_v43 = vpop.eup %4157 }
0x13e0   :  { %v3360_v30 = vmul.f32 %v4158_v43, %v3356_v49 }
0x13e2   :  { %v3361_v33 = vadd.f32 %v3360_v30, %v3320_v38 }
0x13e4   :  { %v3362_v63 = vpack.c.bf16 %v3361_v33, %v3361_v33 }
0x13e6   :  { %3612 = vmatmul.msk.bf16.vlgmr.msra.gmra.mxu0 %vm3388_vm6, %v3362_v63 }
0x1463   :  { %v3401_v11 = vpop.f32.mrf.mxu0 }
0x1464   :  { %v3402_v0 = vadd.f32 %v3401_v11, %v3378_v61 }
0x1466   :  { %v3409_v37 = vadd.f32 %v3643_v19, %v3402_v0 }
0x1468   :  { %4159 = vtanh.f32 %v3409_v37  ;;  %v3613_v18 = vmul.f32 -1.442695, %v3409_v37 }
0x146a   :  { %4161 = vpow2.f32 %v3613_v18 }
0x146b   :  { %v3403_v2 = vpop.f32.mrf.mxu0 }
0x146e   :  { %v4160_v42 = vpop.eup %4159 }
0x146f   :  { %3431 = vrot.lane.b32.xlu2 %v4160_v42, %s4169_s0  ;;  %s4173_s0 = smov 96  }
0x1470   :  { %v4162_v59 = vpop.eup %4161 }
0x1471   :  { %v3413_v50 = vadd.f32 1.0, %v4162_v59 }
0x1473   :  { %4163 = vrcp.f32 %v3413_v50  ;;  %v3425_v16 = vand.u32 2147483648, %v3413_v50  ;;  %vm3419_vm8 = vweird.f32 %v3413_v50  ;;  %v3423_v12 = vand.u32 2147483647, %v3413_v50 }
0x1475   :  { %v3426_v22 = vor.u32 1.1754944e-38, %v3425_v16  ;;  %vm3424_vm10 = vcmp.eq.f32.partialorder %v3423_v12, 8.507059e+37 }
0x1477   :  { %3484 = vrot.lane.b32.xlu2 %v3353_v15, %s4172_s4 }
0x1479   :  { %v4164_v32 = vpop.eup %4163 }
0x147a   :  { %v3415_v39 = vmul.f32 %v4164_v32, %v3413_v50  ;;  %vm3420_vm7 = vweird.f32 %v4164_v32 }
0x147b   :  { %vm3421_vm9 = vmor %vm3419_vm8, %vm3420_vm7 }
0x147c   :  { %v3416_v6 = vsub.f32 1.0, %v3415_v39 }
0x147e   :  { %v3417_v25 = vmul.f32 %v4164_v32, %v3416_v6 }
0x1480   :  { %v3418_v58 = vadd.f32 %v4164_v32, %v3417_v25 }
0x1482   :  { %v3422_v3 = vsel %vm3421_vm9, %v4164_v32, %v3418_v58 }
0x1483   :  { %v3427_v35 = vsel %vm3424_vm10, %v3426_v22, %v3422_v3 }
0x14c9   :  { %v3432_v8 = vpop.permute.xlu2 %3431 }
0x14ca   :  { %v3434_v4 = vmul.f32 %v3432_v8, %v3427_v35 }
0x14cc   :  { %4165 = vtanh.f32 %v3434_v4 }
0x14d1   :  { %v3485_v27 = vpop.permute.xlu2 %3484 }
0x14d2   :  { %v4166_v47 = vpop.eup %4165  ;;  %3488 = vst.msk [vmem:[%s5942_s16] sm:$0xff] %vm3487_vm11, %v3485_v27 }
0x14d3   :  { %3437 = vrot.lane.b32.xlu0 %v4166_v47, %s4173_s0 }
0x14db   :  { %3490 = vrot.lane.b32.xlu0 %v3361_v33, %s4170_s5 }
0x1545   :  { %v3438_v13 = vpop.permute.xlu0 %3437 }
0x1546   :  { %v3440_v31 = vmul.f32 %v3438_v13, %v3427_v35 }
0x1548   :  { %v3441_v54 = vpack.c.bf16 %v3440_v31, %v3440_v31 }
0x154a   :  { %3451 = vrot.lane.b32.xlu1 %v3441_v54, %s4170_s5 }
0x154d   :  { %v3491_v48 = vpop.permute.xlu0 %3490 }
0x154e   :  { %3494 = vst.msk [vmem:[%s5942_s16] sm:$0xff] %vm3493_vm12, %v3491_v48 }
0x15bc   :  { %v3452_v7 = vpop.permute.xlu1 %3451 }
0x15bd   :  { %3622 = vmatmul.msk.bf16.vlgmr.msrb.gmra.mxu1 %vm207_vm13, %v3452_v7 }
0x163a   :  { %v3477_v9 = vpop.f32.mrf.mxu1 }
0x163b   :  { %v3478_v45 = vadd.f32 %v3644_v56, %v3477_v9 }
0x163d   :  { %3496 = vrot.lane.b32.xlu1 %v3478_v45, %s4174_s14 }
0x1642   :  { %v3479_v55 = vpop.f32.mrf.mxu1 }
0x16af   :  { %v3497_v52 = vpop.permute.xlu1 %3496 }
0x16b0   :  { %3500 = vst.msk [vmem:[%s5942_s16] sm:$0xff] %vm3499_vm2, %v3497_v52 }

</bundles_post_ra>
